<compile_context>
chip_gen: v7x
topology: tpu7x:2x2x1
jax: 0.10.0
libtpu: 0.0.40
codegen_flags: <defaults>
</compile_context>

<pallas_src>
import functools
import math

import jax
import jax.numpy as jnp
import numpy as np
from jax import lax
from jax.experimental import pallas as pl
from jax.experimental.pallas import tpu as pltpu


# ----------------------------------------------------------------------------
# Kernel: one grid step == (one sequence, one attention head).
# ----------------------------------------------------------------------------
def _block_kernel(x_ref, cosq_ref, sinq_ref, cosk_ref, sink_ref,
                  wqkv_ref, wo_ref,
                  g1_ref, be1_ref, g2_ref, be2_ref,
                  w1_ref, c1_ref, w2_ref, c2_ref,
                  o_ref, ln1_sc, acc_sc, *, S, D):
    h_idx = pl.program_id(1)

    def layernorm(t, g, b):                        # f32 elementwise, eps=1e-5
        mu = jnp.mean(t, axis=-1, keepdims=True)
        var = jnp.mean(jnp.square(t - mu), axis=-1, keepdims=True)
        return (t - mu) * lax.rsqrt(var + 1e-5) * g + b

    # ---- once per sequence: LN #1 + attention-output accumulator init ------
    @pl.when(h_idx == 0)
    def _():
        ln = layernorm(x_ref[...], g1_ref[...], be1_ref[...])     # (S, E) f32
        ln1_sc[...] = ln.astype(jnp.bfloat16)
        acc_sc[...] = jnp.zeros_like(acc_sc)

    # ---- this head's attention (pure 2-D tiles) -----------------------------
    qkv = jnp.dot(ln1_sc[...], wqkv_ref[...],
                  preferred_element_type=jnp.float32)             # (S, 3D) f32
    q = qkv[:, :D]
    k = qkv[:, D:2 * D]
    v = qkv[:, 2 * D:].astype(jnp.bfloat16)

    # Rotate-half RoPE on the XLU; sign folded into sin, attn scale folded
    # into the q tables (no extra multiply on the (S, S) scores).
    q = (q * cosq_ref[...] + pltpu.roll(q, D // 2, 1) * sinq_ref[...]
         ).astype(jnp.bfloat16)
    k = (k * cosk_ref[...] + pltpu.roll(k, D // 2, 1) * sink_ref[...]
         ).astype(jnp.bfloat16)

    scores = lax.dot_general(q, k, (((1,), (1,)), ((), ())),
                             preferred_element_type=jnp.float32)  # (S, S) f32
    row = lax.broadcasted_iota(jnp.int32, (S, S), 0)
    col = lax.broadcasted_iota(jnp.int32, (S, S), 1)
    scores = jnp.where(col > row, -1e30, scores)   # finite causal mask (NaN safe)

    m = jnp.max(scores, axis=-1, keepdims=True)
    p = jnp.exp(scores - m)
    l = jnp.sum(p, axis=-1, keepdims=True)
    ctx = jnp.dot(p.astype(jnp.bfloat16), v,
                  preferred_element_type=jnp.float32)             # (S, D) f32
    ctx = ctx * pl.reciprocal(l, approx=True)      # softmax denom on the EUP

    # Per-head W_o, accumulated: W_o(concat_h ctx_h) == sum_h ctx_h @ W_o[h].
    acc_sc[...] += jnp.dot(ctx.astype(jnp.bfloat16), wo_ref[...],
                           preferred_element_type=jnp.float32)    # (S, E) f32

    # ---- once per sequence, after the last head: residuals + MLP -----------
    @pl.when(h_idx == pl.num_programs(1) - 1)
    def _():
        x1 = x_ref[...] + acc_sc[...]                             # residual 1
        h2 = layernorm(x1, g2_ref[...], be2_ref[...])
        m1 = jnp.dot(h2.astype(jnp.bfloat16), w1_ref[...],
                     preferred_element_type=jnp.float32) + c1_ref[...]
        g = 0.5 * m1 * (1.0 + lax.erf(m1 * (1.0 / math.sqrt(2.0))))  # exact GELU
        m2 = jnp.dot(g.astype(jnp.bfloat16), w2_ref[...],
                     preferred_element_type=jnp.float32) + c2_ref[...]
        o_ref[...] = x1 + m2                                      # residual 2


# ----------------------------------------------------------------------------
# Wrapper
# ----------------------------------------------------------------------------
def _vmem_limit_bytes():
    # ~80% of the device's VMEM (v5e/v6e: 128 MiB, v7x: 64 MiB) so Mosaic
    # internal scratch and double-buffered streaming blocks keep headroom.
    try:
        cap = getattr(pltpu.get_tpu_info(), "vmem_capacity_bytes", None)
        if cap:
            return int(min(cap * 0.8, 100 * 1024 * 1024))
    except Exception:
        pass
    return 48 * 1024 * 1024


def transformer_block(x, params, *, n_heads, d_latent):
    B, S, E = x.shape
    H, D = n_heads, d_latent
    assert E == d_latent, "module default config: d_q = d_out = d_latent"
    # Alignment guards (perf-review correctness concern): blocks use the full
    # (S, E) extents, but aligned shapes keep stores unmasked and the per-head
    # qkv lane slices vreg-aligned.  Pad in the caller for other shapes.
    assert E % 128 == 0, f"d_latent/E must be a multiple of 128, got {E}"
    assert S % 8 == 0, f"sequence length must be a multiple of 8, got {S}"

    scale = 1.0 / math.sqrt(d_latent)

    # Rotate-half RoPE tables (base 10000); sign folded into sin, attention
    # scale folded into the q tables.
    pos = jnp.arange(S, dtype=jnp.float32)[:, None]
    inv_freq = 1.0 / (10000.0 ** (jnp.arange(0, D, 2, dtype=jnp.float32) / D))
    ang = pos * inv_freq[None, :]                                   # (S, D/2)
    cos = jnp.concatenate([jnp.cos(ang), jnp.cos(ang)], axis=-1)    # (S, D)
    sin = jnp.concatenate([-jnp.sin(ang), jnp.sin(ang)], axis=-1)   # sign folded
    cos_q, sin_q = cos * scale, sin * scale
    cos_k, sin_k = cos, sin

    bf16 = jnp.bfloat16
    # Per-head weight slabs so each grid step streams only its own head:
    #   wqkv_heads[h] = [W_q_h | W_k_h | W_v_h] : (E, 3D)
    #   wo_heads[h]   = W_o rows for head h     : (D, E)
    wq_h = params["wq"].reshape(E, H, D).transpose(1, 0, 2)
    wk_h = params["wk"].reshape(E, H, D).transpose(1, 0, 2)
    wv_h = params["wv"].reshape(E, H, D).transpose(1, 0, 2)
    wqkv_heads = jnp.concatenate([wq_h, wk_h, wv_h], axis=-1).astype(bf16)  # (H,E,3D)
    wo_heads = params["wo"].reshape(H, D, E).astype(bf16)                   # (H,D,E)
    w1 = params["w1"].astype(bf16)
    w2 = params["w2"].astype(bf16)

    kernel = functools.partial(_block_kernel, S=S, D=D)

    x_spec = pl.BlockSpec((None, S, E), lambda i, h: (i, 0, 0))
    qkv_spec = pl.BlockSpec((None, E, 3 * D), lambda i, h: (h, 0, 0))
    wo_spec = pl.BlockSpec((None, D, E), lambda i, h: (h, 0, 0))
    out_spec = pl.BlockSpec((None, S, E), lambda i, h: (i, 0, 0))

    def build(single_buffer_consts):
        def const(arr):
            # Grid-invariant block: full array, same index every step.
            # Single-buffer it (halves its VMEM) when the build supports it.
            if single_buffer_consts:
                return pl.BlockSpec(arr.shape, lambda i, h: (0,) * arr.ndim,
                                    pipeline_mode=pl.Buffered(1))
            return pl.BlockSpec(arr.shape, lambda i, h: (0,) * arr.ndim)

        return pl.pallas_call(
            kernel,
            out_shape=jax.ShapeDtypeStruct((B, S, E), jnp.float32),
            grid=(B, H),
            in_specs=[
                x_spec,
                const(cos_q), const(sin_q), const(cos_k), const(sin_k),
                qkv_spec, wo_spec,
                const(params["g1"]), const(params["be1"]),
                const(params["g2"]), const(params["be2"]),
                const(w1), const(params["c1"]),
                const(w2), const(params["c2"]),
            ],
            out_specs=out_spec,
            scratch_shapes=[pltpu.VMEM((S, E), bf16),          # LN1(x), reused per head
                            pltpu.VMEM((S, E), jnp.float32)],  # attention accumulator
            compiler_params=pltpu.CompilerParams(
                dimension_semantics=("parallel", "arbitrary"),
                vmem_limit_bytes=_vmem_limit_bytes()),
        )

    args = (x, cos_q, sin_q, cos_k, sin_k, wqkv_heads, wo_heads,
            params["g1"], params["be1"], params["g2"], params["be2"],
            w1, params["c1"], w2, params["c2"])
    try:
        return jax.block_until_ready(build(True)(*args))
    except Exception:
        # Fallback for JAX builds that reject BlockSpec(pipeline_mode=Buffered(1)).
        return jax.block_until_ready(build(False)(*args))


# ----------------------------------------------------------------------------
# Pure-JAX f32 reference (same math) for a correctness check
# ----------------------------------------------------------------------------
def reference(x, params, *, n_heads, d_latent):
    B, S, E = x.shape
    H, D = n_heads, d_latent
    pos = jnp.arange(S, dtype=jnp.float32)[:, None]
    inv_freq = 1.0 / (10000.0 ** (jnp.arange(0, D, 2, dtype=jnp.float32) / D))
    ang = pos * inv_freq[None, :]
    cos = jnp.concatenate([jnp.cos(ang), jnp.cos(ang)], axis=-1)
    sin = jnp.concatenate([jnp.sin(ang), jnp.sin(ang)], axis=-1)

    def ln(t, g, b):
        mu = jnp.mean(t, axis=-1, keepdims=True)
        var = jnp.mean(jnp.square(t - mu), axis=-1, keepdims=True)
        return (t - mu) / jnp.sqrt(var + 1e-5) * g + b

    def rope(t):  # (B, H, S, D), rotate-half
        t_rot = jnp.concatenate([-t[..., D // 2:], t[..., :D // 2]], axis=-1)
        return t * cos + t_rot * sin

    h = ln(x, params["g1"][0], params["be1"][0])
    q = (h @ params["wq"]).reshape(B, S, H, D).transpose(0, 2, 1, 3)
    k = (h @ params["wk"]).reshape(B, S, H, D).transpose(0, 2, 1, 3)
    v = (h @ params["wv"]).reshape(B, S, H, D).transpose(0, 2, 1, 3)
    q, k = rope(q), rope(k)
    scores = jnp.einsum("bhsd,bhtd->bhst", q, k) / math.sqrt(d_latent)
    mask = jnp.triu(jnp.ones((S, S), bool), k=1)
    scores = jnp.where(mask, -jnp.inf, scores)
    probs = jax.nn.softmax(scores, axis=-1)
    attn = jnp.einsum("bhst,bhtd->bhsd", probs, v)
    attn = attn.transpose(0, 2, 1, 3).reshape(B, S, H * D) @ params["wo"]
    x1 = x + attn

    h2 = ln(x1, params["g2"][0], params["be2"][0])
    m = h2 @ params["w1"] + params["c1"][0]
    m = 0.5 * m * (1.0 + lax.erf(m / math.sqrt(2.0)))
    m = m @ params["w2"] + params["c2"][0]
    return x1 + m


# ----------------------------------------------------------------------------
if __name__ == "__main__":
    B, S = 2, 8
    d_latent, n_heads = 128, 4          # E = D = 128 -> lane-dense stores
    E, H, D = d_latent, n_heads, d_latent

    key = jax.random.PRNGKey(0)
    keys = jax.random.split(key, 13)
    init = lambda k, shape: (0.02 * jax.random.normal(k, shape)).astype(jnp.float32)

    params = {
        "wq": init(keys[0], (E, H * D)),
        "wk": init(keys[1], (E, H * D)),
        "wv": init(keys[2], (E, H * D)),
        "wo": init(keys[3], (H * D, E)),
        "g1": jnp.ones((1, E), jnp.float32) + init(keys[4], (1, E)),
        "be1": init(keys[5], (1, E)),
        "g2": jnp.ones((1, E), jnp.float32) + init(keys[6], (1, E)),
        "be2": init(keys[7], (1, E)),
        "w1": init(keys[8], (E, 4 * E)),
        "c1": init(keys[9], (1, 4 * E)),
        "w2": init(keys[10], (4 * E, E)),
        "c2": init(keys[11], (1, E)),
    }
    x = jax.random.normal(keys[12], (B, S, E), dtype=jnp.float32)

    out = transformer_block(x, params, n_heads=n_heads, d_latent=d_latent)
    out = jax.block_until_ready(out)

    ref = reference(x, params, n_heads=n_heads, d_latent=d_latent)
    # Tolerance accounts for bf16 MXU inputs + approx reciprocal in the kernel
    # (reference is pure f32).  Fine for inference; flag before training use.
    np.testing.assert_allclose(np.asarray(out), np.asarray(ref),
                               rtol=2e-2, atol=2e-2)
    print("KERNEL_OK")
</pallas_src>

<mosaic_0001>
module attributes {stable_mosaic.version = 11 : i64} {
  func.func @_block_kernel(%arg0: i32, %arg1: i32, %arg2: memref<1x8x128xf32, #tpu.memory_space<vmem>>, %arg3: memref<8x128xf32, #tpu.memory_space<vmem>>, %arg4: memref<8x128xf32, #tpu.memory_space<vmem>>, %arg5: memref<8x128xf32, #tpu.memory_space<vmem>>, %arg6: memref<8x128xf32, #tpu.memory_space<vmem>>, %arg7: memref<1x128x384xbf16, #tpu.memory_space<vmem>>, %arg8: memref<1x128x128xbf16, #tpu.memory_space<vmem>>, %arg9: memref<1x128xf32, #tpu.memory_space<vmem>>, %arg10: memref<1x128xf32, #tpu.memory_space<vmem>>, %arg11: memref<1x128xf32, #tpu.memory_space<vmem>>, %arg12: memref<1x128xf32, #tpu.memory_space<vmem>>, %arg13: memref<128x512xbf16, #tpu.memory_space<vmem>>, %arg14: memref<1x512xf32, #tpu.memory_space<vmem>>, %arg15: memref<512x128xbf16, #tpu.memory_space<vmem>>, %arg16: memref<1x128xf32, #tpu.memory_space<vmem>>, %arg17: memref<1x8x128xf32, #tpu.memory_space<vmem>>, %arg18: memref<8x128xbf16, #tpu.memory_space<vmem>>, %arg19: memref<8x128xf32, #tpu.memory_space<vmem>>) attributes {dimension_semantics = [#tpu.dimension_semantics<parallel>, #tpu.dimension_semantics<arbitrary>], iteration_bounds = array<i64: 2, 4>, scalar_prefetch = 0 : i64, scratch_operands = 2 : i64, tpu.core_type = #tpu.core_type<tc>, window_params = [{transform_indices = @transform_0, window_bounds = array<i64: 1, 8, 128>}, {pipeline_mode = #tpu.pipeline_mode<synchronous>, transform_indices = @transform_1, window_bounds = array<i64: 8, 128>}, {pipeline_mode = #tpu.pipeline_mode<synchronous>, transform_indices = @transform_2, window_bounds = array<i64: 8, 128>}, {pipeline_mode = #tpu.pipeline_mode<synchronous>, transform_indices = @transform_3, window_bounds = array<i64: 8, 128>}, {pipeline_mode = #tpu.pipeline_mode<synchronous>, transform_indices = @transform_4, window_bounds = array<i64: 8, 128>}, {transform_indices = @transform_5, window_bounds = array<i64: 1, 128, 384>}, {transform_indices = @transform_6, window_bounds = array<i64: 1, 128, 128>}, {pipeline_mode = #tpu.pipeline_mode<synchronous>, transform_indices = @transform_7, window_bounds = array<i64: 1, 128>}, {pipeline_mode = #tpu.pipeline_mode<synchronous>, transform_indices = @transform_8, window_bounds = array<i64: 1, 128>}, {pipeline_mode = #tpu.pipeline_mode<synchronous>, transform_indices = @transform_9, window_bounds = array<i64: 1, 128>}, {pipeline_mode = #tpu.pipeline_mode<synchronous>, transform_indices = @transform_10, window_bounds = array<i64: 1, 128>}, {pipeline_mode = #tpu.pipeline_mode<synchronous>, transform_indices = @transform_11, window_bounds = array<i64: 128, 512>}, {pipeline_mode = #tpu.pipeline_mode<synchronous>, transform_indices = @transform_12, window_bounds = array<i64: 1, 512>}, {pipeline_mode = #tpu.pipeline_mode<synchronous>, transform_indices = @transform_13, window_bounds = array<i64: 512, 128>}, {pipeline_mode = #tpu.pipeline_mode<synchronous>, transform_indices = @transform_14, window_bounds = array<i64: 1, 128>}, {transform_indices = @transform_15, window_bounds = array<i64: 1, 8, 128>}]} {
    %c0_i32 = arith.constant 0 : i32
    %0 = arith.cmpi eq, %arg1, %c0_i32 : i32
    %1 = arith.extui %0 : i1 to i32
    %c0_i32_0 = arith.constant 0 : i32
    %2 = arith.cmpi ne, %1, %c0_i32_0 : i32
    scf.if %2 {
      %c0_28 = arith.constant 0 : index
      %c0_29 = arith.constant 0 : index
      %c0_30 = arith.constant 0 : index
      %53 = vector.load %arg2[%c0_28, %c0_29, %c0_30] : memref<1x8x128xf32, #tpu.memory_space<vmem>>, vector<1x8x128xf32>
      %54 = vector.shape_cast %53 : vector<1x8x128xf32> to vector<8x128xf32>
      %c0_31 = arith.constant 0 : index
      %c0_32 = arith.constant 0 : index
      %55 = vector.load %arg9[%c0_31, %c0_32] : memref<1x128xf32, #tpu.memory_space<vmem>>, vector<1x128xf32>
      %c0_33 = arith.constant 0 : index
      %c0_34 = arith.constant 0 : index
      %56 = vector.load %arg10[%c0_33, %c0_34] : memref<1x128xf32, #tpu.memory_space<vmem>>, vector<1x128xf32>
      %cst_35 = arith.constant dense<0.000000e+00> : vector<8xf32>
      %57 = vector.multi_reduction <add>, %54, %cst_35 [1] : vector<8x128xf32> to vector<8xf32>
      %58 = vector.shape_cast %57 : vector<8xf32> to vector<8x1xf32>
      %cst_36 = arith.constant 1.280000e+02 : f32
      %59 = vector.broadcast %cst_36 : f32 to vector<8x1xf32>
      %60 = arith.divf %58, %59 : vector<8x1xf32>
      %61 = vector.broadcast %60 : vector<8x1xf32> to vector<8x128xf32>
      %62 = arith.subf %54, %61 : vector<8x128xf32>
      %63 = arith.mulf %62, %62 : vector<8x128xf32>
      %cst_37 = arith.constant dense<0.000000e+00> : vector<8xf32>
      %64 = vector.multi_reduction <add>, %63, %cst_37 [1] : vector<8x128xf32> to vector<8xf32>
      %65 = vector.shape_cast %64 : vector<8xf32> to vector<8x1xf32>
      %cst_38 = arith.constant 1.280000e+02 : f32
      %66 = vector.broadcast %cst_38 : f32 to vector<8x1xf32>
      %67 = arith.divf %65, %66 : vector<8x1xf32>
      %68 = vector.broadcast %60 : vector<8x1xf32> to vector<8x128xf32>
      %69 = arith.subf %54, %68 : vector<8x128xf32>
      %cst_39 = arith.constant 9.99999974E-6 : f32
      %70 = vector.broadcast %cst_39 : f32 to vector<8x1xf32>
      %71 = arith.addf %67, %70 : vector<8x1xf32>
      %72 = math.rsqrt %71 : vector<8x1xf32>
      %73 = vector.broadcast %72 : vector<8x1xf32> to vector<8x128xf32>
      %74 = arith.mulf %69, %73 : vector<8x128xf32>
      %75 = vector.broadcast %55 : vector<1x128xf32> to vector<8x128xf32>
      %76 = arith.mulf %74, %75 : vector<8x128xf32>
      %77 = vector.broadcast %56 : vector<1x128xf32> to vector<8x128xf32>
      %78 = arith.addf %76, %77 : vector<8x128xf32>
      %79 = arith.truncf %78 : vector<8x128xf32> to vector<8x128xbf16>
      %c0_40 = arith.constant 0 : index
      %c0_41 = arith.constant 0 : index
      %80 = vector.load %arg18[%c0_40, %c0_41] : memref<8x128xbf16, #tpu.memory_space<vmem>>, vector<8x128xbf16>
      tpu.vector_store %arg18[%c0_40, %c0_41], %79 {strides = array<i32>} : memref<8x128xbf16, #tpu.memory_space<vmem>>, vector<8x128xbf16>,
      %cst_42 = arith.constant 0.000000e+00 : f32
      %81 = vector.broadcast %cst_42 : f32 to vector<8x128xf32>
      %c0_43 = arith.constant 0 : index
      %c0_44 = arith.constant 0 : index
      %82 = vector.load %arg19[%c0_43, %c0_44] : memref<8x128xf32, #tpu.memory_space<vmem>>, vector<8x128xf32>
      tpu.vector_store %arg19[%c0_43, %c0_44], %81 {strides = array<i32>} : memref<8x128xf32, #tpu.memory_space<vmem>>, vector<8x128xf32>,
    } else {
    }
    %c0 = arith.constant 0 : index
    %c0_1 = arith.constant 0 : index
    %3 = vector.load %arg18[%c0, %c0_1] : memref<8x128xbf16, #tpu.memory_space<vmem>>, vector<8x128xbf16>
    %c0_2 = arith.constant 0 : index
    %c0_3 = arith.constant 0 : index
    %c0_4 = arith.constant 0 : index
    %4 = vector.load %arg7[%c0_2, %c0_3, %c0_4] : memref<1x128x384xbf16, #tpu.memory_space<vmem>>, vector<1x128x384xbf16>
    %5 = vector.shape_cast %4 : vector<1x128x384xbf16> to vector<128x384xbf16>
    %cst = arith.constant dense<0.000000e+00> : vector<8x384xf32>
    %6 = tpu.matmul %3, %5, %cst {dimension_numbers = #tpu.dot_dimension_numbers<[1], [0], [0], [1], [0, 0, 1, 1], [], []>} : vector<8x128xbf16>, vector<128x384xbf16>, vector<8x384xf32> -> vector<8x384xf32>
    %7 = vector.extract_strided_slice %6 {offsets = [0, 0], sizes = [8, 128], strides = [1, 1]} : vector<8x384xf32> to vector<8x128xf32>
    %8 = vector.extract_strided_slice %6 {offsets = [0, 128], sizes = [8, 128], strides = [1, 1]} : vector<8x384xf32> to vector<8x128xf32>
    %9 = vector.extract_strided_slice %6 {offsets = [0, 256], sizes = [8, 128], strides = [1, 1]} : vector<8x384xf32> to vector<8x128xf32>
    %10 = arith.truncf %9 : vector<8x128xf32> to vector<8x128xbf16>
    %c0_5 = arith.constant 0 : index
    %c0_6 = arith.constant 0 : index
    %11 = vector.load %arg3[%c0_5, %c0_6] : memref<8x128xf32, #tpu.memory_space<vmem>>, vector<8x128xf32>
    %12 = arith.mulf %7, %11 : vector<8x128xf32>
    %c64_i32 = arith.constant 64 : i32
    %13 = tpu.dynamic_rotate %7 by %c64_i32 dim 1 : vector<8x128xf32>, i32 -> vector<8x128xf32>
    %c0_7 = arith.constant 0 : index
    %c0_8 = arith.constant 0 : index
    %14 = vector.load %arg4[%c0_7, %c0_8] : memref<8x128xf32, #tpu.memory_space<vmem>>, vector<8x128xf32>
    %15 = arith.mulf %13, %14 : vector<8x128xf32>
    %16 = arith.addf %12, %15 : vector<8x128xf32>
    %17 = arith.truncf %16 : vector<8x128xf32> to vector<8x128xbf16>
    %c0_9 = arith.constant 0 : index
    %c0_10 = arith.constant 0 : index
    %18 = vector.load %arg5[%c0_9, %c0_10] : memref<8x128xf32, #tpu.memory_space<vmem>>, vector<8x128xf32>
    %19 = arith.mulf %8, %18 : vector<8x128xf32>
    %c64_i32_11 = arith.constant 64 : i32
    %20 = tpu.dynamic_rotate %8 by %c64_i32_11 dim 1 : vector<8x128xf32>, i32 -> vector<8x128xf32>
    %c0_12 = arith.constant 0 : index
    %c0_13 = arith.constant 0 : index
    %21 = vector.load %arg6[%c0_12, %c0_13] : memref<8x128xf32, #tpu.memory_space<vmem>>, vector<8x128xf32>
    %22 = arith.mulf %20, %21 : vector<8x128xf32>
    %23 = arith.addf %19, %22 : vector<8x128xf32>
    %24 = arith.truncf %23 : vector<8x128xf32> to vector<8x128xbf16>
    %cst_14 = arith.constant dense<0.000000e+00> : vector<8x8xf32>
    %25 = tpu.matmul %17, %24, %cst_14 {dimension_numbers = #tpu.dot_dimension_numbers<[1], [1], [0], [0], [0, 0, 1, 0], [], []>} : vector<8x128xbf16>, vector<8x128xbf16>, vector<8x8xf32> -> vector<8x8xf32>
    %26 = tpu.iota {dimensions = array<i32: 0>} : vector<8x8xi32>
    %27 = tpu.iota {dimensions = array<i32: 1>} : vector<8x8xi32>
    %28 = arith.cmpi sgt, %27, %26 : vector<8x8xi32>
    %cst_15 = arith.constant -1.000000e+30 : f32
    %29 = vector.broadcast %cst_15 : f32 to vector<8x8xf32>
    %30 = arith.select %28, %29, %25 : vector<8x8xi1>, vector<8x8xf32>
    %cst_16 = arith.constant dense<0xFF800000> : vector<8xf32>
    %31 = vector.multi_reduction <maximumf>, %30, %cst_16 [1] : vector<8x8xf32> to vector<8xf32>
    %32 = vector.shape_cast %31 : vector<8xf32> to vector<8x1xf32>
    %33 = vector.broadcast %32 : vector<8x1xf32> to vector<8x8xf32>
    %34 = arith.subf %30, %33 : vector<8x8xf32>
    %35 = math.exp %34 : vector<8x8xf32>
    %cst_17 = arith.constant dense<0.000000e+00> : vector<8xf32>
    %36 = vector.multi_reduction <add>, %35, %cst_17 [1] : vector<8x8xf32> to vector<8xf32>
    %37 = vector.shape_cast %36 : vector<8xf32> to vector<8x1xf32>
    %38 = arith.truncf %35 : vector<8x8xf32> to vector<8x8xbf16>
    %cst_18 = arith.constant dense<0.000000e+00> : vector<8x128xf32>
    %39 = tpu.matmul %38, %10, %cst_18 {dimension_numbers = #tpu.dot_dimension_numbers<[1], [0], [0], [1], [0, 0, 1, 1], [], []>} : vector<8x8xbf16>, vector<8x128xbf16>, vector<8x128xf32> -> vector<8x128xf32>
    %40 = tpu.reciprocal %37 {approx = true} : vector<8x1xf32> -> vector<8x1xf32>
    %41 = vector.broadcast %40 : vector<8x1xf32> to vector<8x128xf32>
    %42 = arith.mulf %39, %41 : vector<8x128xf32>
    %c0_19 = arith.constant 0 : index
    %c0_20 = arith.constant 0 : index
    %43 = vector.load %arg19[%c0_19, %c0_20] : memref<8x128xf32, #tpu.memory_space<vmem>>, vector<8x128xf32>
    %44 = arith.truncf %42 : vector<8x128xf32> to vector<8x128xbf16>
    %c0_21 = arith.constant 0 : index
    %c0_22 = arith.constant 0 : index
    %c0_23 = arith.constant 0 : index
    %45 = vector.load %arg8[%c0_21, %c0_22, %c0_23] : memref<1x128x128xbf16, #tpu.memory_space<vmem>>, vector<1x128x128xbf16>
    %46 = vector.shape_cast %45 : vector<1x128x128xbf16> to vector<128x128xbf16>
    %cst_24 = arith.constant dense<0.000000e+00> : vector<8x128xf32>
    %47 = tpu.matmul %44, %46, %cst_24 {dimension_numbers = #tpu.dot_dimension_numbers<[1], [0], [0], [1], [0, 0, 1, 1], [], []>} : vector<8x128xbf16>, vector<128x128xbf16>, vector<8x128xf32> -> vector<8x128xf32>
    %48 = arith.addf %43, %47 : vector<8x128xf32>
    %c0_25 = arith.constant 0 : index
    %c0_26 = arith.constant 0 : index
    %49 = vector.load %arg19[%c0_25, %c0_26] : memref<8x128xf32, #tpu.memory_space<vmem>>, vector<8x128xf32>
    tpu.vector_store %arg19[%c0_25, %c0_26], %48 {strides = array<i32>} : memref<8x128xf32, #tpu.memory_space<vmem>>, vector<8x128xf32>,
    %c3_i32 = arith.constant 3 : i32
    %50 = arith.cmpi eq, %arg1, %c3_i32 : i32
    %51 = arith.extui %50 : i1 to i32
    %c0_i32_27 = arith.constant 0 : i32
    %52 = arith.cmpi ne, %51, %c0_i32_27 : i32
    scf.if %52 {
      %c0_28 = arith.constant 0 : index
      %c0_29 = arith.constant 0 : index
      %c0_30 = arith.constant 0 : index
      %53 = vector.load %arg2[%c0_28, %c0_29, %c0_30] : memref<1x8x128xf32, #tpu.memory_space<vmem>>, vector<1x8x128xf32>
      %54 = vector.shape_cast %53 : vector<1x8x128xf32> to vector<8x128xf32>
      %c0_31 = arith.constant 0 : index
      %c0_32 = arith.constant 0 : index
      %55 = vector.load %arg19[%c0_31, %c0_32] : memref<8x128xf32, #tpu.memory_space<vmem>>, vector<8x128xf32>
      %56 = arith.addf %54, %55 : vector<8x128xf32>
      %c0_33 = arith.constant 0 : index
      %c0_34 = arith.constant 0 : index
      %57 = vector.load %arg11[%c0_33, %c0_34] : memref<1x128xf32, #tpu.memory_space<vmem>>, vector<1x128xf32>
      %c0_35 = arith.constant 0 : index
      %c0_36 = arith.constant 0 : index
      %58 = vector.load %arg12[%c0_35, %c0_36] : memref<1x128xf32, #tpu.memory_space<vmem>>, vector<1x128xf32>
      %cst_37 = arith.constant dense<0.000000e+00> : vector<8xf32>
      %59 = vector.multi_reduction <add>, %56, %cst_37 [1] : vector<8x128xf32> to vector<8xf32>
      %60 = vector.shape_cast %59 : vector<8xf32> to vector<8x1xf32>
      %cst_38 = arith.constant 1.280000e+02 : f32
      %61 = vector.broadcast %cst_38 : f32 to vector<8x1xf32>
      %62 = arith.divf %60, %61 : vector<8x1xf32>
      %63 = vector.broadcast %62 : vector<8x1xf32> to vector<8x128xf32>
      %64 = arith.subf %56, %63 : vector<8x128xf32>
      %65 = arith.mulf %64, %64 : vector<8x128xf32>
      %cst_39 = arith.constant dense<0.000000e+00> : vector<8xf32>
      %66 = vector.multi_reduction <add>, %65, %cst_39 [1] : vector<8x128xf32> to vector<8xf32>
      %67 = vector.shape_cast %66 : vector<8xf32> to vector<8x1xf32>
      %cst_40 = arith.constant 1.280000e+02 : f32
      %68 = vector.broadcast %cst_40 : f32 to vector<8x1xf32>
      %69 = arith.divf %67, %68 : vector<8x1xf32>
      %70 = vector.broadcast %62 : vector<8x1xf32> to vector<8x128xf32>
      %71 = arith.subf %56, %70 : vector<8x128xf32>
      %cst_41 = arith.constant 9.99999974E-6 : f32
      %72 = vector.broadcast %cst_41 : f32 to vector<8x1xf32>
      %73 = arith.addf %69, %72 : vector<8x1xf32>
      %74 = math.rsqrt %73 : vector<8x1xf32>
      %75 = vector.broadcast %74 : vector<8x1xf32> to vector<8x128xf32>
      %76 = arith.mulf %71, %75 : vector<8x128xf32>
      %77 = vector.broadcast %57 : vector<1x128xf32> to vector<8x128xf32>
      %78 = arith.mulf %76, %77 : vector<8x128xf32>
      %79 = vector.broadcast %58 : vector<1x128xf32> to vector<8x128xf32>
      %80 = arith.addf %78, %79 : vector<8x128xf32>
      %81 = arith.truncf %80 : vector<8x128xf32> to vector<8x128xbf16>
      %c0_42 = arith.constant 0 : index
      %c0_43 = arith.constant 0 : index
      %82 = vector.load %arg13[%c0_42, %c0_43] : memref<128x512xbf16, #tpu.memory_space<vmem>>, vector<128x512xbf16>
      %cst_44 = arith.constant dense<0.000000e+00> : vector<8x512xf32>
      %83 = tpu.matmul %81, %82, %cst_44 {dimension_numbers = #tpu.dot_dimension_numbers<[1], [0], [0], [1], [0, 0, 1, 1], [], []>} : vector<8x128xbf16>, vector<128x512xbf16>, vector<8x512xf32> -> vector<8x512xf32>
      %c0_45 = arith.constant 0 : index
      %c0_46 = arith.constant 0 : index
      %84 = vector.load %arg14[%c0_45, %c0_46] : memref<1x512xf32, #tpu.memory_space<vmem>>, vector<1x512xf32>
      %85 = vector.broadcast %84 : vector<1x512xf32> to vector<8x512xf32>
      %86 = arith.addf %83, %85 : vector<8x512xf32>
      %cst_47 = arith.constant 5.000000e-01 : f32
      %87 = vector.broadcast %cst_47 : f32 to vector<8x512xf32>
      %88 = arith.mulf %87, %86 : vector<8x512xf32>
      %cst_48 = arith.constant 0.707106769 : f32
      %89 = vector.broadcast %cst_48 : f32 to vector<8x512xf32>
      %90 = arith.mulf %86, %89 : vector<8x512xf32>
      %91 = math.erf %90 : vector<8x512xf32>
      %cst_49 = arith.constant 1.000000e+00 : f32
      %92 = vector.broadcast %cst_49 : f32 to vector<8x512xf32>
      %93 = arith.addf %92, %91 : vector<8x512xf32>
      %94 = arith.mulf %88, %93 : vector<8x512xf32>
      %95 = arith.truncf %94 : vector<8x512xf32> to vector<8x512xbf16>
      %c0_50 = arith.constant 0 : index
      %c0_51 = arith.constant 0 : index
      %96 = vector.load %arg15[%c0_50, %c0_51] : memref<512x128xbf16, #tpu.memory_space<vmem>>, vector<512x128xbf16>
      %cst_52 = arith.constant dense<0.000000e+00> : vector<8x128xf32>
      %97 = tpu.matmul %95, %96, %cst_52 {dimension_numbers = #tpu.dot_dimension_numbers<[1], [0], [0], [1], [0, 0, 1, 1], [], []>} : vector<8x512xbf16>, vector<512x128xbf16>, vector<8x128xf32> -> vector<8x128xf32>
      %c0_53 = arith.constant 0 : index
      %c0_54 = arith.constant 0 : index
      %98 = vector.load %arg16[%c0_53, %c0_54] : memref<1x128xf32, #tpu.memory_space<vmem>>, vector<1x128xf32>
      %99 = vector.broadcast %98 : vector<1x128xf32> to vector<8x128xf32>
      %100 = arith.addf %97, %99 : vector<8x128xf32>
      %101 = arith.addf %56, %100 : vector<8x128xf32>
      %c0_55 = arith.constant 0 : index
      %c0_56 = arith.constant 0 : index
      %c0_57 = arith.constant 0 : index
      %102 = vector.load %arg17[%c0_55, %c0_56, %c0_57] : memref<1x8x128xf32, #tpu.memory_space<vmem>>, vector<1x8x128xf32>
      %103 = vector.shape_cast %102 : vector<1x8x128xf32> to vector<8x128xf32>
      %104 = vector.shape_cast %101 : vector<8x128xf32> to vector<1x8x128xf32>
      tpu.vector_store %arg17[%c0_55, %c0_56, %c0_57], %104 {strides = array<i32>} : memref<1x8x128xf32, #tpu.memory_space<vmem>>, vector<1x8x128xf32>,
    } else {
    }
    return
  }
  func.func @transform_0(%arg0: i32, %arg1: i32) -> (i32, i32, i32) {
    %c0_i32 = arith.constant 0 : i32
    %c0_i32_0 = arith.constant 0 : i32
    %c0_i32_1 = arith.constant 0 : i32
    return %arg0, %c0_i32, %c0_i32_0 : i32, i32, i32
  }
  func.func @transform_1(%arg0: i32, %arg1: i32) -> (i32, i32) {
    %c0_i32 = arith.constant 0 : i32
    %c0_i32_0 = arith.constant 0 : i32
    %c0_i32_1 = arith.constant 0 : i32
    return %c0_i32, %c0_i32_0 : i32, i32
  }
  func.func @transform_2(%arg0: i32, %arg1: i32) -> (i32, i32) {
    %c0_i32 = arith.constant 0 : i32
    %c0_i32_0 = arith.constant 0 : i32
    %c0_i32_1 = arith.constant 0 : i32
    return %c0_i32, %c0_i32_0 : i32, i32
  }
  func.func @transform_3(%arg0: i32, %arg1: i32) -> (i32, i32) {
    %c0_i32 = arith.constant 0 : i32
    %c0_i32_0 = arith.constant 0 : i32
    %c0_i32_1 = arith.constant 0 : i32
    return %c0_i32, %c0_i32_0 : i32, i32
  }
  func.func @transform_4(%arg0: i32, %arg1: i32) -> (i32, i32) {
    %c0_i32 = arith.constant 0 : i32
    %c0_i32_0 = arith.constant 0 : i32
    %c0_i32_1 = arith.constant 0 : i32
    return %c0_i32, %c0_i32_0 : i32, i32
  }
  func.func @transform_5(%arg0: i32, %arg1: i32) -> (i32, i32, i32) {
    %c0_i32 = arith.constant 0 : i32
    %c0_i32_0 = arith.constant 0 : i32
    %c0_i32_1 = arith.constant 0 : i32
    return %arg1, %c0_i32, %c0_i32_0 : i32, i32, i32
  }
  func.func @transform_6(%arg0: i32, %arg1: i32) -> (i32, i32, i32) {
    %c0_i32 = arith.constant 0 : i32
    %c0_i32_0 = arith.constant 0 : i32
    %c0_i32_1 = arith.constant 0 : i32
    return %arg1, %c0_i32, %c0_i32_0 : i32, i32, i32
  }
  func.func @transform_7(%arg0: i32, %arg1: i32) -> (i32, i32) {
    %c0_i32 = arith.constant 0 : i32
    %c0_i32_0 = arith.constant 0 : i32
    %c0_i32_1 = arith.constant 0 : i32
    return %c0_i32, %c0_i32_0 : i32, i32
  }
  func.func @transform_8(%arg0: i32, %arg1: i32) -> (i32, i32) {
    %c0_i32 = arith.constant 0 : i32
    %c0_i32_0 = arith.constant 0 : i32
    %c0_i32_1 = arith.constant 0 : i32
    return %c0_i32, %c0_i32_0 : i32, i32
  }
  func.func @transform_9(%arg0: i32, %arg1: i32) -> (i32, i32) {
    %c0_i32 = arith.constant 0 : i32
    %c0_i32_0 = arith.constant 0 : i32
    %c0_i32_1 = arith.constant 0 : i32
    return %c0_i32, %c0_i32_0 : i32, i32
  }
  func.func @transform_10(%arg0: i32, %arg1: i32) -> (i32, i32) {
    %c0_i32 = arith.constant 0 : i32
    %c0_i32_0 = arith.constant 0 : i32
    %c0_i32_1 = arith.constant 0 : i32
    return %c0_i32, %c0_i32_0 : i32, i32
  }
  func.func @transform_11(%arg0: i32, %arg1: i32) -> (i32, i32) {
    %c0_i32 = arith.constant 0 : i32
    %c0_i32_0 = arith.constant 0 : i32
    %c0_i32_1 = arith.constant 0 : i32
    return %c0_i32, %c0_i32_0 : i32, i32
  }
  func.func @transform_12(%arg0: i32, %arg1: i32) -> (i32, i32) {
    %c0_i32 = arith.constant 0 : i32
    %c0_i32_0 = arith.constant 0 : i32
    %c0_i32_1 = arith.constant 0 : i32
    return %c0_i32, %c0_i32_0 : i32, i32
  }
  func.func @transform_13(%arg0: i32, %arg1: i32) -> (i32, i32) {
    %c0_i32 = arith.constant 0 : i32
    %c0_i32_0 = arith.constant 0 : i32
    %c0_i32_1 = arith.constant 0 : i32
    return %c0_i32, %c0_i32_0 : i32, i32
  }
  func.func @transform_14(%arg0: i32, %arg1: i32) -> (i32, i32) {
    %c0_i32 = arith.constant 0 : i32
    %c0_i32_0 = arith.constant 0 : i32
    %c0_i32_1 = arith.constant 0 : i32
    return %c0_i32, %c0_i32_0 : i32, i32
  }
  func.func @transform_15(%arg0: i32, %arg1: i32) -> (i32, i32, i32) {
    %c0_i32 = arith.constant 0 : i32
    %c0_i32_0 = arith.constant 0 : i32
    %c0_i32_1 = arith.constant 0 : i32
    return %arg0, %c0_i32, %c0_i32_0 : i32, i32, i32
  }
}

module attributes {stable_mosaic.version = 11 : i64} {
  func.func @_block_kernel(%arg0: i32, %arg1: i32, %arg2: memref<1x8x128xf32, #tpu.memory_space<vmem>>, %arg3: memref<8x128xf32, #tpu.memory_space<vmem>>, %arg4: memref<8x128xf32, #tpu.memory_space<vmem>>, %arg5: memref<8x128xf32, #tpu.memory_space<vmem>>, %arg6: memref<8x128xf32, #tpu.memory_space<vmem>>, %arg7: memref<1x128x384xbf16, #tpu.memory_space<vmem>>, %arg8: memref<1x128x128xbf16, #tpu.memory_space<vmem>>, %arg9: memref<1x128xf32, #tpu.memory_space<vmem>>, %arg10: memref<1x128xf32, #tpu.memory_space<vmem>>, %arg11: memref<1x128xf32, #tpu.memory_space<vmem>>, %arg12: memref<1x128xf32, #tpu.memory_space<vmem>>, %arg13: memref<128x512xbf16, #tpu.memory_space<vmem>>, %arg14: memref<1x512xf32, #tpu.memory_space<vmem>>, %arg15: memref<512x128xbf16, #tpu.memory_space<vmem>>, %arg16: memref<1x128xf32, #tpu.memory_space<vmem>>, %arg17: memref<1x8x128xf32, #tpu.memory_space<vmem>>, %arg18: memref<8x128xbf16, #tpu.memory_space<vmem>>, %arg19: memref<8x128xf32, #tpu.memory_space<vmem>>) attributes {dimension_semantics = [#tpu.dimension_semantics<parallel>, #tpu.dimension_semantics<arbitrary>], iteration_bounds = array<i64: 2, 4>, scalar_prefetch = 0 : i64, scratch_operands = 2 : i64, tpu.core_type = #tpu.core_type<tc>, window_params = [{transform_indices = @transform_0, window_bounds = array<i64: 1, 8, 128>}, {pipeline_mode = #tpu.pipeline_mode<synchronous>, transform_indices = @transform_1, window_bounds = array<i64: 8, 128>}, {pipeline_mode = #tpu.pipeline_mode<synchronous>, transform_indices = @transform_2, window_bounds = array<i64: 8, 128>}, {pipeline_mode = #tpu.pipeline_mode<synchronous>, transform_indices = @transform_3, window_bounds = array<i64: 8, 128>}, {pipeline_mode = #tpu.pipeline_mode<synchronous>, transform_indices = @transform_4, window_bounds = array<i64: 8, 128>}, {transform_indices = @transform_5, window_bounds = array<i64: 1, 128, 384>}, {transform_indices = @transform_6, window_bounds = array<i64: 1, 128, 128>}, {pipeline_mode = #tpu.pipeline_mode<synchronous>, transform_indices = @transform_7, window_bounds = array<i64: 1, 128>}, {pipeline_mode = #tpu.pipeline_mode<synchronous>, transform_indices = @transform_8, window_bounds = array<i64: 1, 128>}, {pipeline_mode = #tpu.pipeline_mode<synchronous>, transform_indices = @transform_9, window_bounds = array<i64: 1, 128>}, {pipeline_mode = #tpu.pipeline_mode<synchronous>, transform_indices = @transform_10, window_bounds = array<i64: 1, 128>}, {pipeline_mode = #tpu.pipeline_mode<synchronous>, transform_indices = @transform_11, window_bounds = array<i64: 128, 512>}, {pipeline_mode = #tpu.pipeline_mode<synchronous>, transform_indices = @transform_12, window_bounds = array<i64: 1, 512>}, {pipeline_mode = #tpu.pipeline_mode<synchronous>, transform_indices = @transform_13, window_bounds = array<i64: 512, 128>}, {pipeline_mode = #tpu.pipeline_mode<synchronous>, transform_indices = @transform_14, window_bounds = array<i64: 1, 128>}, {transform_indices = @transform_15, window_bounds = array<i64: 1, 8, 128>}]} {
    %c0_i32 = arith.constant 0 : i32
    %0 = arith.cmpi eq, %arg1, %c0_i32 : i32
    %1 = arith.extui %0 : i1 to i32
    %c0_i32_0 = arith.constant 0 : i32
    %2 = arith.cmpi ne, %1, %c0_i32_0 : i32
    scf.if %2 {
      %c0_28 = arith.constant 0 : index
      %c0_29 = arith.constant 0 : index
      %c0_30 = arith.constant 0 : index
      %53 = vector.load %arg2[%c0_28, %c0_29, %c0_30] : memref<1x8x128xf32, #tpu.memory_space<vmem>>, vector<1x8x128xf32>
      %54 = vector.shape_cast %53 : vector<1x8x128xf32> to vector<8x128xf32>
      %c0_31 = arith.constant 0 : index
      %c0_32 = arith.constant 0 : index
      %55 = vector.load %arg9[%c0_31, %c0_32] : memref<1x128xf32, #tpu.memory_space<vmem>>, vector<1x128xf32>
      %c0_33 = arith.constant 0 : index
      %c0_34 = arith.constant 0 : index
      %56 = vector.load %arg10[%c0_33, %c0_34] : memref<1x128xf32, #tpu.memory_space<vmem>>, vector<1x128xf32>
      %cst_35 = arith.constant dense<0.000000e+00> : vector<8xf32>
      %57 = vector.multi_reduction <add>, %54, %cst_35 [1] : vector<8x128xf32> to vector<8xf32>
      %58 = vector.shape_cast %57 : vector<8xf32> to vector<8x1xf32>
      %cst_36 = arith.constant 1.280000e+02 : f32
      %59 = vector.broadcast %cst_36 : f32 to vector<8x1xf32>
      %60 = arith.divf %58, %59 : vector<8x1xf32>
      %61 = vector.broadcast %60 : vector<8x1xf32> to vector<8x128xf32>
      %62 = arith.subf %54, %61 : vector<8x128xf32>
      %63 = arith.mulf %62, %62 : vector<8x128xf32>
      %cst_37 = arith.constant dense<0.000000e+00> : vector<8xf32>
      %64 = vector.multi_reduction <add>, %63, %cst_37 [1] : vector<8x128xf32> to vector<8xf32>
      %65 = vector.shape_cast %64 : vector<8xf32> to vector<8x1xf32>
      %cst_38 = arith.constant 1.280000e+02 : f32
      %66 = vector.broadcast %cst_38 : f32 to vector<8x1xf32>
      %67 = arith.divf %65, %66 : vector<8x1xf32>
      %68 = vector.broadcast %60 : vector<8x1xf32> to vector<8x128xf32>
      %69 = arith.subf %54, %68 : vector<8x128xf32>
      %cst_39 = arith.constant 9.99999974E-6 : f32
      %70 = vector.broadcast %cst_39 : f32 to vector<8x1xf32>
      %71 = arith.addf %67, %70 : vector<8x1xf32>
      %72 = math.rsqrt %71 : vector<8x1xf32>
      %73 = vector.broadcast %72 : vector<8x1xf32> to vector<8x128xf32>
      %74 = arith.mulf %69, %73 : vector<8x128xf32>
      %75 = vector.broadcast %55 : vector<1x128xf32> to vector<8x128xf32>
      %76 = arith.mulf %74, %75 : vector<8x128xf32>
      %77 = vector.broadcast %56 : vector<1x128xf32> to vector<8x128xf32>
      %78 = arith.addf %76, %77 : vector<8x128xf32>
      %79 = arith.truncf %78 : vector<8x128xf32> to vector<8x128xbf16>
      %c0_40 = arith.constant 0 : index
      %c0_41 = arith.constant 0 : index
      %80 = vector.load %arg18[%c0_40, %c0_41] : memref<8x128xbf16, #tpu.memory_space<vmem>>, vector<8x128xbf16>
      tpu.vector_store %arg18[%c0_40, %c0_41], %79 {strides = array<i32>} : memref<8x128xbf16, #tpu.memory_space<vmem>>, vector<8x128xbf16>,
      %cst_42 = arith.constant 0.000000e+00 : f32
      %81 = vector.broadcast %cst_42 : f32 to vector<8x128xf32>
      %c0_43 = arith.constant 0 : index
      %c0_44 = arith.constant 0 : index
      %82 = vector.load %arg19[%c0_43, %c0_44] : memref<8x128xf32, #tpu.memory_space<vmem>>, vector<8x128xf32>
      tpu.vector_store %arg19[%c0_43, %c0_44], %81 {strides = array<i32>} : memref<8x128xf32, #tpu.memory_space<vmem>>, vector<8x128xf32>,
    } else {
    }
    %c0 = arith.constant 0 : index
    %c0_1 = arith.constant 0 : index
    %3 = vector.load %arg18[%c0, %c0_1] : memref<8x128xbf16, #tpu.memory_space<vmem>>, vector<8x128xbf16>
    %c0_2 = arith.constant 0 : index
    %c0_3 = arith.constant 0 : index
    %c0_4 = arith.constant 0 : index
    %4 = vector.load %arg7[%c0_2, %c0_3, %c0_4] : memref<1x128x384xbf16, #tpu.memory_space<vmem>>, vector<1x128x384xbf16>
    %5 = vector.shape_cast %4 : vector<1x128x384xbf16> to vector<128x384xbf16>
    %cst = arith.constant dense<0.000000e+00> : vector<8x384xf32>
    %6 = tpu.matmul %3, %5, %cst {dimension_numbers = #tpu.dot_dimension_numbers<[1], [0], [0], [1], [0, 0, 1, 1], [], []>} : vector<8x128xbf16>, vector<128x384xbf16>, vector<8x384xf32> -> vector<8x384xf32>
    %7 = vector.extract_strided_slice %6 {offsets = [0, 0], sizes = [8, 128], strides = [1, 1]} : vector<8x384xf32> to vector<8x128xf32>
    %8 = vector.extract_strided_slice %6 {offsets = [0, 128], sizes = [8, 128], strides = [1, 1]} : vector<8x384xf32> to vector<8x128xf32>
    %9 = vector.extract_strided_slice %6 {offsets = [0, 256], sizes = [8, 128], strides = [1, 1]} : vector<8x384xf32> to vector<8x128xf32>
    %10 = arith.truncf %9 : vector<8x128xf32> to vector<8x128xbf16>
    %c0_5 = arith.constant 0 : index
    %c0_6 = arith.constant 0 : index
    %11 = vector.load %arg3[%c0_5, %c0_6] : memref<8x128xf32, #tpu.memory_space<vmem>>, vector<8x128xf32>
    %12 = arith.mulf %7, %11 : vector<8x128xf32>
    %c64_i32 = arith.constant 64 : i32
    %13 = tpu.dynamic_rotate %7 by %c64_i32 dim 1 : vector<8x128xf32>, i32 -> vector<8x128xf32>
    %c0_7 = arith.constant 0 : index
    %c0_8 = arith.constant 0 : index
    %14 = vector.load %arg4[%c0_7, %c0_8] : memref<8x128xf32, #tpu.memory_space<vmem>>, vector<8x128xf32>
    %15 = arith.mulf %13, %14 : vector<8x128xf32>
    %16 = arith.addf %12, %15 : vector<8x128xf32>
    %17 = arith.truncf %16 : vector<8x128xf32> to vector<8x128xbf16>
    %c0_9 = arith.constant 0 : index
    %c0_10 = arith.constant 0 : index
    %18 = vector.load %arg5[%c0_9, %c0_10] : memref<8x128xf32, #tpu.memory_space<vmem>>, vector<8x128xf32>
    %19 = arith.mulf %8, %18 : vector<8x128xf32>
    %c64_i32_11 = arith.constant 64 : i32
    %20 = tpu.dynamic_rotate %8 by %c64_i32_11 dim 1 : vector<8x128xf32>, i32 -> vector<8x128xf32>
    %c0_12 = arith.constant 0 : index
    %c0_13 = arith.constant 0 : index
    %21 = vector.load %arg6[%c0_12, %c0_13] : memref<8x128xf32, #tpu.memory_space<vmem>>, vector<8x128xf32>
    %22 = arith.mulf %20, %21 : vector<8x128xf32>
    %23 = arith.addf %19, %22 : vector<8x128xf32>
    %24 = arith.truncf %23 : vector<8x128xf32> to vector<8x128xbf16>
    %cst_14 = arith.constant dense<0.000000e+00> : vector<8x8xf32>
    %25 = tpu.matmul %17, %24, %cst_14 {dimension_numbers = #tpu.dot_dimension_numbers<[1], [1], [0], [0], [0, 0, 1, 0], [], []>} : vector<8x128xbf16>, vector<8x128xbf16>, vector<8x8xf32> -> vector<8x8xf32>
    %26 = tpu.iota {dimensions = array<i32: 0>} : vector<8x8xi32>
    %27 = tpu.iota {dimensions = array<i32: 1>} : vector<8x8xi32>
    %28 = arith.cmpi sgt, %27, %26 : vector<8x8xi32>
    %cst_15 = arith.constant -1.000000e+30 : f32
    %29 = vector.broadcast %cst_15 : f32 to vector<8x8xf32>
    %30 = arith.select %28, %29, %25 : vector<8x8xi1>, vector<8x8xf32>
    %cst_16 = arith.constant dense<0xFF800000> : vector<8xf32>
    %31 = vector.multi_reduction <maximumf>, %30, %cst_16 [1] : vector<8x8xf32> to vector<8xf32>
    %32 = vector.shape_cast %31 : vector<8xf32> to vector<8x1xf32>
    %33 = vector.broadcast %32 : vector<8x1xf32> to vector<8x8xf32>
    %34 = arith.subf %30, %33 : vector<8x8xf32>
    %35 = math.exp %34 : vector<8x8xf32>
    %cst_17 = arith.constant dense<0.000000e+00> : vector<8xf32>
    %36 = vector.multi_reduction <add>, %35, %cst_17 [1] : vector<8x8xf32> to vector<8xf32>
    %37 = vector.shape_cast %36 : vector<8xf32> to vector<8x1xf32>
    %38 = arith.truncf %35 : vector<8x8xf32> to vector<8x8xbf16>
    %cst_18 = arith.constant dense<0.000000e+00> : vector<8x128xf32>
    %39 = tpu.matmul %38, %10, %cst_18 {dimension_numbers = #tpu.dot_dimension_numbers<[1], [0], [0], [1], [0, 0, 1, 1], [], []>} : vector<8x8xbf16>, vector<8x128xbf16>, vector<8x128xf32> -> vector<8x128xf32>
    %40 = tpu.reciprocal %37 {approx = true} : vector<8x1xf32> -> vector<8x1xf32>
    %41 = vector.broadcast %40 : vector<8x1xf32> to vector<8x128xf32>
    %42 = arith.mulf %39, %41 : vector<8x128xf32>
    %c0_19 = arith.constant 0 : index
    %c0_20 = arith.constant 0 : index
    %43 = vector.load %arg19[%c0_19, %c0_20] : memref<8x128xf32, #tpu.memory_space<vmem>>, vector<8x128xf32>
    %44 = arith.truncf %42 : vector<8x128xf32> to vector<8x128xbf16>
    %c0_21 = arith.constant 0 : index
    %c0_22 = arith.constant 0 : index
    %c0_23 = arith.constant 0 : index
    %45 = vector.load %arg8[%c0_21, %c0_22, %c0_23] : memref<1x128x128xbf16, #tpu.memory_space<vmem>>, vector<1x128x128xbf16>
    %46 = vector.shape_cast %45 : vector<1x128x128xbf16> to vector<128x128xbf16>
    %cst_24 = arith.constant dense<0.000000e+00> : vector<8x128xf32>
    %47 = tpu.matmul %44, %46, %cst_24 {dimension_numbers = #tpu.dot_dimension_numbers<[1], [0], [0], [1], [0, 0, 1, 1], [], []>} : vector<8x128xbf16>, vector<128x128xbf16>, vector<8x128xf32> -> vector<8x128xf32>
    %48 = arith.addf %43, %47 : vector<8x128xf32>
    %c0_25 = arith.constant 0 : index
    %c0_26 = arith.constant 0 : index
    %49 = vector.load %arg19[%c0_25, %c0_26] : memref<8x128xf32, #tpu.memory_space<vmem>>, vector<8x128xf32>
    tpu.vector_store %arg19[%c0_25, %c0_26], %48 {strides = array<i32>} : memref<8x128xf32, #tpu.memory_space<vmem>>, vector<8x128xf32>,
    %c3_i32 = arith.constant 3 : i32
    %50 = arith.cmpi eq, %arg1, %c3_i32 : i32
    %51 = arith.extui %50 : i1 to i32
    %c0_i32_27 = arith.constant 0 : i32
    %52 = arith.cmpi ne, %51, %c0_i32_27 : i32
    scf.if %52 {
      %c0_28 = arith.constant 0 : index
      %c0_29 = arith.constant 0 : index
      %c0_30 = arith.constant 0 : index
      %53 = vector.load %arg2[%c0_28, %c0_29, %c0_30] : memref<1x8x128xf32, #tpu.memory_space<vmem>>, vector<1x8x128xf32>
      %54 = vector.shape_cast %53 : vector<1x8x128xf32> to vector<8x128xf32>
      %c0_31 = arith.constant 0 : index
      %c0_32 = arith.constant 0 : index
      %55 = vector.load %arg19[%c0_31, %c0_32] : memref<8x128xf32, #tpu.memory_space<vmem>>, vector<8x128xf32>
      %56 = arith.addf %54, %55 : vector<8x128xf32>
      %c0_33 = arith.constant 0 : index
      %c0_34 = arith.constant 0 : index
      %57 = vector.load %arg11[%c0_33, %c0_34] : memref<1x128xf32, #tpu.memory_space<vmem>>, vector<1x128xf32>
      %c0_35 = arith.constant 0 : index
      %c0_36 = arith.constant 0 : index
      %58 = vector.load %arg12[%c0_35, %c0_36] : memref<1x128xf32, #tpu.memory_space<vmem>>, vector<1x128xf32>
      %cst_37 = arith.constant dense<0.000000e+00> : vector<8xf32>
      %59 = vector.multi_reduction <add>, %56, %cst_37 [1] : vector<8x128xf32> to vector<8xf32>
      %60 = vector.shape_cast %59 : vector<8xf32> to vector<8x1xf32>
      %cst_38 = arith.constant 1.280000e+02 : f32
      %61 = vector.broadcast %cst_38 : f32 to vector<8x1xf32>
      %62 = arith.divf %60, %61 : vector<8x1xf32>
      %63 = vector.broadcast %62 : vector<8x1xf32> to vector<8x128xf32>
      %64 = arith.subf %56, %63 : vector<8x128xf32>
      %65 = arith.mulf %64, %64 : vector<8x128xf32>
      %cst_39 = arith.constant dense<0.000000e+00> : vector<8xf32>
      %66 = vector.multi_reduction <add>, %65, %cst_39 [1] : vector<8x128xf32> to vector<8xf32>
      %67 = vector.shape_cast %66 : vector<8xf32> to vector<8x1xf32>
      %cst_40 = arith.constant 1.280000e+02 : f32
      %68 = vector.broadcast %cst_40 : f32 to vector<8x1xf32>
      %69 = arith.divf %67, %68 : vector<8x1xf32>
      %70 = vector.broadcast %62 : vector<8x1xf32> to vector<8x128xf32>
      %71 = arith.subf %56, %70 : vector<8x128xf32>
      %cst_41 = arith.constant 9.99999974E-6 : f32
      %72 = vector.broadcast %cst_41 : f32 to vector<8x1xf32>
      %73 = arith.addf %69, %72 : vector<8x1xf32>
      %74 = math.rsqrt %73 : vector<8x1xf32>
      %75 = vector.broadcast %74 : vector<8x1xf32> to vector<8x128xf32>
      %76 = arith.mulf %71, %75 : vector<8x128xf32>
      %77 = vector.broadcast %57 : vector<1x128xf32> to vector<8x128xf32>
      %78 = arith.mulf %76, %77 : vector<8x128xf32>
      %79 = vector.broadcast %58 : vector<1x128xf32> to vector<8x128xf32>
      %80 = arith.addf %78, %79 : vector<8x128xf32>
      %81 = arith.truncf %80 : vector<8x128xf32> to vector<8x128xbf16>
      %c0_42 = arith.constant 0 : index
      %c0_43 = arith.constant 0 : index
      %82 = vector.load %arg13[%c0_42, %c0_43] : memref<128x512xbf16, #tpu.memory_space<vmem>>, vector<128x512xbf16>
      %cst_44 = arith.constant dense<0.000000e+00> : vector<8x512xf32>
      %83 = tpu.matmul %81, %82, %cst_44 {dimension_numbers = #tpu.dot_dimension_numbers<[1], [0], [0], [1], [0, 0, 1, 1], [], []>} : vector<8x128xbf16>, vector<128x512xbf16>, vector<8x512xf32> -> vector<8x512xf32>
      %c0_45 = arith.constant 0 : index
      %c0_46 = arith.constant 0 : index
      %84 = vector.load %arg14[%c0_45, %c0_46] : memref<1x512xf32, #tpu.memory_space<vmem>>, vector<1x512xf32>
      %85 = vector.broadcast %84 : vector<1x512xf32> to vector<8x512xf32>
      %86 = arith.addf %83, %85 : vector<8x512xf32>
      %cst_47 = arith.constant 5.000000e-01 : f32
      %87 = vector.broadcast %cst_47 : f32 to vector<8x512xf32>
      %88 = arith.mulf %87, %86 : vector<8x512xf32>
      %cst_48 = arith.constant 0.707106769 : f32
      %89 = vector.broadcast %cst_48 : f32 to vector<8x512xf32>
      %90 = arith.mulf %86, %89 : vector<8x512xf32>
      %91 = math.erf %90 : vector<8x512xf32>
      %cst_49 = arith.constant 1.000000e+00 : f32
      %92 = vector.broadcast %cst_49 : f32 to vector<8x512xf32>
      %93 = arith.addf %92, %91 : vector<8x512xf32>
      %94 = arith.mulf %88, %93 : vector<8x512xf32>
      %95 = arith.truncf %94 : vector<8x512xf32> to vector<8x512xbf16>
      %c0_50 = arith.constant 0 : index
      %c0_51 = arith.constant 0 : index
      %96 = vector.load %arg15[%c0_50, %c0_51] : memref<512x128xbf16, #tpu.memory_space<vmem>>, vector<512x128xbf16>
      %cst_52 = arith.constant dense<0.000000e+00> : vector<8x128xf32>
      %97 = tpu.matmul %95, %96, %cst_52 {dimension_numbers = #tpu.dot_dimension_numbers<[1], [0], [0], [1], [0, 0, 1, 1], [], []>} : vector<8x512xbf16>, vector<512x128xbf16>, vector<8x128xf32> -> vector<8x128xf32>
      %c0_53 = arith.constant 0 : index
      %c0_54 = arith.constant 0 : index
      %98 = vector.load %arg16[%c0_53, %c0_54] : memref<1x128xf32, #tpu.memory_space<vmem>>, vector<1x128xf32>
      %99 = vector.broadcast %98 : vector<1x128xf32> to vector<8x128xf32>
      %100 = arith.addf %97, %99 : vector<8x128xf32>
      %101 = arith.addf %56, %100 : vector<8x128xf32>
      %c0_55 = arith.constant 0 : index
      %c0_56 = arith.constant 0 : index
      %c0_57 = arith.constant 0 : index
      %102 = vector.load %arg17[%c0_55, %c0_56, %c0_57] : memref<1x8x128xf32, #tpu.memory_space<vmem>>, vector<1x8x128xf32>
      %103 = vector.shape_cast %102 : vector<1x8x128xf32> to vector<8x128xf32>
      %104 = vector.shape_cast %101 : vector<8x128xf32> to vector<1x8x128xf32>
      tpu.vector_store %arg17[%c0_55, %c0_56, %c0_57], %104 {strides = array<i32>} : memref<1x8x128xf32, #tpu.memory_space<vmem>>, vector<1x8x128xf32>,
    } else {
    }
    return
  }
  func.func @transform_0(%arg0: i32, %arg1: i32) -> (i32, i32, i32) {
    %c0_i32 = arith.constant 0 : i32
    %c0_i32_0 = arith.constant 0 : i32
    %c0_i32_1 = arith.constant 0 : i32
    return %arg0, %c0_i32, %c0_i32_0 : i32, i32, i32
  }
  func.func @transform_1(%arg0: i32, %arg1: i32) -> (i32, i32) {
    %c0_i32 = arith.constant 0 : i32
    %c0_i32_0 = arith.constant 0 : i32
    %c0_i32_1 = arith.constant 0 : i32
    return %c0_i32, %c0_i32_0 : i32, i32
  }
  func.func @transform_2(%arg0: i32, %arg1: i32) -> (i32, i32) {
    %c0_i32 = arith.constant 0 : i32
    %c0_i32_0 = arith.constant 0 : i32
    %c0_i32_1 = arith.constant 0 : i32
    return %c0_i32, %c0_i32_0 : i32, i32
  }
  func.func @transform_3(%arg0: i32, %arg1: i32) -> (i32, i32) {
    %c0_i32 = arith.constant 0 : i32
    %c0_i32_0 = arith.constant 0 : i32
    %c0_i32_1 = arith.constant 0 : i32
    return %c0_i32, %c0_i32_0 : i32, i32
  }
  func.func @transform_4(%arg0: i32, %arg1: i32) -> (i32, i32) {
    %c0_i32 = arith.constant 0 : i32
    %c0_i32_0 = arith.constant 0 : i32
    %c0_i32_1 = arith.constant 0 : i32
    return %c0_i32, %c0_i32_0 : i32, i32
  }
  func.func @transform_5(%arg0: i32, %arg1: i32) -> (i32, i32, i32) {
    %c0_i32 = arith.constant 0 : i32
    %c0_i32_0 = arith.constant 0 : i32
    %c0_i32_1 = arith.constant 0 : i32
    return %arg1, %c0_i32, %c0_i32_0 : i32, i32, i32
  }
  func.func @transform_6(%arg0: i32, %arg1: i32) -> (i32, i32, i32) {
    %c0_i32 = arith.constant 0 : i32
    %c0_i32_0 = arith.constant 0 : i32
    %c0_i32_1 = arith.constant 0 : i32
    return %arg1, %c0_i32, %c0_i32_0 : i32, i32, i32
  }
  func.func @transform_7(%arg0: i32, %arg1: i32) -> (i32, i32) {
    %c0_i32 = arith.constant 0 : i32
    %c0_i32_0 = arith.constant 0 : i32
    %c0_i32_1 = arith.constant 0 : i32
    return %c0_i32, %c0_i32_0 : i32, i32
  }
  func.func @transform_8(%arg0: i32, %arg1: i32) -> (i32, i32) {
    %c0_i32 = arith.constant 0 : i32
    %c0_i32_0 = arith.constant 0 : i32
    %c0_i32_1 = arith.constant 0 : i32
    return %c0_i32, %c0_i32_0 : i32, i32
  }
  func.func @transform_9(%arg0: i32, %arg1: i32) -> (i32, i32) {
    %c0_i32 = arith.constant 0 : i32
    %c0_i32_0 = arith.constant 0 : i32
    %c0_i32_1 = arith.constant 0 : i32
    return %c0_i32, %c0_i32_0 : i32, i32
  }
  func.func @transform_10(%arg0: i32, %arg1: i32) -> (i32, i32) {
    %c0_i32 = arith.constant 0 : i32
    %c0_i32_0 = arith.constant 0 : i32
    %c0_i32_1 = arith.constant 0 : i32
    return %c0_i32, %c0_i32_0 : i32, i32
  }
  func.func @transform_11(%arg0: i32, %arg1: i32) -> (i32, i32) {
    %c0_i32 = arith.constant 0 : i32
    %c0_i32_0 = arith.constant 0 : i32
    %c0_i32_1 = arith.constant 0 : i32
    return %c0_i32, %c0_i32_0 : i32, i32
  }
  func.func @transform_12(%arg0: i32, %arg1: i32) -> (i32, i32) {
    %c0_i32 = arith.constant 0 : i32
    %c0_i32_0 = arith.constant 0 : i32
    %c0_i32_1 = arith.constant 0 : i32
    return %c0_i32, %c0_i32_0 : i32, i32
  }
  func.func @transform_13(%arg0: i32, %arg1: i32) -> (i32, i32) {
    %c0_i32 = arith.constant 0 : i32
    %c0_i32_0 = arith.constant 0 : i32
    %c0_i32_1 = arith.constant 0 : i32
    return %c0_i32, %c0_i32_0 : i32, i32
  }
  func.func @transform_14(%arg0: i32, %arg1: i32) -> (i32, i32) {
    %c0_i32 = arith.constant 0 : i32
    %c0_i32_0 = arith.constant 0 : i32
    %c0_i32_1 = arith.constant 0 : i32
    return %c0_i32, %c0_i32_0 : i32, i32
  }
  func.func @transform_15(%arg0: i32, %arg1: i32) -> (i32, i32, i32) {
    %c0_i32 = arith.constant 0 : i32
    %c0_i32_0 = arith.constant 0 : i32
    %c0_i32_1 = arith.constant 0 : i32
    return %arg0, %c0_i32, %c0_i32_0 : i32, i32, i32
  }
}

</mosaic_0001>

<bundles_post_ra>
// kernel: tpu_custom_call.1
= control target key start
LH: loop header
LB: loop body
LE: loop exit
PB: predicated region body
PF: predicated region fallthrough
CT: control target
= control target key end

     0   :  { %s3674_s0 = inlined_call_operand.hbm [shape: f32[2,8,128], index: 0, kind: input, shape index: {}]   ;;  %s3675_s1 = inlined_call_operand.hbm [shape: f32[8,128], index: 1, kind: input, shape index: {}]   ;;  %s3676_s2 = inlined_call_operand.hbm [shape: f32[8,128], index: 2, kind: input, shape index: {}]   ;;  %s3677_s3 = inlined_call_operand.vmem [shape: f32[8,128], index: 3, kind: input, shape index: {}]   ;;  %s3678_s4 = inlined_call_operand.hbm [shape: f32[8,128], index: 4, kind: input, shape index: {}]   ;;  %s3679_s5 = inlined_call_operand.hbm [shape: bf16[4,128,384], index: 5, kind: input, shape index: {}]   ;;  %s3680_s6 = inlined_call_operand.hbm [shape: bf16[4,128,128], index: 6, kind: input, shape index: {}]   ;;  %s3681_s7 = inlined_call_operand.vmem [shape: f32[1,128], index: 7, kind: input, shape index: {}]   ;;  %s3682_s8 = inlined_call_operand.vmem [shape: f32[1,128], index: 8, kind: input, shape index: {}]   ;;  %s3683_s9 = inlined_call_operand.vmem [shape: f32[1,128], index: 9, kind: input, shape index: {}]   ;;  %s3684_s10 = inlined_call_operand.vmem [shape: f32[1,128], index: 10, kind: input, shape index: {}]   ;;  %s3685_s11 = inlined_call_operand.hbm [shape: bf16[128,512], index: 11, kind: input, shape index: {}]   ;;  %s3686_s12 = inlined_call_operand.vmem [shape: f32[1,512], index: 12, kind: input, shape index: {}]   ;;  %s3687_s13 = inlined_call_operand.hbm [shape: bf16[512,128], index: 13, kind: input, shape index: {}]   ;;  %s3688_s14 = inlined_call_operand.vmem [shape: f32[1,128], index: 14, kind: input, shape index: {}]   ;;  %s3689_s15 = inlined_call_operand.hbm [shape: f32[2,8,128], index: 15, kind: output, shape index: {}]  }
   0x1   :  { %3716 = sst [smem:[#allocation36_spill]] %s3674_s0 }
   0x2   :  { %3717 = sst [smem:[#allocation37_spill]] %s3675_s1 }
   0x3   :  { %3718 = sst [smem:[#allocation38_spill]] %s3676_s2 }
   0x4   :  { %3719 = sst [smem:[#allocation39_spill]] %s3677_s3 }
   0x5   :  { %3720 = sst [smem:[#allocation40_spill]] %s3681_s7 }
   0x6   :  { %3721 = sst [smem:[#allocation41_spill]] %s3682_s8 }
   0x7   :  { %3722 = sst [smem:[#allocation42_spill]] %s3683_s9 }
   0x8   :  { %3723 = sst [smem:[#allocation43_spill]] %s3684_s10 }
   0x9   :  { %3724 = sst [smem:[#allocation44_spill]] %s3686_s12 }
   0xa   :  { %3725 = sst [smem:[#allocation45_spill]] %s3688_s14 }
   0xb   :  { %3726 = sst [smem:[#allocation46_spill]] %s3689_s15 }
   0xc   :  { %20 = vsyncpa [#allocation5], 0 }
   0xd   :  { %22 = vsyncpa [#allocation5 + $0x1], 0 }
   0xe   :  { %23 = vsyncpa [#allocation8], 0 }
   0xf   :  { %24 = vsyncpa [#allocation11], 0 }
  0x10   :  { %25 = vsyncpa [#allocation6], 0 }
  0x11   :  { %27 = vsyncpa [#allocation6 + $0x1], 0  ;;  %s3095_s18 = smov 0   ;;  %s3097_s19 = smov 0  }
  0x12   :  { %s3099_s20 = smov 0   ;;  %s3101_s21 = smov 0  }
  0x13   :  { %s3103_s22 = smov 0   ;;  %s3105_s23 = smov 0  }
  0x14   :  { %s3107_s24 = smov 0   ;;  %s3109_s25 = smov 0  }
  0x15   :  { %s3111_s26 = smov 0   ;;  %s3113_s27 = smov 0  }
  0x16   :  { %s3115_s28 = smov 0  }
  0x17 LB: > { %3727 = sst [smem:[#allocation24_spill]] %s2956_s19  ;;  %s3151_s29 = sadd.s32 4294967295, %s2992_s28   ;;  %s2992_s28 = sphi %s3115_s28, %s33_s28   ;;  %s2988_s27 = sphi %s3113_s27, %s3806_s27   ;;  %s2984_s26 = sphi %s3111_s26, %s3805_s26   ;;  %s2980_s25 = sphi %s3109_s25, %s3797_s25   ;;  %s2976_s24 = sphi %s3107_s24, %s3804_s24   ;;  %s2972_s23 = sphi %s3105_s23, %s3796_s23   ;;  %s2968_s22 = sphi %s3103_s22, %s3803_s22   ;;  %s2964_s21 = sphi %s3101_s21, %s3802_s21   ;;  %s2960_s20 = sphi %s3099_s20, %s3801_s20   ;;  %s2956_s19 = sphi %s3097_s19, %s3800_s19   ;;  %s2952_s18 = sphi %s3095_s18, %s3793_s18  }
  0x18   : > { %3728 = sst [smem:[#allocation25_spill]] %s2964_s21  ;;  %p2057_p0 = scmp.ge.s32.totalorder %s2992_s28, 1 }
  0x19   : > { %3729 = sst [smem:[#allocation26_spill]] %s2972_s23  ;;  %p3691_p1 = scmp.eq.s32.totalorder %s3151_s29, 0 }
  0x1a   : > { %3730 = sst [smem:[#allocation27_spill]] %s2976_s24  ;;  %p406_p2 = scmp.lt.s32.totalorder %s2992_s28, 9 }
  0x1b   : > { %3731 = sst [smem:[#allocation28_spill]] %s2980_s25  ;;  %s2994_s16 = smov [#allocation7]  }
  0x1c   : > { %3732 = sst [smem:[#allocation29_spill]] %s2988_s27  ;;  %p3156_p3 = pnand %p2057_p0, %p406_p2 }
  0x1d   : > { %s419_s17 = sshll.u32 %s2994_s16, 4  ;;  %s3735_s1 = sld [smem:[#allocation37_spill]]  ;;  %s420_s17 = int_to_ptr.vmem [resolvable:$true] %s419_s17 }
  0x1e   : > { %s3733_s30 = scalar_select %p3156_p3, 1, 0 }
  0x1f   : > { %p2337_p4 = pneg %p3156_p3 }
  0x21   : > { %p3164_p5 = pnand %p2337_p4, %p3691_p1 }
  0x23   : > { %s3734_s15 = scalar_select %p3164_p5, 1, 0 }
  0x24   : > { %s2620_s12 = scalar_lea.hbm %s3735_s1, 128  ;;  %p3176_p7 = pneg %p3164_p5 }
  0x25   : > { %p2621_p6 = scmp.ne.s32.totalorder %s3735_s1, %s2620_s12  ;;  %p2627_p10 = scmp.lt.u32.totalorder %s2620_s12, %s3735_s1 }
  0x26   : > { %s3736_s16 = scalar_select %p3176_p7, 1, 0 }
  0x27   : > { %p2623_p8 = pnand %p3176_p7, %p2621_p6 }
  0x29   : > { %p2624_p9 = pneg %p2623_p8 }
  0x2b   : > { %p2629_p11 = pnand %p2627_p10, %p2624_p9 }
  0x2d   : > { %2632 = shalt.err (!%p2629_p11)
}
  0x2e   : > { %s2633_s14 = scalar_lea.vmem %s420_s17, 128  ;;  %p2641_p2 = scmp.lt.s32.totalorder %s420_s17, %s420_s17 }
  0x2f   : > { %p2634_p12 = scmp.ne.s32.totalorder %s420_s17, %s2633_s14  ;;  %p2642_p4 = scmp.lt.s32.totalorder %s2633_s14, %s2633_s14 }
  0x31   : > { %p2636_p13 = pnand %p2634_p12, %p3176_p7  ;;  %p2643_p1 = por %p2642_p4, %p2641_p2 }
  0x33   : > { %p2637_p0 = pneg %p2636_p13 }
  0x35   : > { %p2644_p3 = pnand %p2643_p1, %p2637_p0 }
  0x37   : > { %2647 = shalt.err (!%p2644_p3)
}
  0x38   : > { %2340 = dma.hbm_to_vmem [thread:$0]  (!%p3164_p5), %s3735_s1, 128, %s420_s17, [#allocation8]  }
  0x39   : > { %s2056_s3 = sadd.s32 4294967294, %s2992_s28   ;;  %s42_s8 = sadd.s32 1, %s2984_s26 }
  0x3a   : > { %s45_s12 = sadd.s32 1, %s2988_s27  ;;  %p43_p1 = scmp.ge.s32.totalorder %s42_s8, 4 }
  0x3b   : > { %s52_s25 = sadd.s32 1, %s2972_s23  ;;  %p3695_p3 = scmp.ne.s32.totalorder %s2972_s23, %s2968_s22 }
  0x3c   : > { %p60_p6 = scmp.eq.s32.totalorder %s2992_s28, 0  ;;  %s3808_s8 = smov (%p43_p1, %s42_s8), 0 }
  0x3d   : > { %3737 = sst [smem:[#allocation30_spill]] %s3808_s8  ;;  %s3810_s12 = smov (!%p43_p1, %s45_s12), %s2988_s27 }
  0x3e   : > { %p3207_p8 = por %p60_p6, %p3695_p3  ;;  %p3694_p9 = scmp.ne.s32.totalorder %s2968_s22, %s2964_s21 }
  0x3f   : > { %p47_p10 = scmp.ge.s32.totalorder %s3810_s12, 2  ;;  %s159_s14 = ssub.s32 %s2984_s26, %s3808_s8 }
  0x40   : > { %p3739_p11 = scmp.eq.s32.totalorder %s3151_s29, 0  ;;  %p160_p13 = scmp.eq.s32.totalorder %s159_s14, 0 }
  0x41   : > { %s3812_s12 = smov (%p47_p10, %s3810_s12), 0  ;;  %s162_s10 = sadd.s32 1, %s2960_s20 }
  0x42   : > { %p3220_p12 = por %p3739_p11, %p3694_p9  ;;  %3741 = sst [smem:[#allocation31_spill]] %s3812_s12 }
  0x43   : > { %p169_p0 = scmp.ne.s32.totalorder %s2960_s20, %s2956_s19  ;;  %s49_s1 = ssub.s32 %s2988_s27, %s3812_s12 }
  0x44   : > { %s3740_s9 = scalar_select %p3220_p12, 1, 0 }
  0x45   : > { %p175_p2 = scmp.ne.s32.totalorder %s2956_s19, %s2952_s18  ;;  %p50_p4 = scmp.eq.s32.totalorder %s49_s1, 0 }
  0x46   : > { %p3235_p1 = por %p169_p0, %p60_p6  ;;  %p3745_p10 = pmov %p3739_p11 }
  0x47   : > { %s3240_s7 = scalar_select %p160_p13, %s2960_s20, %s162_s10  }
  0x48   : > { %s3243_s14 = scalar_select %p50_p4, %s2972_s23, %s52_s25  }
  0x49   : > { %3743 = sst [smem:[#allocation32_spill]] %s3240_s7  ;;  %p3247_p11 = por %p175_p2, %p3745_p10 }
  0x4a   : > { %3744 = sst [smem:[#allocation33_spill]] %s3243_s14  ;;  %p393_p9 = scmp.eq.s32.totalorder %s3151_s29, 7 }
  0x4b   : > { %s3746_s24 = scalar_select %p3247_p11, 1, 0 }
  0x4c   : > { %p399_p3 = scmp.eq.s32.totalorder %s2056_s3, 7  ;;  %p2372_p12 = scmp.lt.s32.totalorder %s2992_s28, 8 }
  0x4d   : > { %3747 = sst [smem:[#allocation34_spill]] %s3746_s24  ;;  %p3748_p5 = scmp.ne.s32.totalorder %s2972_s23, %s2968_s22 }
  0x4e   : > { %s499_s18 = sand.u32 1, %s2992_s28   ;;  %p3750_p6 = scmp.ne.s32.totalorder %s2968_s22, %s2964_s21 }
  0x4f   : > { %p3256_p7 = por %p393_p9, %p3748_p5  ;;  %s501_s25 = sand.u32 1, %s2972_s23  }
  0x50   : > { %p3264_p13 = por %p399_p3, %p3750_p6  ;;  %s2065_s12 = sshll.u32 %s2988_s27, 7 }
  0x51   : > { %s3749_s1 = scalar_select %p3256_p7, 1, 0 }
  0x52   : > { %s3751_s10 = scalar_select %p3264_p13, 1, 0 }
  0x53   : > { %s2064_s14 = sshll.u32 %s501_s25, 3  ;;  %s3753_s0 = sld [smem:[#allocation36_spill]] }
  0x54   : > { %3752 = sst [smem:[#allocation35_spill]] %s3751_s10  ;;  %p3277_p5 = pnand %p2372_p12, %p3207_p8 }
  0x55   : > { %s503_s10 = scalar_lea.vmem [#allocation4], %s2064_s14  ;;  %p3283_p3 = pnand %p2372_p12, %p3235_p1 }
  0x56   : > { %s510_s23 = sshll.u32 %s503_s10, 4  ;;  %s3289_s7 = scalar_lea.sflag [#allocation5], %s499_s18  ;;  %s3287_s23 = int_to_ptr.vmem [resolvable:$true] %s510_s23 }
  0x57   : > { %s3755_s25 = scalar_select %p3283_p3, 1, 0 }
  0x58   : > { %p2650_p8 = pneg %p3277_p5 }
  0x59   : > { %s3273_s24 = scalar_lea.hbm %s3753_s0, %s2065_s12  ;;  %s2653_s8 = scalar_lea.hbm %s3753_s0, 256 }
  0x5a   : > { %s2648_s19 = scalar_lea.hbm %s3273_s24, 128  ;;  %p2654_p12 = scmp.lt.u32.totalorder %s3273_s24, %s3753_s0 }
  0x5b   : > { %p2649_p9 = scmp.ne.s32.totalorder %s3273_s24, %s2648_s19  ;;  %p2655_p4 = scmp.lt.u32.totalorder %s2653_s8, %s2648_s19 }
  0x5c   : > { %p2657_p10 = scmp.lt.u32.totalorder %s2648_s19, %s3273_s24 }
  0x5d   : > { %p2651_p0 = pnand %p2650_p8, %p2649_p9  ;;  %p2656_p1 = por %p2655_p4, %p2654_p12 }
  0x5f   : > { %p2652_p2 = pneg %p2651_p0  ;;  %p2658_p6 = por %p2657_p10, %p2656_p1 }
  0x61   : > { %p2659_p13 = pnand %p2658_p6, %p2652_p2 }
  0x63   : > { %2662 = shalt.err (!%p2659_p13)
}
  0x64   : > { %s2663_s18 = scalar_lea.vmem %s3287_s23, 128  ;;  %s2995_s12 = smov [#allocation4]  }
  0x65   : > { %p2664_p9 = scmp.ne.s32.totalorder %s3287_s23, %s2663_s18  ;;  %s2668_s17 = sshll.u32 %s2995_s12, 4  ;;  %s2669_s17 = int_to_ptr.vmem [resolvable:$false] %s2668_s17 }
  0x66   : > { %s2670_s14 = scalar_lea.vmem %s2669_s17, 256  ;;  %p2671_p11 = scmp.lt.s32.totalorder %s3287_s23, %s2669_s17 }
  0x67   : > { %p2666_p0 = pnand %p2664_p9, %p2650_p8  ;;  %p2672_p12 = scmp.lt.s32.totalorder %s2670_s14, %s2663_s18 }
  0x69   : > { %p2667_p7 = pneg %p2666_p0  ;;  %p2673_p4 = por %p2672_p12, %p2671_p11 }
  0x6b   : > { %p2674_p1 = pnand %p2673_p4, %p2667_p7 }
  0x6d   : > { %2677 = shalt.err (!%p2674_p1)
}
  0x6e   : > { %2356 = dma.hbm_to_vmem [thread:$0]  (!%p3277_p5), %s3273_s24, 128, %s3287_s23, %s3289_s7  }
  0x6f   : > { %s2996_s19 = smov [#allocation9]   ;;  %s2997_s10 = smov [#allocation10]  }
  0x70   : > { %s430_s8 = sshll.u32 %s2996_s19, 4  ;;  %s444_s0 = sshll.u32 %s2997_s10, 4  ;;  %s431_s8 = int_to_ptr.vmem [resolvable:$true] %s430_s8  ;;  %s445_s0 = int_to_ptr.vmem [resolvable:$true] %s444_s0 }
  0x71   : > { %s3756_s2 = sld [smem:[#allocation38_spill]]  ;;  %p3757_p11 = scmp.ne.s32.totalorder %s3736_s16, 0 }
  0x77   : > { %s2678_s17 = scalar_lea.hbm %s3756_s2, 128 }
  0x78   : > { %p2679_p7 = scmp.ne.s32.totalorder %s3756_s2, %s2678_s17  ;;  %p2685_p5 = scmp.lt.u32.totalorder %s2678_s17, %s3756_s2 }
  0x7a   : > { %p2681_p13 = pnand %p2679_p7, %p3757_p11 }
  0x7c   : > { %p2682_p8 = pneg %p2681_p13 }
  0x7e   : > { %p2687_p2 = pnand %p2685_p5, %p2682_p8 }
  0x80   : > { %2690 = shalt.err (!%p2687_p2)
}
  0x81   : > { %s2691_s23 = scalar_lea.vmem %s431_s8, 128  ;;  %p2699_p0 = scmp.lt.s32.totalorder %s431_s8, %s431_s8 }
  0x82   : > { %p2692_p10 = scmp.ne.s32.totalorder %s431_s8, %s2691_s23  ;;  %p2700_p12 = scmp.lt.s32.totalorder %s2691_s23, %s2691_s23 }
  0x84   : > { %p2694_p6 = pnand %p2692_p10, %p3757_p11  ;;  %p2701_p4 = por %p2700_p12, %p2699_p0 }
  0x86   : > { %p2695_p9 = pneg %p2694_p6 }
  0x88   : > { %p2702_p1 = pnand %p2701_p4, %p2695_p9 }
  0x8a   : > { %2705 = shalt.err (!%p2702_p1)
}
  0x8b   : > { %p3758_p7 = scmp.ne.s32.totalorder %s3734_s15, 0  ;;  %s3713_s21 = sand.u32 1, %s2960_s20  }
  0x8c   : > { %s2706_s12 = scalar_lea.hbm %s3678_s4, 128 }
  0x8d   : > { %2343 = dma.hbm_to_vmem [thread:$0]  (!%p3758_p7), %s3756_s2, 128, %s431_s8, [#allocation8]  }
  0x8e   : > { %p2707_p13 = scmp.ne.s32.totalorder %s3678_s4, %s2706_s12  ;;  %p2713_p2 = scmp.lt.u32.totalorder %s2706_s12, %s3678_s4 }
  0x90   : > { %p2709_p8 = pnand %p2707_p13, %p3757_p11 }
  0x92   : > { %p2710_p5 = pneg %p2709_p8 }
  0x94   : > { %p2715_p10 = pnand %p2713_p2, %p2710_p5 }
  0x96   : > { %2718 = shalt.err (!%p2715_p10)
}
  0x97   : > { %s2719_s8 = scalar_lea.vmem %s445_s0, 128  ;;  %p2727_p12 = scmp.lt.s32.totalorder %s445_s0, %s445_s0 }
  0x98   : > { %p2720_p6 = scmp.ne.s32.totalorder %s445_s0, %s2719_s8  ;;  %p2728_p4 = scmp.lt.s32.totalorder %s2719_s8, %s2719_s8 }
  0x9a   : > { %p2722_p9 = pnand %p2720_p6, %p3757_p11  ;;  %p2729_p1 = por %p2728_p4, %p2727_p12 }
  0x9c   : > { %p2723_p0 = pneg %p2722_p9 }
  0x9e   : > { %p2730_p3 = pnand %p2729_p1, %p2723_p0 }
  0xa0   : > { %2733 = shalt.err (!%p2730_p3)
}
  0xa1   : > { %2346 = dma.hbm_to_vmem [thread:$0]  (!%p3758_p7), %s3678_s4, 128, %s445_s0, [#allocation11]  }
  0xa2   : > { %s2306_s27 = smul.u32 192, %s3713_s21  ;;  %s2998_s3 = smov [#allocation14]  }
  0xa3   : > { %s2307_s19 = smul.u32 3072, %s2984_s26  ;;  %s3364_s8 = sshll.u32 %s2998_s3, 4  ;;  %s467_s8 = int_to_ptr.vmem [resolvable:$true] %s3364_s8 }
  0xa4   : > { %s521_s18 = scalar_lea.vmem [#allocation12], %s2306_s27  ;;  %p3759_p13 = scmp.ne.s32.totalorder %s3755_s25, 0 }
  0xa5   : > { %s3360_s17 = scalar_lea.hbm %s3679_s5, %s2307_s19  ;;  %s528_s14 = sshll.u32 %s521_s18, 4  ;;  %s3362_s14 = int_to_ptr.vmem [resolvable:$true] %s528_s14 }
  0xa6   : > { %s2734_s0 = scalar_lea.hbm %s3360_s17, 3072  ;;  %p3714_p8 = pneg %p3759_p13 }
  0xa7   : > { %p2735_p3 = scmp.ne.s32.totalorder %s3360_s17, %s2734_s0  ;;  %s2739_s19 = scalar_lea.hbm %s3679_s5, 12288 }
  0xa8   : > { %p2740_p10 = scmp.lt.u32.totalorder %s3360_s17, %s3679_s5  ;;  %p2741_p6 = scmp.lt.u32.totalorder %s2739_s19, %s2734_s0 }
  0xa9   : > { %p2737_p5 = pnand %p3714_p8, %p2735_p3  ;;  %p2743_p0 = scmp.lt.u32.totalorder %s2734_s0, %s3360_s17 }
  0xaa   : > { %p2742_p9 = por %p2741_p6, %p2740_p10 }
  0xab   : > { %p2738_p2 = pneg %p2737_p5 }
  0xac   : > { %p2744_p12 = por %p2743_p0, %p2742_p9 }
  0xae   : > { %p2745_p4 = pnand %p2744_p12, %p2738_p2 }
  0xb0   : > { %2748 = shalt.err (!%p2745_p4)
}
  0xb1   : > { %s2749_s12 = scalar_lea.vmem %s3362_s14, 3072  ;;  %s2999_s18 = smov [#allocation12]  }
  0xb2   : > { %p2750_p1 = scmp.ne.s32.totalorder %s3362_s14, %s2749_s12  ;;  %s2754_s3 = sshll.u32 %s2999_s18, 4  ;;  %s2755_s3 = int_to_ptr.vmem [resolvable:$false] %s2754_s3 }
  0xb3   : > { %s2756_s23 = scalar_lea.vmem %s2755_s3, 6144  ;;  %p2757_p7 = scmp.lt.s32.totalorder %s3362_s14, %s2755_s3 }
  0xb4   : > { %p2752_p3 = pnand %p2750_p1, %p3714_p8  ;;  %p2758_p10 = scmp.lt.s32.totalorder %s2756_s23, %s2749_s12 }
  0xb6   : > { %p2753_p5 = pneg %p2752_p3  ;;  %p2759_p6 = por %p2758_p10, %p2757_p7 }
  0xb8   : > { %p2760_p9 = pnand %p2759_p6, %p2753_p5 }
  0xba   : > { %2763 = shalt.err (!%p2760_p9)
}
  0xbb   : > { %s3000_s0 = smov 192   ;;  %s3001_s24 = smov 12  }
  0xbc   : > { %2359 = dma.hbm_to_vmem [thread:$0]  (!%p3759_p13), %s3360_s17, 3072, %s3362_s14, %s3289_s7, %s3000_s0, %s3000_s0, %s3001_s24  }
  0xbd   : > { %s2764_s27 = scalar_lea.hbm %s3685_s11, 4096 }
  0xbe   : > { %p2765_p7 = scmp.ne.s32.totalorder %s3685_s11, %s2764_s27  ;;  %p2771_p12 = scmp.lt.u32.totalorder %s2764_s27, %s3685_s11 }
  0xc0   : > { %p2767_p2 = pnand %p2765_p7, %p3757_p11 }
  0xc2   : > { %p2768_p0 = pneg %p2767_p2 }
  0xc4   : > { %p2773_p4 = pnand %p2771_p12, %p2768_p0 }
  0xc6   : > { %2776 = shalt.err (!%p2773_p4)
}
  0xc7   : > { %s2777_s21 = scalar_lea.vmem %s467_s8, 4096  ;;  %p2785_p10 = scmp.lt.s32.totalorder %s467_s8, %s467_s8 }
  0xc8   : > { %p2778_p1 = scmp.ne.s32.totalorder %s467_s8, %s2777_s21  ;;  %p2786_p6 = scmp.lt.s32.totalorder %s2777_s21, %s2777_s21 }
  0xca   : > { %p2780_p3 = pnand %p2778_p1, %p3757_p11  ;;  %p2787_p9 = por %p2786_p6, %p2785_p10 }
  0xcc   : > { %p2781_p5 = pneg %p2780_p3 }
  0xce   : > { %p2788_p8 = pnand %p2787_p9, %p2781_p5 }
  0xd0   : > { %2791 = shalt.err (!%p2788_p8)
}
  0xd1   : > { %s3002_s17 = smov 256   ;;  %s3003_s14 = smov 16  }
  0xd2   : > { %p3760_p7 = scmp.ne.s32.totalorder %s3734_s15, 0  ;;  %s3004_s19 = smov [#allocation15]  }
  0xd3   : > { %s482_s10 = sshll.u32 %s3004_s19, 4  ;;  %s2792_s12 = scalar_lea.hbm %s3687_s13, 4096  ;;  %s483_s10 = int_to_ptr.vmem [resolvable:$true] %s482_s10 }
  0xd4   : > { %2349 = dma.hbm_to_vmem [thread:$0]  (!%p3760_p7), %s3685_s11, 4096, %s467_s8, [#allocation8], %s3002_s17, %s3002_s17, %s3003_s14  }
  0xd5   : > { %p2793_p8 = scmp.ne.s32.totalorder %s3687_s13, %s2792_s12  ;;  %p2799_p12 = scmp.lt.u32.totalorder %s2792_s12, %s3687_s13 }
  0xd7   : > { %p2795_p2 = pnand %p2793_p8, %p3757_p11 }
  0xd9   : > { %p2796_p0 = pneg %p2795_p2 }
  0xdb   : > { %p2801_p4 = pnand %p2799_p12, %p2796_p0 }
  0xdd   : > { %2804 = shalt.err (!%p2801_p4)
}
  0xde   : > { %s2805_s8 = scalar_lea.vmem %s483_s10, 4096  ;;  %p2813_p10 = scmp.lt.s32.totalorder %s483_s10, %s483_s10 }
  0xdf   : > { %p2806_p1 = scmp.ne.s32.totalorder %s483_s10, %s2805_s8  ;;  %p2814_p6 = scmp.lt.s32.totalorder %s2805_s8, %s2805_s8 }
  0xe1   : > { %p2808_p3 = pnand %p2806_p1, %p3757_p11  ;;  %p2815_p9 = por %p2814_p6, %p2813_p10 }
  0xe3   : > { %p2809_p5 = pneg %p2808_p3 }
  0xe5   : > { %p2816_p13 = pnand %p2815_p9, %p2809_p5 }
  0xe7   : > { %2819 = shalt.err (!%p2816_p13)
}
  0xe8   : > { %s3005_s17 = smov 64   ;;  %s3006_s2 = smov 4  }
  0xe9   : > { %2352 = dma.hbm_to_vmem [thread:$0]  (!%p3760_p7), %s3687_s13, 4096, %s483_s10, [#allocation11], %s3005_s17, %s3005_s17, %s3006_s2  }
  0xea   : > { %s3761_s16 = sand.u32 1, %s2960_s20   ;;  %s2187_s19 = sshll.u32 %s2984_s26, 10 }
  0xeb   : > { %s2067_s24 = sshll.u32 %s3761_s16, 6  ;;  %s3438_s12 = scalar_lea.hbm %s3680_s6, %s2187_s19 }
  0xec   : > { %s542_s15 = scalar_lea.vmem [#allocation13], %s2067_s24  ;;  %s2820_s3 = scalar_lea.hbm %s3438_s12, 1024 }
  0xed   : > { %s549_s21 = sshll.u32 %s542_s15, 4  ;;  %p2821_p11 = scmp.ne.s32.totalorder %s3438_s12, %s2820_s3  ;;  %s3440_s21 = int_to_ptr.vmem [resolvable:$true] %s549_s21 }
  0xee   : > { %p3762_p13 = scmp.ne.s32.totalorder %s3755_s25, 0  ;;  %s2825_s8 = scalar_lea.hbm %s3680_s6, 4096 }
  0xef   : > { %p2826_p0 = scmp.lt.u32.totalorder %s3438_s12, %s3680_s6  ;;  %p2827_p12 = scmp.lt.u32.totalorder %s2825_s8, %s2820_s3 }
  0xf0   : > { %p3763_p7 = pneg %p3762_p13  ;;  %p2829_p1 = scmp.lt.u32.totalorder %s2820_s3, %s3438_s12 }
  0xf1   : > { %p2828_p4 = por %p2827_p12, %p2826_p0 }
  0xf2   : > { %p2823_p8 = pnand %p2821_p11, %p3763_p7 }
  0xf3   : > { %p2830_p3 = por %p2829_p1, %p2828_p4 }
  0xf4   : > { %p2824_p2 = pneg %p2823_p8 }
  0xf6   : > { %p2831_p5 = pnand %p2830_p3, %p2824_p2 }
  0xf8   : > { %2834 = shalt.err (!%p2831_p5)
}
  0xf9   : > { %s2835_s16 = scalar_lea.vmem %s3440_s21, 1024  ;;  %p3764_p6 = pmov %p3763_p7 }
  0xfa   : > { %p2836_p10 = scmp.ne.s32.totalorder %s3440_s21, %s2835_s16  ;;  %s3007_s24 = smov [#allocation13]  }
  0xfb   : > { %s2840_s19 = sshll.u32 %s3007_s24, 4  ;;  %s2841_s19 = int_to_ptr.vmem [resolvable:$false] %s2840_s19 }
  0xfc   : > { %p2838_p9 = pnand %p2836_p10, %p3764_p6  ;;  %s2842_s27 = scalar_lea.vmem %s2841_s19, 2048 }
  0xfd   : > { %p2843_p7 = scmp.lt.s32.totalorder %s3440_s21, %s2841_s19  ;;  %p2844_p8 = scmp.lt.s32.totalorder %s2842_s27, %s2835_s16 }
  0xfe   : > { %p2839_p11 = pneg %p2838_p9 }
  0xff   : > { %p2845_p0 = por %p2844_p8, %p2843_p7 }
 0x101   : > { %p2846_p12 = pnand %p2845_p0, %p2839_p11 }
 0x103   : > { %2849 = shalt.err (!%p2846_p12)
}
 0x104   : > { %2362 = dma.hbm_to_vmem [thread:$0]  (!%p3762_p13), %s3438_s12, 1024, %s3440_s21, %s3289_s7, %s3005_s17, %s3005_s17, %s3006_s2  }
 0x105   : > { %p3765_p2 = scmp.ne.s32.totalorder %s3733_s30, 0 }
 0x106   : > { %s563_s18 = sand.u32 (!%p3765_p2), 1, %s3151_s29   ;;  %s565_s15 = sand.u32 (!%p3765_p2), 1, %s2968_s22  }
 0x107   : > { %561 = sbr.rel (%p3765_p2) target bundleno = 2602 (0xa2a), region = 80  ;;  %s3475_s3 = sshll.u32 (!%p3765_p2), %s565_s15, 3 }
 0x108   : > { %s564_s25 = scalar_lea.sflag (!%p3765_p2), [#allocation5], %s563_s18  ;;  %s567_s10 = scalar_lea.vmem (!%p3765_p2), [#allocation4], %s3475_s3 }
 0x109   : > { %p3766_p4 = scmp.ne.s32.totalorder (!%p3765_p2), %s3740_s9, 0 }
 0x10e   : > { %2923 = dma.done.wait (%p3766_p4), %s564_s25, 128  }
 0x10f   : > { %2925 = vsyncadd (%p3766_p4), %s564_s25, 4294967168  ;;  %p3767_p13 = scmp.eq.s32.totalorder %s3151_s29, 0 }
 0x111   : > { %2927 = dma.done.wait (%p3767_p13), [#allocation8], 256   ;;  %p3768_p1 = pmov %p3767_p13 }
 0x113   : > { %2929 = vsyncadd (%p3768_p1), [#allocation8], 4294967040  ;;  %p3769_p3 = pmov %p3768_p1 }
 0x114   : > { %p3770_p5 = pmov %p3768_p1 }
 0x115   : > { %2931 = dma.done.wait (%p3769_p3), [#allocation11], 128  }
 0x116   : > { %2933 = vsyncadd (%p3770_p5), [#allocation11], 4294967168  ;;  %s3771_s30 = sld [smem:[#allocation24_spill]]  ;;  %s3772_s7 = sld [smem:[#allocation34_spill]] }
 0x11c   : > { %s586_s17 = sand.u32 1, %s3771_s30   ;;  %p3773_p10 = scmp.ne.s32.totalorder %s3772_s7, 0 }
 0x11d   : > { %s2308_s2 = smul.u32 192, %s586_s17 }
 0x11f   : > { %s3491_s12 = scalar_lea.vmem [#allocation12], %s2308_s2 }
 0x120   : > { %2935 = dma.done.wait (%p3773_p10), %s564_s25, 4096  }
 0x121   : > { %2937 = vsyncadd (%p3773_p10), %s564_s25, 4294963200  ;;  %s2075_s9 = sshll.u32 %s586_s17, 6  ;;  %p3774_p6 = pmov %p3768_p1 }
 0x122   : > { %s3497_s21 = scalar_lea.vmem [#allocation13], %s2075_s9 }
 0x123   : > { %2939 = dma.done.wait (%p3774_p6), [#allocation8], 4096   ;;  %p3775_p9 = pmov %p3768_p1 }
 0x124   : > { %p3776_p11 = pmov %p3768_p1 }
 0x125   : > { %2941 = vsyncadd (%p3775_p9), [#allocation8], 4294963200 }
 0x126   : > { %2943 = dma.done.wait (%p3776_p11), [#allocation11], 4096   ;;  %p3777_p7 = pmov %p3768_p1 }
 0x127   : > { %s661_s23 = scalar_lea.vmem [#allocation16], %s3475_s3  ;;  %s3778_s8 = sld [smem:[#allocation27_spill]] }
 0x128   : > { %2945 = vsyncadd (%p3777_p7), [#allocation11], 4294963200 }
 0x12d   : > { %p2079_p8 = scmp.ne.s32.totalorder %s3778_s8, 0 }
 0x12e   : > { %v667_v0 = vld [vmem:[%s567_s10] sm:$0xff] (!%p2079_p8)  ;;  %v3008_v5 = vmov (!%p2079_p8), 0.0   ;;  %s3779_s0 = sld [smem:[#allocation40_spill]] (!%p2079_p8)  ;;  %s3780_s19 = sld [smem:[#allocation41_spill]] (!%p2079_p8) }
 0x12f   : > { %666 = sbr.rel (%p2079_p8) target bundleno = 617 (0x269), region = 116  ;;  %670 = vadd.xlane.f32.xlu0 (!%p2079_p8), %v667_v0  ;;  %698 = vst [vmem:[#allocation3] sm:$0xff] (!%p2079_p8), %v3008_v5 }
 0x134   : > { %v2080_v10 = vld [vmem:[%s3779_s0] ss:$0 sm:$0xff] (!%p2079_p8) }
 0x135   : > { %v2081_v12 = vld [vmem:[%s3780_s19] ss:$0 sm:$0xff] (!%p2079_p8) }
 0x1bc   : > { %v671_v1 = vpop.xlane.xlu0 %670 }
 0x1bd   : > { %v673_v2 = vmul.f32 0.0078125, %v671_v1 }
 0x1bf   : > { %v674_v3 = vsub.f32 %v667_v0, %v673_v2 }
 0x1c1   : > { %v675_v4 = vmul.f32 %v674_v3, %v674_v3 }
 0x1c3   : > { %676 = vadd.xlane.f32.xlu0 %v675_v4 }
 0x250   : > { %v677_v6 = vpop.xlane.xlu0 %676 }
 0x251   : > { %v678_v7 = vmul.f32 0.0078125, %v677_v6 }
 0x253   : > { %v679_v8 = vadd.f32 1e-05, %v678_v7 }
 0x255   : > { %2484 = vrsqrt.f32 %v679_v8 }
 0x25f   : > { %v2485_v9 = vpop.eup %2484 }
 0x260   : > { %v681_v11 = vmul.f32 %v2485_v9, %v674_v3 }
 0x262   : > { %v688_v13 = vmul.f32 %v2080_v10, %v681_v11 }
 0x264   : > { %v695_v14 = vadd.f32 %v2081_v12, %v688_v13 }
 0x266   : > { %v696_v15 = vpack.c.bf16 %v695_v14, %v695_v14 }
 0x268   : > { %697 = vst [vmem:[#allocation2] sm:$0xf] %v696_v15 }
 0x269 PF: > { %v2486_v16 = vld [vmem:[%s3491_s12 + $0x4] ss:$12 sps:$4 sm:$0xff]   ;;  %v2488_v17 = vld [vmem:[%s3491_s12] ss:$12 sps:$4 sm:$0xff]   ;;  %v3009_v18 = vmov 0   ;;  %v3010_v35 = vmov 0.0   ;;  %v998_v3 = vlaneseq }
 0x26a   : > { %892 = vmatprep.mubr.bf16.mxu0 %v3009_v18  ;;  %860 = vmatprep.subr.bf16.mxu0 %v2486_v16  ;;  %v2489_v19 = vld [vmem:[%s3491_s12 + $0x1c] ss:$12 sps:$4 sm:$0xff]   ;;  %v2491_v20 = vld [vmem:[%s3491_s12 + $0x18] ss:$12 sps:$4 sm:$0xff]   ;;  %v2492_v21 = vld [vmem:[%s3491_s12 + $0x34] ss:$12 sps:$4 sm:$0xff]  }
 0x26b   : > { %861 = vmatpush1.bf16.msra.mxu0 %v2488_v17  ;;  %v2494_v22 = vld [vmem:[%s3491_s12 + $0x30] ss:$12 sps:$4 sm:$0xff]   ;;  %v2495_v23 = vld [vmem:[%s3491_s12 + $0x4c] ss:$12 sps:$4 sm:$0xff]   ;;  %v2497_v24 = vld [vmem:[%s3491_s12 + $0x48] ss:$12 sps:$4 sm:$0xff]   ;;  %2254 = vmatprep.subr.bf16.mxu1 %v3010_v35 }
 0x26c   : > { %862 = vmatprep.subr.bf16.mxu0 %v2489_v19  ;;  %v2498_v25 = vld [vmem:[%s3491_s12 + $0x64] ss:$12 sps:$4 sm:$0xff]   ;;  %v2500_v26 = vld [vmem:[%s3491_s12 + $0x60] ss:$12 sps:$4 sm:$0xff]   ;;  %v2501_v27 = vld [vmem:[%s3491_s12 + $0x7c] ss:$12 sps:$4 sm:$0xff]  }
 0x26d   : > { %v2503_v28 = vld [vmem:[%s3491_s12 + $0x78] ss:$12 sps:$4 sm:$0xff]   ;;  %v2504_v29 = vld [vmem:[%s3491_s12 + $0x94] ss:$12 sps:$4 sm:$0xff]   ;;  %v2506_v30 = vld [vmem:[%s3491_s12 + $0x90] ss:$12 sps:$4 sm:$0xff]  }
 0x26e   : > { %v2507_v31 = vld [vmem:[%s3491_s12 + $0xac] ss:$12 sps:$4 sm:$0xff]   ;;  %v2509_v32 = vld [vmem:[%s3491_s12 + $0xa8] ss:$12 sps:$4 sm:$0xff]   ;;  %v2513_v38 = vld [vmem:[%s3491_s12 + $0x50] ss:$12 sps:$4 sm:$0xff]  }
 0x26f   : > { %863 = vmatpush1.bf16.msra.mxu0 %v2491_v20  ;;  %v699_v33 = vld [vmem:[#allocation2] sm:$0xf]  ;;  %v2510_v34 = vld [vmem:[%s3491_s12 + $0x8] ss:$12 sps:$4 sm:$0xff]   ;;  %v2512_v37 = vld [vmem:[%s3491_s12 + $0x38] ss:$12 sps:$4 sm:$0xff]  }
 0x270   : > { %864 = vmatprep.subr.bf16.mxu0 %v2492_v21  ;;  %2255 = vmatpush3.bf16.msra.mxu1 %v2510_v34  ;;  %v2511_v36 = vld [vmem:[%s3491_s12 + $0x20] ss:$12 sps:$4 sm:$0xff]   ;;  %v2514_v39 = vld [vmem:[%s3491_s12 + $0x68] ss:$12 sps:$4 sm:$0xff]   ;;  %v2516_v41 = vld [vmem:[%s3491_s12 + $0x98] ss:$12 sps:$4 sm:$0xff]  }
 0x271   : > { %2256 = vmatprep.subr.bf16.mxu1 %v3010_v35  ;;  %v2515_v40 = vld [vmem:[%s3491_s12 + $0x80] ss:$12 sps:$4 sm:$0xff]   ;;  %v2517_v42 = vld [vmem:[%s3491_s12 + $0xb0] ss:$12 sps:$4 sm:$0xff]   ;;  %vm3011_vm0 = vmmov 0   ;;  %s3012_s27 = smov 64  }
 0x272   : > { %2270 = vmatprep.mubr.msk.bf16.mxu1 %vm3011_vm0, %v3010_v35  ;;  %s3781_s30 = sld [smem:[#allocation39_spill]]  ;;  %v954_v48 = vld [vmem:[#allocation10] sm:$0xff]  ;;  %v946_v52 = vld [vmem:[#allocation9] sm:$0xff]  ;;  %v942_v53 = vld [vmem:[#allocation7] sm:$0xff]  ;;  %vm1018_vm1 = vcmask 1043456   ;;  %v3563_v4 = vshrl.u32 %v998_v3, 7 }
 0x273   : > { %865 = vmatpush1.bf16.msra.mxu0 %v2494_v22  ;;  %v1001_v5 = vand.u32 127, %v998_v3  ;;  %vm1004_vm3 = vcmask 64512   ;;  %v2518_v18 = vld [vmem:[%s3497_s21] sm:$0xff]   ;;  %v2519_v19 = vld [vmem:[%s3497_s21 + $0x8] sm:$0xff]   ;;  %v2520_v20 = vld [vmem:[%s3497_s21 + $0x10] sm:$0xff]   ;;  %s3782_s7 = sld [smem:[#allocation27_spill]] }
 0x274   : > { %866 = vmatprep.subr.bf16.mxu0 %v2495_v23  ;;  %2257 = vmatpush3.bf16.msra.mxu1 %v2511_v36  ;;  %v2521_v21 = vld [vmem:[%s3497_s21 + $0x18] sm:$0xff]   ;;  %v2522_v22 = vld [vmem:[%s3497_s21 + $0x20] sm:$0xff]   ;;  %v2523_v23 = vld [vmem:[%s3497_s21 + $0x28] sm:$0xff]  }
 0x275   : > { %2258 = vmatprep.subr.bf16.mxu1 %v3010_v35  ;;  %vm1002_vm2 = vcmp.gt.s32.totalorder %v1001_v5, %v3563_v4  ;;  %v1064_v34 = vld [vmem:[#allocation3] sm:$0xff] }
 0x277   : > { %867 = vmatpush1.bf16.msra.mxu0 %v2497_v24  ;;  %v2524_v24 = vld [vmem:[%s3497_s21 + $0x30] sm:$0xff]  }
 0x278   : > { %868 = vmatprep.subr.bf16.mxu0 %v2498_v25  ;;  %2259 = vmatpush3.bf16.msra.mxu1 %v2512_v37  ;;  %v950_v47 = vld [vmem:[%s3781_s30] sm:$0xff]  ;;  %v2525_v25 = vld [vmem:[%s3497_s21 + $0x38] sm:$0xff]  }
 0x279   : > { %2260 = vmatprep.subr.bf16.mxu1 %v3010_v35  ;;  %p2115_p0 = scmp.ne.s32.totalorder %s3782_s7, 3 }
 0x27a   : > { %v2560_v3 = vld [vmem:[#allocation14 + $0xa4] ss:$16 sps:$4 sm:$0xff] (!%p2115_p0)   ;;  %v2562_v5 = vld [vmem:[#allocation14 + $0xac] ss:$16 sps:$4 sm:$0xff] (!%p2115_p0)   ;;  %s3783_s2 = sld [smem:[#allocation42_spill]] (!%p2115_p0)  ;;  %s3784_s21 = sld [smem:[#allocation43_spill]] (!%p2115_p0) }
 0x27b   : > { %869 = vmatpush1.bf16.msra.mxu0 %v2500_v26  ;;  %s3785_s14 = sld [smem:[#allocation44_spill]] (!%p2115_p0)  ;;  %s3786_s24 = sld [smem:[#allocation45_spill]] (!%p2115_p0) }
 0x27c   : > { %870 = vmatprep.subr.bf16.mxu0 %v2501_v27  ;;  %2261 = vmatpush3.bf16.msra.mxu1 %v2513_v38 }
 0x27d   : > { %2262 = vmatprep.subr.bf16.mxu1 %v3010_v35 }
 0x27f   : > { %871 = vmatpush1.bf16.msra.mxu0 %v2503_v28 }
 0x280   : > { %872 = vmatprep.subr.bf16.mxu0 %v2504_v29  ;;  %2263 = vmatpush3.bf16.msra.mxu1 %v2514_v39 }
 0x281   : > { %2264 = vmatprep.subr.bf16.mxu1 %v3010_v35 }
 0x283   : > { %873 = vmatpush1.bf16.msra.mxu0 %v2506_v30 }
 0x284   : > { %874 = vmatprep.subr.bf16.mxu0 %v2507_v31  ;;  %2265 = vmatpush3.bf16.msra.mxu1 %v2515_v40 }
 0x285   : > { %2266 = vmatprep.subr.bf16.mxu1 %v3010_v35 }
 0x287   : > { %875 = vmatpush1.bf16.msra.mxu0 %v2509_v32 }
 0x288   : > { %2286 = vmatprep.subr.bf16.mxu0 %v3010_v35  ;;  %2267 = vmatpush3.bf16.msra.mxu1 %v2516_v41 }
 0x289   : > { %2268 = vmatprep.subr.bf16.mxu1 %v3010_v35 }
 0x28a   : > { %893 = vmatmul.mubr.bf16.vlgmr.msra.gmra.mrb[0].mxu0 %v699_v33 }
 0x28b   : > { %2302 = vmatprep.mubr.msk.bf16.mxu0 %vm3011_vm0, %v3010_v35  ;;  %2287 = vmatpush3.bf16.msra.mxu0 %v2518_v18  ;;  %v2579_v18 = vld [vmem:[#allocation15 + $0xc0] sm:$0xff] (!%p2115_p0)  }
 0x28c   : > { %2269 = vmatpush3.bf16.msra.mxu1 %v2517_v42  ;;  %2288 = vmatprep.subr.bf16.mxu0 %v3010_v35 }
 0x28d   : > { %2274 = vmatprep.subr.bf16.mxu1 %v3010_v35 }
 0x28f   : > { %2271 = vmatmul.mubr.bf16.vlgmr.msra.gmra.mrb[0].mxu1 %v699_v33  ;;  %2289 = vmatpush3.bf16.msra.mxu0 %v2519_v19 }
 0x290   : > { %2276 = vmatprep.mubr.msk.bf16.mxu1 %vm3011_vm0, %v3010_v35  ;;  %2290 = vmatprep.subr.bf16.mxu0 %v3010_v35 }
 0x293   : > { %2291 = vmatpush3.bf16.msra.mxu0 %v2520_v20 }
 0x294   : > { %2292 = vmatprep.subr.bf16.mxu0 %v3010_v35 }
 0x297   : > { %2293 = vmatpush3.bf16.msra.mxu0 %v2521_v21 }
 0x298   : > { %2294 = vmatprep.subr.bf16.mxu0 %v3010_v35 }
 0x29b   : > { %2295 = vmatpush3.bf16.msra.mxu0 %v2522_v22 }
 0x29c   : > { %2296 = vmatprep.subr.bf16.mxu0 %v3010_v35 }
 0x29f   : > { %2297 = vmatpush3.bf16.msra.mxu0 %v2523_v23  ;;  %v2116_v23 = vld [vmem:[%s3783_s2] ss:$0 sm:$0xff] (!%p2115_p0) }
 0x2a0   : > { %2298 = vmatprep.subr.bf16.mxu0 %v3010_v35 }
 0x2a3   : > { %2299 = vmatpush3.bf16.msra.mxu0 %v2524_v24 }
 0x2a4   : > { %2300 = vmatprep.subr.bf16.mxu0 %v3010_v35 }
 0x2a7   : > { %2301 = vmatpush3.bf16.msra.mxu0 %v2525_v25  ;;  %v2117_v25 = vld [vmem:[%s3784_s21] ss:$0 sm:$0xff] (!%p2115_p0) }
 0x35d   : > { %v894_v43 = vpop.f32.mrb[0].mxu0 }
 0x35e   : > { %v896_v44 = vpop.f32.mrb[1].mxu0  ;;  %v943_v58 = vmul.f32 %v942_v53, %v894_v43 }
 0x35f   : > { %952 = vrot.lane.b32.xlu0 %v896_v44, %s3012_s27  ;;  %v898_v45 = vpop.f32.mrb[2].mxu0  ;;  %v951_v50 = vmul.f32 %v950_v47, %v896_v44  ;;  %v2532_v44 = vld [vmem:[#allocation14 + $0xc] ss:$16 sps:$4 sm:$0xff] (!%p2115_p0)   ;;  %v2536_v47 = vld [vmem:[#allocation14 + $0x24] ss:$16 sps:$4 sm:$0xff] (!%p2115_p0)  }
 0x360   : > { %v899_v46 = vpop.f32.mrb[3].mxu0  ;;  %v2534_v45 = vld [vmem:[#allocation14] ss:$16 sps:$4 sm:$0xff] (!%p2115_p0)  }
 0x361   : > { %v2535_v46 = vld [vmem:[#allocation14 + $0x8] ss:$16 sps:$4 sm:$0xff] (!%p2115_p0)  }
 0x362   : > { %v935_v61 = vpop.f32.mrb[0].mxu1 }
 0x363   : > { %944 = vrot.lane.b32.xlu0 %v894_v43, %s3012_s27  ;;  %v941_v62 = vpack.c.bf16 %v935_v61, %v935_v61  ;;  %v2272_v63 = vpop.f32.mrb[1].mxu1  ;;  %v2530_v43 = vld [vmem:[#allocation14 + $0x4] ss:$16 sps:$4 sm:$0xff] (!%p2115_p0)   ;;  %v2552_v61 = vld [vmem:[#allocation14 + $0x60] ss:$16 sps:$4 sm:$0xff] (!%p2115_p0)  }
 0x364   : > { %v938_v0 = vpop.f32.mrb[2].mxu1  ;;  %1422 = vmatprep.subr.bf16.mxu0 (!%p2115_p0), %v2530_v43  ;;  %v2554_v63 = vld [vmem:[#allocation14 + $0x84] ss:$16 sps:$4 sm:$0xff] (!%p2115_p0)   ;;  %v2593_v43 = vld [vmem:[#allocation15 + $0x98] sm:$0xff] (!%p2115_p0)  }
 0x365   : > { %v1020_v1 = vsel %vm1018_vm1, %v941_v62, 0  ;;  %v2273_v2 = vpop.f32.mrb[3].mxu1  ;;  %v2553_v62 = vld [vmem:[#allocation14 + $0x68] ss:$16 sps:$4 sm:$0xff] (!%p2115_p0)   ;;  %v2556_v0 = vld [vmem:[#allocation14 + $0x8c] ss:$16 sps:$4 sm:$0xff] (!%p2115_p0)  }
 0x366   : > { %v2559_v2 = vld [vmem:[#allocation14 + $0x88] ss:$16 sps:$4 sm:$0xff] (!%p2115_p0)  }
 0x3d1   : > { %v953_v49 = vpop.permute.xlu0 %952 }
 0x3d2   : > { %v955_v51 = vmul.f32 %v954_v48, %v953_v49  ;;  %v2538_v48 = vld [vmem:[#allocation14 + $0x2c] ss:$16 sps:$4 sm:$0xff] (!%p2115_p0)   ;;  %v2540_v49 = vld [vmem:[#allocation14 + $0x20] ss:$16 sps:$4 sm:$0xff] (!%p2115_p0)  }
 0x3d4   : > { %v956_v54 = vadd.f32 %v955_v51, %v951_v50  ;;  %v2541_v50 = vld [vmem:[#allocation14 + $0x28] ss:$16 sps:$4 sm:$0xff] (!%p2115_p0)   ;;  %v2542_v51 = vld [vmem:[#allocation14 + $0x44] ss:$16 sps:$4 sm:$0xff] (!%p2115_p0)  }
 0x3d5   : > { %v945_v55 = vpop.permute.xlu0 %944 }
 0x3d6   : > { %v957_v56 = vpack.c.bf16 %v956_v54, %v956_v54  ;;  %v947_v57 = vmul.f32 %v946_v52, %v945_v55  ;;  %v2544_v52 = vld [vmem:[#allocation14 + $0x4c] ss:$16 sps:$4 sm:$0xff] (!%p2115_p0)  }
 0x3d8   : > { %2275 = vmatpush3.bf16.xpose.msra.mxu1 %v957_v56  ;;  %v948_v59 = vadd.f32 %v947_v57, %v943_v58  ;;  %v2546_v57 = vld [vmem:[#allocation14 + $0x40] ss:$16 sps:$4 sm:$0xff] (!%p2115_p0)   ;;  %v2547_v58 = vld [vmem:[#allocation14 + $0x48] ss:$16 sps:$4 sm:$0xff] (!%p2115_p0)  }
 0x3d9   : > { %2280 = vmatprep.subr.bf16.mxu1 %v3010_v35 }
 0x3da   : > { %v949_v60 = vpack.c.bf16 %v948_v59, %v948_v59  ;;  %v2548_v59 = vld [vmem:[#allocation14 + $0x64] ss:$16 sps:$4 sm:$0xff] (!%p2115_p0)  }
 0x3df   : > { %2277 = vmatmul.mubr.bf16.vlgmr.msra.gmra.mrb[4].mxu1 %v949_v60  ;;  %v2550_v60 = vld [vmem:[#allocation14 + $0x6c] ss:$16 sps:$4 sm:$0xff] (!%p2115_p0)  }
 0x3e0   : > { %2282 = vmatprep.mubr.msk.bf16.mxu1 %vm3011_vm0, %v3010_v35  ;;  %2281 = vmatpush3.bf16.msra.mxu1 %v1020_v1  ;;  %v1176_v35 = vld [vmem:[%s567_s10] sm:$0xff] (!%p2115_p0) }
 0x3e1   : > { %1463 = vmatprep.subr.bf16.mxu1 (!%p2115_p0), %v2532_v44  ;;  %v2558_v1 = vld [vmem:[#allocation14 + $0x80] ss:$16 sps:$4 sm:$0xff] (!%p2115_p0)  }
 0x3e2   : > { %v2594_v44 = vld [vmem:[#allocation15 + $0x60] sm:$0xff] (!%p2115_p0)  }
 0x4b2   : > { %v992_v6 = vpop.f32.mrb[4].mxu1 }
 0x4b3   : > { %v1003_v7 = vsel %vm1002_vm2, -1e+30, %v992_v6  ;;  %v2278_v8 = vpop.f32.mrb[5].mxu1  ;;  %v2564_v6 = vld [vmem:[#allocation14 + $0xa0] ss:$16 sps:$4 sm:$0xff] (!%p2115_p0)  }
 0x4b4   : > { %v995_v9 = vpop.f32.mrb[6].mxu1  ;;  %v1005_v10 = vsel %vm1004_vm3, %v1003_v7, -inf  ;;  %v2566_v8 = vld [vmem:[#allocation14 + $0xc4] ss:$16 sps:$4 sm:$0xff] (!%p2115_p0)  }
 0x4b5   : > { %1006 = vmax.xlane.f32.xlu1 %v1005_v10  ;;  %v2279_v11 = vpop.f32.mrb[7].mxu1  ;;  %v2568_v9 = vld [vmem:[#allocation14 + $0xcc] ss:$16 sps:$4 sm:$0xff] (!%p2115_p0)   ;;  %v3013_v10 = vmov (!%p2115_p0), 0  }
 0x4b6   : > { %v2570_v11 = vld [vmem:[#allocation14 + $0xc0] ss:$16 sps:$4 sm:$0xff] (!%p2115_p0)  }
 0x542   : > { %v1007_v12 = vpop.xlane.xlu1 %1006 }
 0x543   : > { %v1008_v13 = vsub.f32 %v1003_v7, %v1007_v12  ;;  %v2565_v7 = vld [vmem:[#allocation14 + $0xa8] ss:$16 sps:$4 sm:$0xff] (!%p2115_p0)  }
 0x544   : > { %v2571_v12 = vld [vmem:[#allocation14 + $0xc8] ss:$16 sps:$4 sm:$0xff] (!%p2115_p0)  }
 0x545   : > { %v1009_v14 = vmul.f32 1.442695, %v1008_v13  ;;  %v2572_v13 = vld [vmem:[#allocation14 + $0xe4] ss:$16 sps:$4 sm:$0xff] (!%p2115_p0)  }
 0x547   : > { %2526 = vpow2.f32 %v1009_v14  ;;  %v2574_v14 = vld [vmem:[#allocation14 + $0xec] ss:$16 sps:$4 sm:$0xff] (!%p2115_p0)  }
 0x551   : > { %v2527_v15 = vpop.eup %2526 }
 0x552   : > { %v1011_v16 = vsel %vm1004_vm3, %v2527_v15, 0.0  ;;  %v1014_v17 = vpack.c.bf16 %v2527_v15, %v2527_v15  ;;  %v2576_v15 = vld [vmem:[#allocation14 + $0xe0] ss:$16 sps:$4 sm:$0xff] (!%p2115_p0)  }
 0x553   : > { %1012 = vadd.xlane.f32.xlu1 %v1011_v16  ;;  %v2577_v16 = vld [vmem:[#allocation14 + $0xe8] ss:$16 sps:$4 sm:$0xff] (!%p2115_p0)  }
 0x554   : > { %2283 = vmatmul.mubr.msk.bf16.vlgmr.msra.gmra.mrb[8].mxu1 %vm1004_vm3, %v1014_v17  ;;  %v2578_v17 = vld [vmem:[#allocation15 + $0x40] sm:$0xff] (!%p2115_p0)  }
 0x555   : > { %1464 = vmatpush1.bf16.msra.mxu1 (!%p2115_p0), %v2535_v46  ;;  %1495 = vmatprep.mubr.bf16.mxu1 (!%p2115_p0), %v3013_v10  ;;  %v2596_v46 = vld [vmem:[#allocation15 + $0x20] sm:$0xff] (!%p2115_p0)  }
 0x556   : > { %1465 = vmatprep.subr.bf16.mxu1 (!%p2115_p0), %v2538_v48  ;;  %v2598_v48 = vld [vmem:[#allocation15 + $0x68] sm:$0xff] (!%p2115_p0)  }
 0x559   : > { %1466 = vmatpush1.bf16.msra.mxu1 (!%p2115_p0), %v2541_v50  ;;  %v2600_v50 = vld [vmem:[#allocation15 + $0x28] sm:$0xff] (!%p2115_p0)  }
 0x55a   : > { %1467 = vmatprep.subr.bf16.mxu1 (!%p2115_p0), %v2544_v52  ;;  %v2602_v52 = vld [vmem:[#allocation15 + $0x70] sm:$0xff] (!%p2115_p0)  }
 0x55d   : > { %1468 = vmatpush1.bf16.msra.mxu1 (!%p2115_p0), %v2547_v58  ;;  %v2608_v58 = vld [vmem:[#allocation15 + $0x38] sm:$0xff] (!%p2115_p0)  }
 0x55e   : > { %1469 = vmatprep.subr.bf16.mxu1 (!%p2115_p0), %v2550_v60  ;;  %v1244_v60 = vsub.s32 (!%p2115_p0), 0, %v3563_v4 }
 0x561   : > { %1470 = vmatpush1.bf16.msra.mxu1 (!%p2115_p0), %v2553_v62  ;;  %v1240_v62 = vld [vmem:[%s3785_s14] sm:$0xf] (!%p2115_p0) }
 0x562   : > { %1471 = vmatprep.subr.bf16.mxu1 (!%p2115_p0), %v2556_v0  ;;  %v1256_v0 = vsub.s32 (!%p2115_p0), 3, %v3563_v4 }
 0x565   : > { %1472 = vmatpush1.bf16.msra.mxu1 (!%p2115_p0), %v2559_v2 }
 0x566   : > { %1473 = vmatprep.subr.bf16.mxu1 (!%p2115_p0), %v2562_v5  ;;  %v1257_v5 = vrot.slane (!%p2115_p0), %v1240_v62, %v1256_v0 }
 0x569   : > { %1474 = vmatpush1.bf16.msra.mxu1 (!%p2115_p0), %v2565_v7 }
 0x56a   : > { %1475 = vmatprep.subr.bf16.mxu1 (!%p2115_p0), %v2568_v9 }
 0x56d   : > { %1476 = vmatpush1.bf16.msra.mxu1 (!%p2115_p0), %v2571_v12 }
 0x56e   : > { %1477 = vmatprep.subr.bf16.mxu1 (!%p2115_p0), %v2574_v14 }
 0x571   : > { %1478 = vmatpush1.bf16.msra.mxu1 (!%p2115_p0), %v2577_v16 }
 0x572   : > { %2232 = vmatprep.subr.bf16.mxu1 (!%p2115_p0), %v2579_v18 }
 0x5e0   : > { %v1013_v26 = vpop.xlane.xlu1 %1012 }
 0x5e1   : > { %2528 = vrcp.f32 %v1013_v26 }
 0x5eb   : > { %v2529_v27 = vpop.eup %2528 }
 0x627   : > { %v1056_v28 = vpop.f32.mrb[8].mxu1 }
 0x628   : > { %v1063_v29 = vmul.f32 %v2529_v27, %v1056_v28  ;;  %v2284_v30 = vpop.f32.mrb[9].mxu1  ;;  %v2580_v28 = vld [vmem:[#allocation15] sm:$0xff] (!%p2115_p0)  }
 0x629   : > { %v1059_v31 = vpop.f32.mrb[10].mxu1 }
 0x62a   : > { %v1065_v32 = vpack.c.bf16 %v1063_v29, %v1063_v29  ;;  %v2285_v33 = vpop.f32.mrb[11].mxu1  ;;  %v2581_v29 = vld [vmem:[#allocation15 + $0x80] sm:$0xff] (!%p2115_p0)   ;;  %v2582_v31 = vld [vmem:[#allocation15 + $0x48] sm:$0xff] (!%p2115_p0)  }
 0x62b   : > { %v2584_v33 = vld [vmem:[#allocation15 + $0x8] sm:$0xff] (!%p2115_p0)  }
 0x62c   : > { %2303 = vmatmul.mubr.bf16.vlgmr.msra.gmra.mrb[4].mxu0 %v1065_v32  ;;  %v2583_v32 = vld [vmem:[#allocation15 + $0xc8] sm:$0xff] (!%p2115_p0)  }
 0x62d   : > { %1423 = vmatpush1.bf16.msra.mxu0 (!%p2115_p0), %v2534_v45  ;;  %1454 = vmatprep.mubr.bf16.mxu0 (!%p2115_p0), %v3013_v10  ;;  %v2595_v45 = vld [vmem:[#allocation15 + $0xe0] sm:$0xff] (!%p2115_p0)  }
 0x62e   : > { %1424 = vmatprep.subr.bf16.mxu0 (!%p2115_p0), %v2536_v47  ;;  %v2597_v47 = vld [vmem:[#allocation15 + $0xa0] sm:$0xff] (!%p2115_p0)  }
 0x631   : > { %1425 = vmatpush1.bf16.msra.mxu0 (!%p2115_p0), %v2540_v49  ;;  %v2599_v49 = vld [vmem:[#allocation15 + $0xe8] sm:$0xff] (!%p2115_p0)  }
 0x632   : > { %1426 = vmatprep.subr.bf16.mxu0 (!%p2115_p0), %v2542_v51  ;;  %v2601_v51 = vld [vmem:[#allocation15 + $0xa8] sm:$0xff] (!%p2115_p0)  }
 0x635   : > { %1427 = vmatpush1.bf16.msra.mxu0 (!%p2115_p0), %v2546_v57  ;;  %v2607_v57 = vld [vmem:[#allocation15 + $0xf8] sm:$0xff] (!%p2115_p0)  }
 0x636   : > { %1428 = vmatprep.subr.bf16.mxu0 (!%p2115_p0), %v2548_v59  ;;  %v2609_v59 = vld [vmem:[#allocation15 + $0xb8] sm:$0xff] (!%p2115_p0)  }
 0x639   : > { %1429 = vmatpush1.bf16.msra.mxu0 (!%p2115_p0), %v2552_v61  ;;  %v1252_v61 = vsub.s32 (!%p2115_p0), 2, %v3563_v4 }
 0x63a   : > { %1430 = vmatprep.subr.bf16.mxu0 (!%p2115_p0), %v2554_v63  ;;  %v1248_v63 = vsub.s32 (!%p2115_p0), 1, %v3563_v4 }
 0x63b   : > { %v1253_v2 = vrot.slane (!%p2115_p0), %v1240_v62, %v1252_v61 }
 0x63d   : > { %1431 = vmatpush1.bf16.msra.mxu0 (!%p2115_p0), %v2558_v1  ;;  %v1245_v1 = vrot.slane (!%p2115_p0), %v1240_v62, %v1244_v60 }
 0x63e   : > { %1432 = vmatprep.subr.bf16.mxu0 (!%p2115_p0), %v2560_v3  ;;  %v1249_v3 = vrot.slane (!%p2115_p0), %v1240_v62, %v1248_v63 }
 0x641   : > { %1433 = vmatpush1.bf16.msra.mxu0 (!%p2115_p0), %v2564_v6 }
 0x642   : > { %1434 = vmatprep.subr.bf16.mxu0 (!%p2115_p0), %v2566_v8 }
 0x645   : > { %1435 = vmatpush1.bf16.msra.mxu0 (!%p2115_p0), %v2570_v11 }
 0x646   : > { %1436 = vmatprep.subr.bf16.mxu0 (!%p2115_p0), %v2572_v13 }
 0x649   : > { %1437 = vmatpush1.bf16.msra.mxu0 (!%p2115_p0), %v2576_v15 }
 0x64a   : > { %2210 = vmatprep.subr.bf16.mxu0 (!%p2115_p0), %v2578_v17 }
 0x6fc   : > { %1175 = sbr.rel (%p2115_p0) target bundleno = 2575 (0xa0f), region = 120 }
 0x6ff   : > { %v1164_v36 = vpop.f32.mrb[4].mxu0 }
 0x700   : > { %v1170_v37 = vadd.f32 %v1164_v36, %v1064_v34  ;;  %v2304_v38 = vpop.f32.mrb[5].mxu0  ;;  %v2585_v34 = vld [vmem:[#allocation15 + $0x88] sm:$0xff] (!%p2115_p0)   ;;  %v2586_v36 = vld [vmem:[#allocation15 + $0x50] sm:$0xff] (!%p2115_p0)  }
 0x701   : > { %v1167_v39 = vpop.f32.mrb[6].mxu0  ;;  %v2588_v38 = vld [vmem:[#allocation15 + $0x10] sm:$0xff] (!%p2115_p0)  }
 0x702   : > { %1171 = vst [vmem:[#allocation3] sm:$0xff] %v1170_v37  ;;  %v2305_v40 = vpop.f32.mrb[7].mxu0  ;;  %v2587_v37 = vld [vmem:[#allocation15 + $0xd0] sm:$0xff] (!%p2115_p0)  }
 0x703   : > { %v2589_v39 = vld [vmem:[#allocation15 + $0x90] sm:$0xff]   ;;  %v2590_v40 = vld [vmem:[#allocation15 + $0x58] sm:$0xff]  }
 0x709   : > { %v1177_v41 = vld [vmem:[#allocation3] sm:$0xff] }
 0x70a   : > { %v3587_v42 = vadd.f32 %v1177_v41, %v1176_v35  ;;  %v2591_v35 = vld [vmem:[#allocation15 + $0xd8] sm:$0xff]  }
 0x70b   : > { %v2592_v41 = vld [vmem:[#allocation15 + $0x18] sm:$0xff]  }
 0x70c   : > { %1181 = vadd.xlane.f32.xlu0 %v3587_v42 }
 0x799   : > { %v1182_v53 = vpop.xlane.xlu0 %1181 }
 0x79a   : > { %v1184_v54 = vmul.f32 0.0078125, %v1182_v53  ;;  %v2603_v53 = vld [vmem:[#allocation15 + $0xf0] sm:$0xff]  }
 0x79c   : > { %v1185_v55 = vsub.f32 %v3587_v42, %v1184_v54  ;;  %v2604_v54 = vld [vmem:[#allocation15 + $0x30] sm:$0xff]  }
 0x79e   : > { %v1186_v56 = vmul.f32 %v1185_v55, %v1185_v55 }
 0x7a0   : > { %1187 = vadd.xlane.f32.xlu0 %v1186_v56  ;;  %v2606_v56 = vld [vmem:[#allocation15 + $0x78] sm:$0xff]  }
 0x82d   : > { %v1188_v19 = vpop.xlane.xlu0 %1187 }
 0x82e   : > { %v1189_v20 = vmul.f32 0.0078125, %v1188_v19 }
 0x830   : > { %v1190_v21 = vadd.f32 1e-05, %v1189_v20 }
 0x832   : > { %2610 = vrsqrt.f32 %v1190_v21 }
 0x83c   : > { %v2611_v22 = vpop.eup %2610 }
 0x83d   : > { %v1192_v24 = vmul.f32 %v2611_v22, %v1185_v55  ;;  %v2605_v55 = vld [vmem:[#allocation15 + $0xb0] sm:$0xff]  }
 0x83f   : > { %v1199_v26 = vmul.f32 %v2116_v23, %v1192_v24 }
 0x841   : > { %v1206_v27 = vadd.f32 %v2117_v25, %v1199_v26 }
 0x843   : > { %v1207_v30 = vpack.c.bf16 %v1206_v27, %v1206_v27 }
 0x845   : > { %1455 = vmatmul.mubr.bf16.vlgmr.msra.gmra.mrb[0].mxu0 %v1207_v30  ;;  %1496 = vmatmul.mubr.bf16.vlgmr.msra.gmra.mrb[0].mxu1 %v1207_v30 }
 0x846   : > { %2211 = vmatpush3.bf16.msra.mxu0 %v2580_v28  ;;  %2233 = vmatpush3.bf16.msra.mxu1 %v2581_v29 }
 0x847   : > { %2212 = vmatprep.subr.bf16.mxu0 %v2582_v31  ;;  %2234 = vmatprep.subr.bf16.mxu1 %v2583_v32 }
 0x84a   : > { %2213 = vmatpush3.bf16.msra.mxu0 %v2584_v33  ;;  %2235 = vmatpush3.bf16.msra.mxu1 %v2585_v34 }
 0x84b   : > { %2214 = vmatprep.subr.bf16.mxu0 %v2586_v36  ;;  %2236 = vmatprep.subr.bf16.mxu1 %v2587_v37 }
 0x84e   : > { %2215 = vmatpush3.bf16.msra.mxu0 %v2588_v38  ;;  %2237 = vmatpush3.bf16.msra.mxu1 %v2589_v39 }
 0x84f   : > { %2216 = vmatprep.subr.bf16.mxu0 %v2590_v40  ;;  %2238 = vmatprep.subr.bf16.mxu1 %v2591_v35 }
 0x852   : > { %2217 = vmatpush3.bf16.msra.mxu0 %v2592_v41  ;;  %2239 = vmatpush3.bf16.msra.mxu1 %v2593_v43 }
 0x853   : > { %2218 = vmatprep.subr.bf16.mxu0 %v2594_v44  ;;  %2240 = vmatprep.subr.bf16.mxu1 %v2595_v45  ;;  %v2150_v44 = vld [vmem:[%s3786_s24] ss:$0 sm:$0xff] }
 0x856   : > { %2219 = vmatpush3.bf16.msra.mxu0 %v2596_v46  ;;  %2241 = vmatpush3.bf16.msra.mxu1 %v2597_v47 }
 0x857   : > { %2220 = vmatprep.subr.bf16.mxu0 %v2598_v48  ;;  %2242 = vmatprep.subr.bf16.mxu1 %v2599_v49 }
 0x85a   : > { %2221 = vmatpush3.bf16.msra.mxu0 %v2600_v50  ;;  %2243 = vmatpush3.bf16.msra.mxu1 %v2601_v51 }
 0x85b   : > { %2222 = vmatprep.subr.bf16.mxu0 %v2602_v52  ;;  %2244 = vmatprep.subr.bf16.mxu1 %v2603_v53 }
 0x85e   : > { %2223 = vmatpush3.bf16.msra.mxu0 %v2604_v54  ;;  %2245 = vmatpush3.bf16.msra.mxu1 %v2605_v55 }
 0x85f   : > { %2224 = vmatprep.subr.bf16.mxu0 %v2606_v56  ;;  %2246 = vmatprep.subr.bf16.mxu1 %v2607_v57 }
 0x862   : > { %2225 = vmatpush3.bf16.msra.mxu0 %v2608_v58  ;;  %2247 = vmatpush3.bf16.msra.mxu1 %v2609_v59 }
 0x918   : > { %v1456_v6 = vpop.f32.mrb[0].mxu0  ;;  %v1497_v7 = vpop.f32.mrb[0].mxu1 }
 0x919   : > { %v1457_v8 = vadd.f32 %v1456_v6, %v1245_v1  ;;  %v1498_v9 = vadd.f32 %v1497_v7, %v1253_v2  ;;  %v1458_v10 = vpop.f32.mrb[1].mxu0  ;;  %v1499_v11 = vpop.f32.mrb[1].mxu1 }
 0x91a   : > { %v1459_v12 = vadd.f32 %v1458_v10, %v1249_v3  ;;  %v1500_v13 = vadd.f32 %v1499_v11, %v1257_v5  ;;  %v1460_v14 = vpop.f32.mrb[2].mxu0  ;;  %v1501_v15 = vpop.f32.mrb[2].mxu1 }
 0x91b   : > { %v1508_v16 = vmul.f32 0.70710677, %v1457_v8  ;;  %v1510_v17 = vmul.f32 0.70710677, %v1498_v9  ;;  %v1461_v4 = vpop.f32.mrb[3].mxu0  ;;  %v1502_v20 = vpop.f32.mrb[3].mxu1 }
 0x91c   : > { %v1509_v18 = vmul.f32 0.70710677, %v1459_v12  ;;  %v1511_v19 = vmul.f32 0.70710677, %v1500_v13  ;;  %v1504_v25 = vmul.f32 0.5, %v1457_v8  ;;  %v1506_v28 = vmul.f32 0.5, %v1498_v9 }
 0x91d   : > { %2612 = verf.f32 %v1508_v16  ;;  %v1505_v29 = vmul.f32 0.5, %v1459_v12  ;;  %v1507_v32 = vmul.f32 0.5, %v1500_v13 }
 0x91e   : > { %2614 = verf.f32 %v1510_v17 }
 0x91f   : > { %2616 = verf.f32 %v1509_v18 }
 0x920   : > { %2618 = verf.f32 %v1511_v19 }
 0x927   : > { %v2613_v21 = vpop.eup %2612 }
 0x928   : > { %v2615_v22 = vpop.eup %2614  ;;  %v1516_v23 = vadd.f32 1.0, %v2613_v21 }
 0x929   : > { %v2617_v24 = vpop.eup %2616  ;;  %v1518_v26 = vadd.f32 1.0, %v2615_v22 }
 0x92a   : > { %v2619_v27 = vpop.eup %2618  ;;  %v1517_v30 = vadd.f32 1.0, %v2617_v24  ;;  %v1520_v31 = vmul.f32 %v1516_v23, %v1504_v25 }
 0x92b   : > { %v1519_v33 = vadd.f32 1.0, %v2619_v27  ;;  %v1522_v34 = vmul.f32 %v1518_v26, %v1506_v28 }
 0x92c   : > { %v1521_v36 = vmul.f32 %v1517_v30, %v1505_v29  ;;  %v1524_v39 = vpack.c.bf16 %v1520_v31, %v1520_v31 }
 0x92d   : > { %v1523_v37 = vmul.f32 %v1519_v33, %v1507_v32  ;;  %v1526_v35 = vpack.c.bf16 %v1522_v34, %v1522_v34 }
 0x92e   : > { %v1525_v38 = vpack.c.bf16 %v1521_v36, %v1521_v36 }
 0x92f   : > { %v1527_v40 = vpack.c.bf16 %v1523_v37, %v1523_v37 }
 0x930   : > { %1823 = vmatprep.mubr.bf16.mxu0 %v1525_v38 }
 0x931   : > { %1863 = vmatprep.mubr.bf16.mxu1 %v1527_v40  ;;  %1824 = vmatmul.mubr.bf16.vlgmr.msra.gmra.mrb[4].mxu0 %v1524_v39 }
 0x932   : > { %1864 = vmatmul.mubr.bf16.vlgmr.msra.gmra.mrb[4].mxu1 %v1526_v35 }
 0xa04   : > { %v2226_v41 = vpop.f32.mrb[4].mxu0 }
 0xa05   : > { %v2248_v43 = vpop.f32.mrb[4].mxu1  ;;  %v2227_v45 = vpop.f32.mrb[5].mxu0 }
 0xa06   : > { %v2228_v46 = vadd.f32 %v2227_v45, %v2226_v41  ;;  %v2249_v47 = vpop.f32.mrb[5].mxu1  ;;  %v2229_v48 = vpop.f32.mrb[6].mxu0 }
 0xa07   : > { %v2250_v49 = vadd.f32 %v2249_v47, %v2248_v43  ;;  %v2251_v50 = vpop.f32.mrb[6].mxu1  ;;  %v2230_v51 = vpop.f32.mrb[7].mxu0 }
 0xa08   : > { %v1826_v52 = vadd.f32 %v2228_v46, %v2150_v44  ;;  %v2252_v53 = vpop.f32.mrb[7].mxu1 }
 0xa0a   : > { %v1866_v54 = vadd.f32 %v2250_v49, %v1826_v52 }
 0xa0c   : > { %v1871_v55 = vadd.f32 %v1866_v54, %v3587_v42 }
 0xa0e   : > { %1872 = vst [vmem:[%s661_s23] sm:$0xff] %v1871_v55 }
 0xa0f PF: > { %s3787_s19 = sld [smem:[#allocation28_spill]]  ;;  %s3788_s30 = sld [smem:[#allocation46_spill]] }
 0xa10   : > { %s1887_s10 = sshll.u32 %s661_s23, 4  ;;  %s1874_s17 = scalar_lea.sflag [#allocation6], %s565_s15  ;;  %s1888_s10 = int_to_ptr.vmem [resolvable:$true] %s1887_s10 }
 0xa11   : > { %s2850_s2 = scalar_lea.vmem %s1888_s10, 128  ;;  %p3789_p2 = scmp.ne.s32.totalorder %s3749_s1, 0 }
 0xa12   : > { %p2851_p12 = scmp.ne.s32.totalorder %s1888_s10, %s2850_s2  ;;  %s3014_s12 = smov [#allocation16]  }
 0xa13   : > { %s2854_s9 = sshll.u32 %s3014_s12, 4  ;;  %s2855_s9 = int_to_ptr.vmem [resolvable:$false] %s2854_s9 }
 0xa14   : > { %p2852_p4 = pnand %p2851_p12, %p3789_p2  ;;  %s2856_s21 = scalar_lea.vmem %s2855_s9, 256 }
 0xa15   : > { %s2184_s27 = sshll.u32 %s3787_s19, 7  ;;  %p2857_p1 = scmp.lt.s32.totalorder %s1888_s10, %s2855_s9 }
 0xa16   : > { %s3614_s7 = scalar_lea.hbm %s3788_s30, %s2184_s27  ;;  %p2853_p13 = pneg %p2852_p4 }
 0xa17   : > { %p2858_p3 = scmp.lt.s32.totalorder %s2856_s21, %s2850_s2 }
 0xa19   : > { %p2859_p5 = por %p2858_p3, %p2857_p1 }
 0xa1b   : > { %p2860_p10 = pnand %p2859_p5, %p2853_p13 }
 0xa1d   : > { %2863 = shalt.err (!%p2860_p10)
}
 0xa1e   : > { %s2864_s15 = scalar_lea.hbm %s3614_s7, 128  ;;  %s2868_s8 = scalar_lea.hbm %s3788_s30, 256 }
 0xa1f   : > { %p2865_p6 = scmp.ne.s32.totalorder %s3614_s7, %s2864_s15  ;;  %p2869_p7 = scmp.lt.u32.totalorder %s3614_s7, %s3788_s30 }
 0xa20   : > { %p2870_p8 = scmp.lt.u32.totalorder %s2868_s8, %s2864_s15  ;;  %p2872_p12 = scmp.lt.u32.totalorder %s2864_s15, %s3614_s7 }
 0xa21   : > { %p2866_p9 = pnand %p2865_p6, %p3789_p2 }
 0xa22   : > { %p2871_p0 = por %p2870_p8, %p2869_p7 }
 0xa23   : > { %p2867_p11 = pneg %p2866_p9 }
 0xa24   : > { %p2873_p4 = por %p2872_p12, %p2871_p0 }
 0xa26   : > { %p2874_p13 = pnand %p2873_p4, %p2867_p11 }
 0xa28   : > { %2877 = shalt.err (!%p2874_p13)
}
 0xa29   : > { %2335 = dma.vmem_to_hbm [thread:$0]  (%p3789_p2), %s1888_s10, 128, %s3614_s7, %s1874_s17  }
 0xa2a PF: > { %s3790_s0 = sld [smem:[#allocation25_spill]]  ;;  %s3791_s16 = sld [smem:[#allocation35_spill]] }
 0xa2b   : > { %p2378_p1 = scmp.ge.s32.totalorder %s2992_s28, 2 }
 0xa30   : > { %s1899_s24 = sand.u32 1, %s3790_s0   ;;  %p3792_p3 = scmp.ne.s32.totalorder %s3791_s16, 0 }
 0xa31   : > { %s1900_s19 = scalar_lea.sflag [#allocation6], %s1899_s24 }
 0xa32   : > { %p2364_p5 = pnand %p2378_p1, %p3792_p3 }
 0xa34   : > { %2947 = dma.done.wait (!%p2364_p5), %s1900_s19, 128  }
 0xa35   : > { %2949 = vsyncadd (!%p2364_p5), %s1900_s19, 4294967168  ;;  %s33_s28 = sadd.s32 1, %s2992_s28   ;;  %s3793_s18 = sld [smem:[#allocation24_spill]] }
 0xa36   : > { %p30_p10 = scmp.ge.s32.totalorder %s33_s28, 10   ;;  %s3794_s27 = sld [smem:[#allocation32_spill]] }
 0xa37   : > { %s3795_s1 = sld [smem:[#allocation26_spill]]  ;;  %s3796_s23 = sld [smem:[#allocation33_spill]] }
 0xa38   : > { %s3797_s25 = sld [smem:[#allocation29_spill]]  ;;  %s3798_s7 = sld [smem:[#allocation30_spill]] }
 0xa39   : > { %s3799_s10 = sld [smem:[#allocation31_spill]]  ;;  %s3800_s19 = smov %s2960_s20 }
 0xa3a   : > { %s3802_s21 = smov %s2968_s22  ;;  %s3804_s24 = smov %s2984_s26 }
 0xa3b   :  { %32 = sbr.rel (!%p30_p10) target bundleno = 23 (0x17), region = 175 }
 0xa3c   : > { %s3801_s20 = smov %s3794_s27 }
 0xa3d   : > { %s3803_s22 = smov %s3795_s1 }
 0xa3e   : > { %s3805_s26 = smov %s3798_s7 }
 0xa3f   : > { %s3806_s27 = smov %s3799_s10 }
 0xa42   :  { %1905 = vsyncpa [#allocation5], 1 }
 0xa43   :  { %1907 = vsyncpa [#allocation5 + $0x1], 1 }
 0xa44   :  { %1908 = vsyncpa [#allocation8], 1 }
 0xa45   :  { %1909 = vsyncpa [#allocation11], 1 }
 0xa46   :  { %1910 = vsyncpa [#allocation6], 1 }
 0xa47   :  { %1912 = vsyncpa [#allocation6 + $0x1], 1 }

// kernel: tpu_custom_call.1
= control target key start
LH: loop header
LB: loop body
LE: loop exit
PB: predicated region body
PF: predicated region fallthrough
CT: control target
= control target key end

     0   :  { %s3674_s0 = inlined_call_operand.hbm [shape: f32[2,8,128], index: 0, kind: input, shape index: {}]   ;;  %s3675_s1 = inlined_call_operand.hbm [shape: f32[8,128], index: 1, kind: input, shape index: {}]   ;;  %s3676_s2 = inlined_call_operand.hbm [shape: f32[8,128], index: 2, kind: input, shape index: {}]   ;;  %s3677_s3 = inlined_call_operand.vmem [shape: f32[8,128], index: 3, kind: input, shape index: {}]   ;;  %s3678_s4 = inlined_call_operand.hbm [shape: f32[8,128], index: 4, kind: input, shape index: {}]   ;;  %s3679_s5 = inlined_call_operand.hbm [shape: bf16[4,128,384], index: 5, kind: input, shape index: {}]   ;;  %s3680_s6 = inlined_call_operand.hbm [shape: bf16[4,128,128], index: 6, kind: input, shape index: {}]   ;;  %s3681_s7 = inlined_call_operand.vmem [shape: f32[1,128], index: 7, kind: input, shape index: {}]   ;;  %s3682_s8 = inlined_call_operand.vmem [shape: f32[1,128], index: 8, kind: input, shape index: {}]   ;;  %s3683_s9 = inlined_call_operand.vmem [shape: f32[1,128], index: 9, kind: input, shape index: {}]   ;;  %s3684_s10 = inlined_call_operand.vmem [shape: f32[1,128], index: 10, kind: input, shape index: {}]   ;;  %s3685_s11 = inlined_call_operand.hbm [shape: bf16[128,512], index: 11, kind: input, shape index: {}]   ;;  %s3686_s12 = inlined_call_operand.vmem [shape: f32[1,512], index: 12, kind: input, shape index: {}]   ;;  %s3687_s13 = inlined_call_operand.hbm [shape: bf16[512,128], index: 13, kind: input, shape index: {}]   ;;  %s3688_s14 = inlined_call_operand.vmem [shape: f32[1,128], index: 14, kind: input, shape index: {}]   ;;  %s3689_s15 = inlined_call_operand.hbm [shape: f32[2,8,128], index: 15, kind: output, shape index: {}]  }
   0x1   :  { %3716 = sst [smem:[#allocation36_spill]] %s3674_s0 }
   0x2   :  { %3717 = sst [smem:[#allocation37_spill]] %s3675_s1 }
   0x3   :  { %3718 = sst [smem:[#allocation38_spill]] %s3676_s2 }
   0x4   :  { %3719 = sst [smem:[#allocation39_spill]] %s3677_s3 }
   0x5   :  { %3720 = sst [smem:[#allocation40_spill]] %s3681_s7 }
   0x6   :  { %3721 = sst [smem:[#allocation41_spill]] %s3682_s8 }
   0x7   :  { %3722 = sst [smem:[#allocation42_spill]] %s3683_s9 }
   0x8   :  { %3723 = sst [smem:[#allocation43_spill]] %s3684_s10 }
   0x9   :  { %3724 = sst [smem:[#allocation44_spill]] %s3686_s12 }
   0xa   :  { %3725 = sst [smem:[#allocation45_spill]] %s3688_s14 }
   0xb   :  { %3726 = sst [smem:[#allocation46_spill]] %s3689_s15 }
   0xc   :  { %20 = vsyncpa [#allocation5], 0 }
   0xd   :  { %22 = vsyncpa [#allocation5 + $0x1], 0 }
   0xe   :  { %23 = vsyncpa [#allocation8], 0 }
   0xf   :  { %24 = vsyncpa [#allocation11], 0 }
  0x10   :  { %25 = vsyncpa [#allocation6], 0 }
  0x11   :  { %27 = vsyncpa [#allocation6 + $0x1], 0  ;;  %s3095_s18 = smov 0   ;;  %s3097_s19 = smov 0  }
  0x12   :  { %s3099_s20 = smov 0   ;;  %s3101_s21 = smov 0  }
  0x13   :  { %s3103_s22 = smov 0   ;;  %s3105_s23 = smov 0  }
  0x14   :  { %s3107_s24 = smov 0   ;;  %s3109_s25 = smov 0  }
  0x15   :  { %s3111_s26 = smov 0   ;;  %s3113_s27 = smov 0  }
  0x16   :  { %s3115_s28 = smov 0  }
  0x17 LB: > { %3727 = sst [smem:[#allocation24_spill]] %s2956_s19  ;;  %s3151_s29 = sadd.s32 4294967295, %s2992_s28   ;;  %s2992_s28 = sphi %s3115_s28, %s33_s28   ;;  %s2988_s27 = sphi %s3113_s27, %s3806_s27   ;;  %s2984_s26 = sphi %s3111_s26, %s3805_s26   ;;  %s2980_s25 = sphi %s3109_s25, %s3797_s25   ;;  %s2976_s24 = sphi %s3107_s24, %s3804_s24   ;;  %s2972_s23 = sphi %s3105_s23, %s3796_s23   ;;  %s2968_s22 = sphi %s3103_s22, %s3803_s22   ;;  %s2964_s21 = sphi %s3101_s21, %s3802_s21   ;;  %s2960_s20 = sphi %s3099_s20, %s3801_s20   ;;  %s2956_s19 = sphi %s3097_s19, %s3800_s19   ;;  %s2952_s18 = sphi %s3095_s18, %s3793_s18  }
  0x18   : > { %3728 = sst [smem:[#allocation25_spill]] %s2964_s21  ;;  %p2057_p0 = scmp.ge.s32.totalorder %s2992_s28, 1 }
  0x19   : > { %3729 = sst [smem:[#allocation26_spill]] %s2972_s23  ;;  %p3691_p1 = scmp.eq.s32.totalorder %s3151_s29, 0 }
  0x1a   : > { %3730 = sst [smem:[#allocation27_spill]] %s2976_s24  ;;  %p406_p2 = scmp.lt.s32.totalorder %s2992_s28, 9 }
  0x1b   : > { %3731 = sst [smem:[#allocation28_spill]] %s2980_s25  ;;  %s2994_s16 = smov [#allocation7]  }
  0x1c   : > { %3732 = sst [smem:[#allocation29_spill]] %s2988_s27  ;;  %p3156_p3 = pnand %p2057_p0, %p406_p2 }
  0x1d   : > { %s419_s17 = sshll.u32 %s2994_s16, 4  ;;  %s3735_s1 = sld [smem:[#allocation37_spill]]  ;;  %s420_s17 = int_to_ptr.vmem [resolvable:$true] %s419_s17 }
  0x1e   : > { %s3733_s30 = scalar_select %p3156_p3, 1, 0 }
  0x1f   : > { %p2337_p4 = pneg %p3156_p3 }
  0x21   : > { %p3164_p5 = pnand %p2337_p4, %p3691_p1 }
  0x23   : > { %s3734_s15 = scalar_select %p3164_p5, 1, 0 }
  0x24   : > { %s2620_s12 = scalar_lea.hbm %s3735_s1, 128  ;;  %p3176_p7 = pneg %p3164_p5 }
  0x25   : > { %p2621_p6 = scmp.ne.s32.totalorder %s3735_s1, %s2620_s12  ;;  %p2627_p10 = scmp.lt.u32.totalorder %s2620_s12, %s3735_s1 }
  0x26   : > { %s3736_s16 = scalar_select %p3176_p7, 1, 0 }
  0x27   : > { %p2623_p8 = pnand %p3176_p7, %p2621_p6 }
  0x29   : > { %p2624_p9 = pneg %p2623_p8 }
  0x2b   : > { %p2629_p11 = pnand %p2627_p10, %p2624_p9 }
  0x2d   : > { %2632 = shalt.err (!%p2629_p11)
}
  0x2e   : > { %s2633_s14 = scalar_lea.vmem %s420_s17, 128  ;;  %p2641_p2 = scmp.lt.s32.totalorder %s420_s17, %s420_s17 }
  0x2f   : > { %p2634_p12 = scmp.ne.s32.totalorder %s420_s17, %s2633_s14  ;;  %p2642_p4 = scmp.lt.s32.totalorder %s2633_s14, %s2633_s14 }
  0x31   : > { %p2636_p13 = pnand %p2634_p12, %p3176_p7  ;;  %p2643_p1 = por %p2642_p4, %p2641_p2 }
  0x33   : > { %p2637_p0 = pneg %p2636_p13 }
  0x35   : > { %p2644_p3 = pnand %p2643_p1, %p2637_p0 }
  0x37   : > { %2647 = shalt.err (!%p2644_p3)
}
  0x38   : > { %2340 = dma.hbm_to_vmem [thread:$0]  (!%p3164_p5), %s3735_s1, 128, %s420_s17, [#allocation8]  }
  0x39   : > { %s2056_s3 = sadd.s32 4294967294, %s2992_s28   ;;  %s42_s8 = sadd.s32 1, %s2984_s26 }
  0x3a   : > { %s45_s12 = sadd.s32 1, %s2988_s27  ;;  %p43_p1 = scmp.ge.s32.totalorder %s42_s8, 4 }
  0x3b   : > { %s52_s25 = sadd.s32 1, %s2972_s23  ;;  %p3695_p3 = scmp.ne.s32.totalorder %s2972_s23, %s2968_s22 }
  0x3c   : > { %p60_p6 = scmp.eq.s32.totalorder %s2992_s28, 0  ;;  %s3808_s8 = smov (%p43_p1, %s42_s8), 0 }
  0x3d   : > { %3737 = sst [smem:[#allocation30_spill]] %s3808_s8  ;;  %s3810_s12 = smov (!%p43_p1, %s45_s12), %s2988_s27 }
  0x3e   : > { %p3207_p8 = por %p60_p6, %p3695_p3  ;;  %p3694_p9 = scmp.ne.s32.totalorder %s2968_s22, %s2964_s21 }
  0x3f   : > { %p47_p10 = scmp.ge.s32.totalorder %s3810_s12, 2  ;;  %s159_s14 = ssub.s32 %s2984_s26, %s3808_s8 }
  0x40   : > { %p3739_p11 = scmp.eq.s32.totalorder %s3151_s29, 0  ;;  %p160_p13 = scmp.eq.s32.totalorder %s159_s14, 0 }
  0x41   : > { %s3812_s12 = smov (%p47_p10, %s3810_s12), 0  ;;  %s162_s10 = sadd.s32 1, %s2960_s20 }
  0x42   : > { %p3220_p12 = por %p3739_p11, %p3694_p9  ;;  %3741 = sst [smem:[#allocation31_spill]] %s3812_s12 }
  0x43   : > { %p169_p0 = scmp.ne.s32.totalorder %s2960_s20, %s2956_s19  ;;  %s49_s1 = ssub.s32 %s2988_s27, %s3812_s12 }
  0x44   : > { %s3740_s9 = scalar_select %p3220_p12, 1, 0 }
  0x45   : > { %p175_p2 = scmp.ne.s32.totalorder %s2956_s19, %s2952_s18  ;;  %p50_p4 = scmp.eq.s32.totalorder %s49_s1, 0 }
  0x46   : > { %p3235_p1 = por %p169_p0, %p60_p6  ;;  %p3745_p10 = pmov %p3739_p11 }
  0x47   : > { %s3240_s7 = scalar_select %p160_p13, %s2960_s20, %s162_s10  }
  0x48   : > { %s3243_s14 = scalar_select %p50_p4, %s2972_s23, %s52_s25  }
  0x49   : > { %3743 = sst [smem:[#allocation32_spill]] %s3240_s7  ;;  %p3247_p11 = por %p175_p2, %p3745_p10 }
  0x4a   : > { %3744 = sst [smem:[#allocation33_spill]] %s3243_s14  ;;  %p393_p9 = scmp.eq.s32.totalorder %s3151_s29, 7 }
  0x4b   : > { %s3746_s24 = scalar_select %p3247_p11, 1, 0 }
  0x4c   : > { %p399_p3 = scmp.eq.s32.totalorder %s2056_s3, 7  ;;  %p2372_p12 = scmp.lt.s32.totalorder %s2992_s28, 8 }
  0x4d   : > { %3747 = sst [smem:[#allocation34_spill]] %s3746_s24  ;;  %p3748_p5 = scmp.ne.s32.totalorder %s2972_s23, %s2968_s22 }
  0x4e   : > { %s499_s18 = sand.u32 1, %s2992_s28   ;;  %p3750_p6 = scmp.ne.s32.totalorder %s2968_s22, %s2964_s21 }
  0x4f   : > { %p3256_p7 = por %p393_p9, %p3748_p5  ;;  %s501_s25 = sand.u32 1, %s2972_s23  }
  0x50   : > { %p3264_p13 = por %p399_p3, %p3750_p6  ;;  %s2065_s12 = sshll.u32 %s2988_s27, 7 }
  0x51   : > { %s3749_s1 = scalar_select %p3256_p7, 1, 0 }
  0x52   : > { %s3751_s10 = scalar_select %p3264_p13, 1, 0 }
  0x53   : > { %s2064_s14 = sshll.u32 %s501_s25, 3  ;;  %s3753_s0 = sld [smem:[#allocation36_spill]] }
  0x54   : > { %3752 = sst [smem:[#allocation35_spill]] %s3751_s10  ;;  %p3277_p5 = pnand %p2372_p12, %p3207_p8 }
  0x55   : > { %s503_s10 = scalar_lea.vmem [#allocation4], %s2064_s14  ;;  %p3283_p3 = pnand %p2372_p12, %p3235_p1 }
  0x56   : > { %s510_s23 = sshll.u32 %s503_s10, 4  ;;  %s3289_s7 = scalar_lea.sflag [#allocation5], %s499_s18  ;;  %s3287_s23 = int_to_ptr.vmem [resolvable:$true] %s510_s23 }
  0x57   : > { %s3755_s25 = scalar_select %p3283_p3, 1, 0 }
  0x58   : > { %p2650_p8 = pneg %p3277_p5 }
  0x59   : > { %s3273_s24 = scalar_lea.hbm %s3753_s0, %s2065_s12  ;;  %s2653_s8 = scalar_lea.hbm %s3753_s0, 256 }
  0x5a   : > { %s2648_s19 = scalar_lea.hbm %s3273_s24, 128  ;;  %p2654_p12 = scmp.lt.u32.totalorder %s3273_s24, %s3753_s0 }
  0x5b   : > { %p2649_p9 = scmp.ne.s32.totalorder %s3273_s24, %s2648_s19  ;;  %p2655_p4 = scmp.lt.u32.totalorder %s2653_s8, %s2648_s19 }
  0x5c   : > { %p2657_p10 = scmp.lt.u32.totalorder %s2648_s19, %s3273_s24 }
  0x5d   : > { %p2651_p0 = pnand %p2650_p8, %p2649_p9  ;;  %p2656_p1 = por %p2655_p4, %p2654_p12 }
  0x5f   : > { %p2652_p2 = pneg %p2651_p0  ;;  %p2658_p6 = por %p2657_p10, %p2656_p1 }
  0x61   : > { %p2659_p13 = pnand %p2658_p6, %p2652_p2 }
  0x63   : > { %2662 = shalt.err (!%p2659_p13)
}
  0x64   : > { %s2663_s18 = scalar_lea.vmem %s3287_s23, 128  ;;  %s2995_s12 = smov [#allocation4]  }
  0x65   : > { %p2664_p9 = scmp.ne.s32.totalorder %s3287_s23, %s2663_s18  ;;  %s2668_s17 = sshll.u32 %s2995_s12, 4  ;;  %s2669_s17 = int_to_ptr.vmem [resolvable:$false] %s2668_s17 }
  0x66   : > { %s2670_s14 = scalar_lea.vmem %s2669_s17, 256  ;;  %p2671_p11 = scmp.lt.s32.totalorder %s3287_s23, %s2669_s17 }
  0x67   : > { %p2666_p0 = pnand %p2664_p9, %p2650_p8  ;;  %p2672_p12 = scmp.lt.s32.totalorder %s2670_s14, %s2663_s18 }
  0x69   : > { %p2667_p7 = pneg %p2666_p0  ;;  %p2673_p4 = por %p2672_p12, %p2671_p11 }
  0x6b   : > { %p2674_p1 = pnand %p2673_p4, %p2667_p7 }
  0x6d   : > { %2677 = shalt.err (!%p2674_p1)
}
  0x6e   : > { %2356 = dma.hbm_to_vmem [thread:$0]  (!%p3277_p5), %s3273_s24, 128, %s3287_s23, %s3289_s7  }
  0x6f   : > { %s2996_s19 = smov [#allocation9]   ;;  %s2997_s10 = smov [#allocation10]  }
  0x70   : > { %s430_s8 = sshll.u32 %s2996_s19, 4  ;;  %s444_s0 = sshll.u32 %s2997_s10, 4  ;;  %s431_s8 = int_to_ptr.vmem [resolvable:$true] %s430_s8  ;;  %s445_s0 = int_to_ptr.vmem [resolvable:$true] %s444_s0 }
  0x71   : > { %s3756_s2 = sld [smem:[#allocation38_spill]]  ;;  %p3757_p11 = scmp.ne.s32.totalorder %s3736_s16, 0 }
  0x77   : > { %s2678_s17 = scalar_lea.hbm %s3756_s2, 128 }
  0x78   : > { %p2679_p7 = scmp.ne.s32.totalorder %s3756_s2, %s2678_s17  ;;  %p2685_p5 = scmp.lt.u32.totalorder %s2678_s17, %s3756_s2 }
  0x7a   : > { %p2681_p13 = pnand %p2679_p7, %p3757_p11 }
  0x7c   : > { %p2682_p8 = pneg %p2681_p13 }
  0x7e   : > { %p2687_p2 = pnand %p2685_p5, %p2682_p8 }
  0x80   : > { %2690 = shalt.err (!%p2687_p2)
}
  0x81   : > { %s2691_s23 = scalar_lea.vmem %s431_s8, 128  ;;  %p2699_p0 = scmp.lt.s32.totalorder %s431_s8, %s431_s8 }
  0x82   : > { %p2692_p10 = scmp.ne.s32.totalorder %s431_s8, %s2691_s23  ;;  %p2700_p12 = scmp.lt.s32.totalorder %s2691_s23, %s2691_s23 }
  0x84   : > { %p2694_p6 = pnand %p2692_p10, %p3757_p11  ;;  %p2701_p4 = por %p2700_p12, %p2699_p0 }
  0x86   : > { %p2695_p9 = pneg %p2694_p6 }
  0x88   : > { %p2702_p1 = pnand %p2701_p4, %p2695_p9 }
  0x8a   : > { %2705 = shalt.err (!%p2702_p1)
}
  0x8b   : > { %p3758_p7 = scmp.ne.s32.totalorder %s3734_s15, 0  ;;  %s3713_s21 = sand.u32 1, %s2960_s20  }
  0x8c   : > { %s2706_s12 = scalar_lea.hbm %s3678_s4, 128 }
  0x8d   : > { %2343 = dma.hbm_to_vmem [thread:$0]  (!%p3758_p7), %s3756_s2, 128, %s431_s8, [#allocation8]  }
  0x8e   : > { %p2707_p13 = scmp.ne.s32.totalorder %s3678_s4, %s2706_s12  ;;  %p2713_p2 = scmp.lt.u32.totalorder %s2706_s12, %s3678_s4 }
  0x90   : > { %p2709_p8 = pnand %p2707_p13, %p3757_p11 }
  0x92   : > { %p2710_p5 = pneg %p2709_p8 }
  0x94   : > { %p2715_p10 = pnand %p2713_p2, %p2710_p5 }
  0x96   : > { %2718 = shalt.err (!%p2715_p10)
}
  0x97   : > { %s2719_s8 = scalar_lea.vmem %s445_s0, 128  ;;  %p2727_p12 = scmp.lt.s32.totalorder %s445_s0, %s445_s0 }
  0x98   : > { %p2720_p6 = scmp.ne.s32.totalorder %s445_s0, %s2719_s8  ;;  %p2728_p4 = scmp.lt.s32.totalorder %s2719_s8, %s2719_s8 }
  0x9a   : > { %p2722_p9 = pnand %p2720_p6, %p3757_p11  ;;  %p2729_p1 = por %p2728_p4, %p2727_p12 }
  0x9c   : > { %p2723_p0 = pneg %p2722_p9 }
  0x9e   : > { %p2730_p3 = pnand %p2729_p1, %p2723_p0 }
  0xa0   : > { %2733 = shalt.err (!%p2730_p3)
}
  0xa1   : > { %2346 = dma.hbm_to_vmem [thread:$0]  (!%p3758_p7), %s3678_s4, 128, %s445_s0, [#allocation11]  }
  0xa2   : > { %s2306_s27 = smul.u32 192, %s3713_s21  ;;  %s2998_s3 = smov [#allocation14]  }
  0xa3   : > { %s2307_s19 = smul.u32 3072, %s2984_s26  ;;  %s3364_s8 = sshll.u32 %s2998_s3, 4  ;;  %s467_s8 = int_to_ptr.vmem [resolvable:$true] %s3364_s8 }
  0xa4   : > { %s521_s18 = scalar_lea.vmem [#allocation12], %s2306_s27  ;;  %p3759_p13 = scmp.ne.s32.totalorder %s3755_s25, 0 }
  0xa5   : > { %s3360_s17 = scalar_lea.hbm %s3679_s5, %s2307_s19  ;;  %s528_s14 = sshll.u32 %s521_s18, 4  ;;  %s3362_s14 = int_to_ptr.vmem [resolvable:$true] %s528_s14 }
  0xa6   : > { %s2734_s0 = scalar_lea.hbm %s3360_s17, 3072  ;;  %p3714_p8 = pneg %p3759_p13 }
  0xa7   : > { %p2735_p3 = scmp.ne.s32.totalorder %s3360_s17, %s2734_s0  ;;  %s2739_s19 = scalar_lea.hbm %s3679_s5, 12288 }
  0xa8   : > { %p2740_p10 = scmp.lt.u32.totalorder %s3360_s17, %s3679_s5  ;;  %p2741_p6 = scmp.lt.u32.totalorder %s2739_s19, %s2734_s0 }
  0xa9   : > { %p2737_p5 = pnand %p3714_p8, %p2735_p3  ;;  %p2743_p0 = scmp.lt.u32.totalorder %s2734_s0, %s3360_s17 }
  0xaa   : > { %p2742_p9 = por %p2741_p6, %p2740_p10 }
  0xab   : > { %p2738_p2 = pneg %p2737_p5 }
  0xac   : > { %p2744_p12 = por %p2743_p0, %p2742_p9 }
  0xae   : > { %p2745_p4 = pnand %p2744_p12, %p2738_p2 }
  0xb0   : > { %2748 = shalt.err (!%p2745_p4)
}
  0xb1   : > { %s2749_s12 = scalar_lea.vmem %s3362_s14, 3072  ;;  %s2999_s18 = smov [#allocation12]  }
  0xb2   : > { %p2750_p1 = scmp.ne.s32.totalorder %s3362_s14, %s2749_s12  ;;  %s2754_s3 = sshll.u32 %s2999_s18, 4  ;;  %s2755_s3 = int_to_ptr.vmem [resolvable:$false] %s2754_s3 }
  0xb3   : > { %s2756_s23 = scalar_lea.vmem %s2755_s3, 6144  ;;  %p2757_p7 = scmp.lt.s32.totalorder %s3362_s14, %s2755_s3 }
  0xb4   : > { %p2752_p3 = pnand %p2750_p1, %p3714_p8  ;;  %p2758_p10 = scmp.lt.s32.totalorder %s2756_s23, %s2749_s12 }
  0xb6   : > { %p2753_p5 = pneg %p2752_p3  ;;  %p2759_p6 = por %p2758_p10, %p2757_p7 }
  0xb8   : > { %p2760_p9 = pnand %p2759_p6, %p2753_p5 }
  0xba   : > { %2763 = shalt.err (!%p2760_p9)
}
  0xbb   : > { %s3000_s0 = smov 192   ;;  %s3001_s24 = smov 12  }
  0xbc   : > { %2359 = dma.hbm_to_vmem [thread:$0]  (!%p3759_p13), %s3360_s17, 3072, %s3362_s14, %s3289_s7, %s3000_s0, %s3000_s0, %s3001_s24  }
  0xbd   : > { %s2764_s27 = scalar_lea.hbm %s3685_s11, 4096 }
  0xbe   : > { %p2765_p7 = scmp.ne.s32.totalorder %s3685_s11, %s2764_s27  ;;  %p2771_p12 = scmp.lt.u32.totalorder %s2764_s27, %s3685_s11 }
  0xc0   : > { %p2767_p2 = pnand %p2765_p7, %p3757_p11 }
  0xc2   : > { %p2768_p0 = pneg %p2767_p2 }
  0xc4   : > { %p2773_p4 = pnand %p2771_p12, %p2768_p0 }
  0xc6   : > { %2776 = shalt.err (!%p2773_p4)
}
  0xc7   : > { %s2777_s21 = scalar_lea.vmem %s467_s8, 4096  ;;  %p2785_p10 = scmp.lt.s32.totalorder %s467_s8, %s467_s8 }
  0xc8   : > { %p2778_p1 = scmp.ne.s32.totalorder %s467_s8, %s2777_s21  ;;  %p2786_p6 = scmp.lt.s32.totalorder %s2777_s21, %s2777_s21 }
  0xca   : > { %p2780_p3 = pnand %p2778_p1, %p3757_p11  ;;  %p2787_p9 = por %p2786_p6, %p2785_p10 }
  0xcc   : > { %p2781_p5 = pneg %p2780_p3 }
  0xce   : > { %p2788_p8 = pnand %p2787_p9, %p2781_p5 }
  0xd0   : > { %2791 = shalt.err (!%p2788_p8)
}
  0xd1   : > { %s3002_s17 = smov 256   ;;  %s3003_s14 = smov 16  }
  0xd2   : > { %p3760_p7 = scmp.ne.s32.totalorder %s3734_s15, 0  ;;  %s3004_s19 = smov [#allocation15]  }
  0xd3   : > { %s482_s10 = sshll.u32 %s3004_s19, 4  ;;  %s2792_s12 = scalar_lea.hbm %s3687_s13, 4096  ;;  %s483_s10 = int_to_ptr.vmem [resolvable:$true] %s482_s10 }
  0xd4   : > { %2349 = dma.hbm_to_vmem [thread:$0]  (!%p3760_p7), %s3685_s11, 4096, %s467_s8, [#allocation8], %s3002_s17, %s3002_s17, %s3003_s14  }
  0xd5   : > { %p2793_p8 = scmp.ne.s32.totalorder %s3687_s13, %s2792_s12  ;;  %p2799_p12 = scmp.lt.u32.totalorder %s2792_s12, %s3687_s13 }
  0xd7   : > { %p2795_p2 = pnand %p2793_p8, %p3757_p11 }
  0xd9   : > { %p2796_p0 = pneg %p2795_p2 }
  0xdb   : > { %p2801_p4 = pnand %p2799_p12, %p2796_p0 }
  0xdd   : > { %2804 = shalt.err (!%p2801_p4)
}
  0xde   : > { %s2805_s8 = scalar_lea.vmem %s483_s10, 4096  ;;  %p2813_p10 = scmp.lt.s32.totalorder %s483_s10, %s483_s10 }
  0xdf   : > { %p2806_p1 = scmp.ne.s32.totalorder %s483_s10, %s2805_s8  ;;  %p2814_p6 = scmp.lt.s32.totalorder %s2805_s8, %s2805_s8 }
  0xe1   : > { %p2808_p3 = pnand %p2806_p1, %p3757_p11  ;;  %p2815_p9 = por %p2814_p6, %p2813_p10 }
  0xe3   : > { %p2809_p5 = pneg %p2808_p3 }
  0xe5   : > { %p2816_p13 = pnand %p2815_p9, %p2809_p5 }
  0xe7   : > { %2819 = shalt.err (!%p2816_p13)
}
  0xe8   : > { %s3005_s17 = smov 64   ;;  %s3006_s2 = smov 4  }
  0xe9   : > { %2352 = dma.hbm_to_vmem [thread:$0]  (!%p3760_p7), %s3687_s13, 4096, %s483_s10, [#allocation11], %s3005_s17, %s3005_s17, %s3006_s2  }
  0xea   : > { %s3761_s16 = sand.u32 1, %s2960_s20   ;;  %s2187_s19 = sshll.u32 %s2984_s26, 10 }
  0xeb   : > { %s2067_s24 = sshll.u32 %s3761_s16, 6  ;;  %s3438_s12 = scalar_lea.hbm %s3680_s6, %s2187_s19 }
  0xec   : > { %s542_s15 = scalar_lea.vmem [#allocation13], %s2067_s24  ;;  %s2820_s3 = scalar_lea.hbm %s3438_s12, 1024 }
  0xed   : > { %s549_s21 = sshll.u32 %s542_s15, 4  ;;  %p2821_p11 = scmp.ne.s32.totalorder %s3438_s12, %s2820_s3  ;;  %s3440_s21 = int_to_ptr.vmem [resolvable:$true] %s549_s21 }
  0xee   : > { %p3762_p13 = scmp.ne.s32.totalorder %s3755_s25, 0  ;;  %s2825_s8 = scalar_lea.hbm %s3680_s6, 4096 }
  0xef   : > { %p2826_p0 = scmp.lt.u32.totalorder %s3438_s12, %s3680_s6  ;;  %p2827_p12 = scmp.lt.u32.totalorder %s2825_s8, %s2820_s3 }
  0xf0   : > { %p3763_p7 = pneg %p3762_p13  ;;  %p2829_p1 = scmp.lt.u32.totalorder %s2820_s3, %s3438_s12 }
  0xf1   : > { %p2828_p4 = por %p2827_p12, %p2826_p0 }
  0xf2   : > { %p2823_p8 = pnand %p2821_p11, %p3763_p7 }
  0xf3   : > { %p2830_p3 = por %p2829_p1, %p2828_p4 }
  0xf4   : > { %p2824_p2 = pneg %p2823_p8 }
  0xf6   : > { %p2831_p5 = pnand %p2830_p3, %p2824_p2 }
  0xf8   : > { %2834 = shalt.err (!%p2831_p5)
}
  0xf9   : > { %s2835_s16 = scalar_lea.vmem %s3440_s21, 1024  ;;  %p3764_p6 = pmov %p3763_p7 }
  0xfa   : > { %p2836_p10 = scmp.ne.s32.totalorder %s3440_s21, %s2835_s16  ;;  %s3007_s24 = smov [#allocation13]  }
  0xfb   : > { %s2840_s19 = sshll.u32 %s3007_s24, 4  ;;  %s2841_s19 = int_to_ptr.vmem [resolvable:$false] %s2840_s19 }
  0xfc   : > { %p2838_p9 = pnand %p2836_p10, %p3764_p6  ;;  %s2842_s27 = scalar_lea.vmem %s2841_s19, 2048 }
  0xfd   : > { %p2843_p7 = scmp.lt.s32.totalorder %s3440_s21, %s2841_s19  ;;  %p2844_p8 = scmp.lt.s32.totalorder %s2842_s27, %s2835_s16 }
  0xfe   : > { %p2839_p11 = pneg %p2838_p9 }
  0xff   : > { %p2845_p0 = por %p2844_p8, %p2843_p7 }
 0x101   : > { %p2846_p12 = pnand %p2845_p0, %p2839_p11 }
 0x103   : > { %2849 = shalt.err (!%p2846_p12)
}
 0x104   : > { %2362 = dma.hbm_to_vmem [thread:$0]  (!%p3762_p13), %s3438_s12, 1024, %s3440_s21, %s3289_s7, %s3005_s17, %s3005_s17, %s3006_s2  }
 0x105   : > { %p3765_p2 = scmp.ne.s32.totalorder %s3733_s30, 0 }
 0x106   : > { %s563_s18 = sand.u32 (!%p3765_p2), 1, %s3151_s29   ;;  %s565_s15 = sand.u32 (!%p3765_p2), 1, %s2968_s22  }
 0x107   : > { %561 = sbr.rel (%p3765_p2) target bundleno = 2602 (0xa2a), region = 80  ;;  %s3475_s3 = sshll.u32 (!%p3765_p2), %s565_s15, 3 }
 0x108   : > { %s564_s25 = scalar_lea.sflag (!%p3765_p2), [#allocation5], %s563_s18  ;;  %s567_s10 = scalar_lea.vmem (!%p3765_p2), [#allocation4], %s3475_s3 }
 0x109   : > { %p3766_p4 = scmp.ne.s32.totalorder (!%p3765_p2), %s3740_s9, 0 }
 0x10e   : > { %2923 = dma.done.wait (%p3766_p4), %s564_s25, 128  }
 0x10f   : > { %2925 = vsyncadd (%p3766_p4), %s564_s25, 4294967168  ;;  %p3767_p13 = scmp.eq.s32.totalorder %s3151_s29, 0 }
 0x111   : > { %2927 = dma.done.wait (%p3767_p13), [#allocation8], 256   ;;  %p3768_p1 = pmov %p3767_p13 }
 0x113   : > { %2929 = vsyncadd (%p3768_p1), [#allocation8], 4294967040  ;;  %p3769_p3 = pmov %p3768_p1 }
 0x114   : > { %p3770_p5 = pmov %p3768_p1 }
 0x115   : > { %2931 = dma.done.wait (%p3769_p3), [#allocation11], 128  }
 0x116   : > { %2933 = vsyncadd (%p3770_p5), [#allocation11], 4294967168  ;;  %s3771_s30 = sld [smem:[#allocation24_spill]]  ;;  %s3772_s7 = sld [smem:[#allocation34_spill]] }
 0x11c   : > { %s586_s17 = sand.u32 1, %s3771_s30   ;;  %p3773_p10 = scmp.ne.s32.totalorder %s3772_s7, 0 }
 0x11d   : > { %s2308_s2 = smul.u32 192, %s586_s17 }
 0x11f   : > { %s3491_s12 = scalar_lea.vmem [#allocation12], %s2308_s2 }
 0x120   : > { %2935 = dma.done.wait (%p3773_p10), %s564_s25, 4096  }
 0x121   : > { %2937 = vsyncadd (%p3773_p10), %s564_s25, 4294963200  ;;  %s2075_s9 = sshll.u32 %s586_s17, 6  ;;  %p3774_p6 = pmov %p3768_p1 }
 0x122   : > { %s3497_s21 = scalar_lea.vmem [#allocation13], %s2075_s9 }
 0x123   : > { %2939 = dma.done.wait (%p3774_p6), [#allocation8], 4096   ;;  %p3775_p9 = pmov %p3768_p1 }
 0x124   : > { %p3776_p11 = pmov %p3768_p1 }
 0x125   : > { %2941 = vsyncadd (%p3775_p9), [#allocation8], 4294963200 }
 0x126   : > { %2943 = dma.done.wait (%p3776_p11), [#allocation11], 4096   ;;  %p3777_p7 = pmov %p3768_p1 }
 0x127   : > { %s661_s23 = scalar_lea.vmem [#allocation16], %s3475_s3  ;;  %s3778_s8 = sld [smem:[#allocation27_spill]] }
 0x128   : > { %2945 = vsyncadd (%p3777_p7), [#allocation11], 4294963200 }
 0x12d   : > { %p2079_p8 = scmp.ne.s32.totalorder %s3778_s8, 0 }
 0x12e   : > { %v667_v0 = vld [vmem:[%s567_s10] sm:$0xff] (!%p2079_p8)  ;;  %v3008_v5 = vmov (!%p2079_p8), 0.0   ;;  %s3779_s0 = sld [smem:[#allocation40_spill]] (!%p2079_p8)  ;;  %s3780_s19 = sld [smem:[#allocation41_spill]] (!%p2079_p8) }
 0x12f   : > { %666 = sbr.rel (%p2079_p8) target bundleno = 617 (0x269), region = 116  ;;  %670 = vadd.xlane.f32.xlu0 (!%p2079_p8), %v667_v0  ;;  %698 = vst [vmem:[#allocation3] sm:$0xff] (!%p2079_p8), %v3008_v5 }
 0x134   : > { %v2080_v10 = vld [vmem:[%s3779_s0] ss:$0 sm:$0xff] (!%p2079_p8) }
 0x135   : > { %v2081_v12 = vld [vmem:[%s3780_s19] ss:$0 sm:$0xff] (!%p2079_p8) }
 0x1bc   : > { %v671_v1 = vpop.xlane.xlu0 %670 }
 0x1bd   : > { %v673_v2 = vmul.f32 0.0078125, %v671_v1 }
 0x1bf   : > { %v674_v3 = vsub.f32 %v667_v0, %v673_v2 }
 0x1c1   : > { %v675_v4 = vmul.f32 %v674_v3, %v674_v3 }
 0x1c3   : > { %676 = vadd.xlane.f32.xlu0 %v675_v4 }
 0x250   : > { %v677_v6 = vpop.xlane.xlu0 %676 }
 0x251   : > { %v678_v7 = vmul.f32 0.0078125, %v677_v6 }
 0x253   : > { %v679_v8 = vadd.f32 1e-05, %v678_v7 }
 0x255   : > { %2484 = vrsqrt.f32 %v679_v8 }
 0x25f   : > { %v2485_v9 = vpop.eup %2484 }
 0x260   : > { %v681_v11 = vmul.f32 %v2485_v9, %v674_v3 }
 0x262   : > { %v688_v13 = vmul.f32 %v2080_v10, %v681_v11 }
 0x264   : > { %v695_v14 = vadd.f32 %v2081_v12, %v688_v13 }
 0x266   : > { %v696_v15 = vpack.c.bf16 %v695_v14, %v695_v14 }
 0x268   : > { %697 = vst [vmem:[#allocation2] sm:$0xf] %v696_v15 }
 0x269 PF: > { %v2486_v16 = vld [vmem:[%s3491_s12 + $0x4] ss:$12 sps:$4 sm:$0xff]   ;;  %v2488_v17 = vld [vmem:[%s3491_s12] ss:$12 sps:$4 sm:$0xff]   ;;  %v3009_v18 = vmov 0   ;;  %v3010_v35 = vmov 0.0   ;;  %v998_v3 = vlaneseq }
 0x26a   : > { %892 = vmatprep.mubr.bf16.mxu0 %v3009_v18  ;;  %860 = vmatprep.subr.bf16.mxu0 %v2486_v16  ;;  %v2489_v19 = vld [vmem:[%s3491_s12 + $0x1c] ss:$12 sps:$4 sm:$0xff]   ;;  %v2491_v20 = vld [vmem:[%s3491_s12 + $0x18] ss:$12 sps:$4 sm:$0xff]   ;;  %v2492_v21 = vld [vmem:[%s3491_s12 + $0x34] ss:$12 sps:$4 sm:$0xff]  }
 0x26b   : > { %861 = vmatpush1.bf16.msra.mxu0 %v2488_v17  ;;  %v2494_v22 = vld [vmem:[%s3491_s12 + $0x30] ss:$12 sps:$4 sm:$0xff]   ;;  %v2495_v23 = vld [vmem:[%s3491_s12 + $0x4c] ss:$12 sps:$4 sm:$0xff]   ;;  %v2497_v24 = vld [vmem:[%s3491_s12 + $0x48] ss:$12 sps:$4 sm:$0xff]   ;;  %2254 = vmatprep.subr.bf16.mxu1 %v3010_v35 }
 0x26c   : > { %862 = vmatprep.subr.bf16.mxu0 %v2489_v19  ;;  %v2498_v25 = vld [vmem:[%s3491_s12 + $0x64] ss:$12 sps:$4 sm:$0xff]   ;;  %v2500_v26 = vld [vmem:[%s3491_s12 + $0x60] ss:$12 sps:$4 sm:$0xff]   ;;  %v2501_v27 = vld [vmem:[%s3491_s12 + $0x7c] ss:$12 sps:$4 sm:$0xff]  }
 0x26d   : > { %v2503_v28 = vld [vmem:[%s3491_s12 + $0x78] ss:$12 sps:$4 sm:$0xff]   ;;  %v2504_v29 = vld [vmem:[%s3491_s12 + $0x94] ss:$12 sps:$4 sm:$0xff]   ;;  %v2506_v30 = vld [vmem:[%s3491_s12 + $0x90] ss:$12 sps:$4 sm:$0xff]  }
 0x26e   : > { %v2507_v31 = vld [vmem:[%s3491_s12 + $0xac] ss:$12 sps:$4 sm:$0xff]   ;;  %v2509_v32 = vld [vmem:[%s3491_s12 + $0xa8] ss:$12 sps:$4 sm:$0xff]   ;;  %v2513_v38 = vld [vmem:[%s3491_s12 + $0x50] ss:$12 sps:$4 sm:$0xff]  }
 0x26f   : > { %863 = vmatpush1.bf16.msra.mxu0 %v2491_v20  ;;  %v699_v33 = vld [vmem:[#allocation2] sm:$0xf]  ;;  %v2510_v34 = vld [vmem:[%s3491_s12 + $0x8] ss:$12 sps:$4 sm:$0xff]   ;;  %v2512_v37 = vld [vmem:[%s3491_s12 + $0x38] ss:$12 sps:$4 sm:$0xff]  }
 0x270   : > { %864 = vmatprep.subr.bf16.mxu0 %v2492_v21  ;;  %2255 = vmatpush3.bf16.msra.mxu1 %v2510_v34  ;;  %v2511_v36 = vld [vmem:[%s3491_s12 + $0x20] ss:$12 sps:$4 sm:$0xff]   ;;  %v2514_v39 = vld [vmem:[%s3491_s12 + $0x68] ss:$12 sps:$4 sm:$0xff]   ;;  %v2516_v41 = vld [vmem:[%s3491_s12 + $0x98] ss:$12 sps:$4 sm:$0xff]  }
 0x271   : > { %2256 = vmatprep.subr.bf16.mxu1 %v3010_v35  ;;  %v2515_v40 = vld [vmem:[%s3491_s12 + $0x80] ss:$12 sps:$4 sm:$0xff]   ;;  %v2517_v42 = vld [vmem:[%s3491_s12 + $0xb0] ss:$12 sps:$4 sm:$0xff]   ;;  %vm3011_vm0 = vmmov 0   ;;  %s3012_s27 = smov 64  }
 0x272   : > { %2270 = vmatprep.mubr.msk.bf16.mxu1 %vm3011_vm0, %v3010_v35  ;;  %s3781_s30 = sld [smem:[#allocation39_spill]]  ;;  %v954_v48 = vld [vmem:[#allocation10] sm:$0xff]  ;;  %v946_v52 = vld [vmem:[#allocation9] sm:$0xff]  ;;  %v942_v53 = vld [vmem:[#allocation7] sm:$0xff]  ;;  %vm1018_vm1 = vcmask 1043456   ;;  %v3563_v4 = vshrl.u32 %v998_v3, 7 }
 0x273   : > { %865 = vmatpush1.bf16.msra.mxu0 %v2494_v22  ;;  %v1001_v5 = vand.u32 127, %v998_v3  ;;  %vm1004_vm3 = vcmask 64512   ;;  %v2518_v18 = vld [vmem:[%s3497_s21] sm:$0xff]   ;;  %v2519_v19 = vld [vmem:[%s3497_s21 + $0x8] sm:$0xff]   ;;  %v2520_v20 = vld [vmem:[%s3497_s21 + $0x10] sm:$0xff]   ;;  %s3782_s7 = sld [smem:[#allocation27_spill]] }
 0x274   : > { %866 = vmatprep.subr.bf16.mxu0 %v2495_v23  ;;  %2257 = vmatpush3.bf16.msra.mxu1 %v2511_v36  ;;  %v2521_v21 = vld [vmem:[%s3497_s21 + $0x18] sm:$0xff]   ;;  %v2522_v22 = vld [vmem:[%s3497_s21 + $0x20] sm:$0xff]   ;;  %v2523_v23 = vld [vmem:[%s3497_s21 + $0x28] sm:$0xff]  }
 0x275   : > { %2258 = vmatprep.subr.bf16.mxu1 %v3010_v35  ;;  %vm1002_vm2 = vcmp.gt.s32.totalorder %v1001_v5, %v3563_v4  ;;  %v1064_v34 = vld [vmem:[#allocation3] sm:$0xff] }
 0x277   : > { %867 = vmatpush1.bf16.msra.mxu0 %v2497_v24  ;;  %v2524_v24 = vld [vmem:[%s3497_s21 + $0x30] sm:$0xff]  }
 0x278   : > { %868 = vmatprep.subr.bf16.mxu0 %v2498_v25  ;;  %2259 = vmatpush3.bf16.msra.mxu1 %v2512_v37  ;;  %v950_v47 = vld [vmem:[%s3781_s30] sm:$0xff]  ;;  %v2525_v25 = vld [vmem:[%s3497_s21 + $0x38] sm:$0xff]  }
 0x279   : > { %2260 = vmatprep.subr.bf16.mxu1 %v3010_v35  ;;  %p2115_p0 = scmp.ne.s32.totalorder %s3782_s7, 3 }
 0x27a   : > { %v2560_v3 = vld [vmem:[#allocation14 + $0xa4] ss:$16 sps:$4 sm:$0xff] (!%p2115_p0)   ;;  %v2562_v5 = vld [vmem:[#allocation14 + $0xac] ss:$16 sps:$4 sm:$0xff] (!%p2115_p0)   ;;  %s3783_s2 = sld [smem:[#allocation42_spill]] (!%p2115_p0)  ;;  %s3784_s21 = sld [smem:[#allocation43_spill]] (!%p2115_p0) }
 0x27b   : > { %869 = vmatpush1.bf16.msra.mxu0 %v2500_v26  ;;  %s3785_s14 = sld [smem:[#allocation44_spill]] (!%p2115_p0)  ;;  %s3786_s24 = sld [smem:[#allocation45_spill]] (!%p2115_p0) }
 0x27c   : > { %870 = vmatprep.subr.bf16.mxu0 %v2501_v27  ;;  %2261 = vmatpush3.bf16.msra.mxu1 %v2513_v38 }
 0x27d   : > { %2262 = vmatprep.subr.bf16.mxu1 %v3010_v35 }
 0x27f   : > { %871 = vmatpush1.bf16.msra.mxu0 %v2503_v28 }
 0x280   : > { %872 = vmatprep.subr.bf16.mxu0 %v2504_v29  ;;  %2263 = vmatpush3.bf16.msra.mxu1 %v2514_v39 }
 0x281   : > { %2264 = vmatprep.subr.bf16.mxu1 %v3010_v35 }
 0x283   : > { %873 = vmatpush1.bf16.msra.mxu0 %v2506_v30 }
 0x284   : > { %874 = vmatprep.subr.bf16.mxu0 %v2507_v31  ;;  %2265 = vmatpush3.bf16.msra.mxu1 %v2515_v40 }
 0x285   : > { %2266 = vmatprep.subr.bf16.mxu1 %v3010_v35 }
 0x287   : > { %875 = vmatpush1.bf16.msra.mxu0 %v2509_v32 }
 0x288   : > { %2286 = vmatprep.subr.bf16.mxu0 %v3010_v35  ;;  %2267 = vmatpush3.bf16.msra.mxu1 %v2516_v41 }
 0x289   : > { %2268 = vmatprep.subr.bf16.mxu1 %v3010_v35 }
 0x28a   : > { %893 = vmatmul.mubr.bf16.vlgmr.msra.gmra.mrb[0].mxu0 %v699_v33 }
 0x28b   : > { %2302 = vmatprep.mubr.msk.bf16.mxu0 %vm3011_vm0, %v3010_v35  ;;  %2287 = vmatpush3.bf16.msra.mxu0 %v2518_v18  ;;  %v2579_v18 = vld [vmem:[#allocation15 + $0xc0] sm:$0xff] (!%p2115_p0)  }
 0x28c   : > { %2269 = vmatpush3.bf16.msra.mxu1 %v2517_v42  ;;  %2288 = vmatprep.subr.bf16.mxu0 %v3010_v35 }
 0x28d   : > { %2274 = vmatprep.subr.bf16.mxu1 %v3010_v35 }
 0x28f   : > { %2271 = vmatmul.mubr.bf16.vlgmr.msra.gmra.mrb[0].mxu1 %v699_v33  ;;  %2289 = vmatpush3.bf16.msra.mxu0 %v2519_v19 }
 0x290   : > { %2276 = vmatprep.mubr.msk.bf16.mxu1 %vm3011_vm0, %v3010_v35  ;;  %2290 = vmatprep.subr.bf16.mxu0 %v3010_v35 }
 0x293   : > { %2291 = vmatpush3.bf16.msra.mxu0 %v2520_v20 }
 0x294   : > { %2292 = vmatprep.subr.bf16.mxu0 %v3010_v35 }
 0x297   : > { %2293 = vmatpush3.bf16.msra.mxu0 %v2521_v21 }
 0x298   : > { %2294 = vmatprep.subr.bf16.mxu0 %v3010_v35 }
 0x29b   : > { %2295 = vmatpush3.bf16.msra.mxu0 %v2522_v22 }
 0x29c   : > { %2296 = vmatprep.subr.bf16.mxu0 %v3010_v35 }
 0x29f   : > { %2297 = vmatpush3.bf16.msra.mxu0 %v2523_v23  ;;  %v2116_v23 = vld [vmem:[%s3783_s2] ss:$0 sm:$0xff] (!%p2115_p0) }
 0x2a0   : > { %2298 = vmatprep.subr.bf16.mxu0 %v3010_v35 }
 0x2a3   : > { %2299 = vmatpush3.bf16.msra.mxu0 %v2524_v24 }
 0x2a4   : > { %2300 = vmatprep.subr.bf16.mxu0 %v3010_v35 }
 0x2a7   : > { %2301 = vmatpush3.bf16.msra.mxu0 %v2525_v25  ;;  %v2117_v25 = vld [vmem:[%s3784_s21] ss:$0 sm:$0xff] (!%p2115_p0) }
 0x35d   : > { %v894_v43 = vpop.f32.mrb[0].mxu0 }
 0x35e   : > { %v896_v44 = vpop.f32.mrb[1].mxu0  ;;  %v943_v58 = vmul.f32 %v942_v53, %v894_v43 }
 0x35f   : > { %952 = vrot.lane.b32.xlu0 %v896_v44, %s3012_s27  ;;  %v898_v45 = vpop.f32.mrb[2].mxu0  ;;  %v951_v50 = vmul.f32 %v950_v47, %v896_v44  ;;  %v2532_v44 = vld [vmem:[#allocation14 + $0xc] ss:$16 sps:$4 sm:$0xff] (!%p2115_p0)   ;;  %v2536_v47 = vld [vmem:[#allocation14 + $0x24] ss:$16 sps:$4 sm:$0xff] (!%p2115_p0)  }
 0x360   : > { %v899_v46 = vpop.f32.mrb[3].mxu0  ;;  %v2534_v45 = vld [vmem:[#allocation14] ss:$16 sps:$4 sm:$0xff] (!%p2115_p0)  }
 0x361   : > { %v2535_v46 = vld [vmem:[#allocation14 + $0x8] ss:$16 sps:$4 sm:$0xff] (!%p2115_p0)  }
 0x362   : > { %v935_v61 = vpop.f32.mrb[0].mxu1 }
 0x363   : > { %944 = vrot.lane.b32.xlu0 %v894_v43, %s3012_s27  ;;  %v941_v62 = vpack.c.bf16 %v935_v61, %v935_v61  ;;  %v2272_v63 = vpop.f32.mrb[1].mxu1  ;;  %v2530_v43 = vld [vmem:[#allocation14 + $0x4] ss:$16 sps:$4 sm:$0xff] (!%p2115_p0)   ;;  %v2552_v61 = vld [vmem:[#allocation14 + $0x60] ss:$16 sps:$4 sm:$0xff] (!%p2115_p0)  }
 0x364   : > { %v938_v0 = vpop.f32.mrb[2].mxu1  ;;  %1422 = vmatprep.subr.bf16.mxu0 (!%p2115_p0), %v2530_v43  ;;  %v2554_v63 = vld [vmem:[#allocation14 + $0x84] ss:$16 sps:$4 sm:$0xff] (!%p2115_p0)   ;;  %v2593_v43 = vld [vmem:[#allocation15 + $0x98] sm:$0xff] (!%p2115_p0)  }
 0x365   : > { %v1020_v1 = vsel %vm1018_vm1, %v941_v62, 0  ;;  %v2273_v2 = vpop.f32.mrb[3].mxu1  ;;  %v2553_v62 = vld [vmem:[#allocation14 + $0x68] ss:$16 sps:$4 sm:$0xff] (!%p2115_p0)   ;;  %v2556_v0 = vld [vmem:[#allocation14 + $0x8c] ss:$16 sps:$4 sm:$0xff] (!%p2115_p0)  }
 0x366   : > { %v2559_v2 = vld [vmem:[#allocation14 + $0x88] ss:$16 sps:$4 sm:$0xff] (!%p2115_p0)  }
 0x3d1   : > { %v953_v49 = vpop.permute.xlu0 %952 }
 0x3d2   : > { %v955_v51 = vmul.f32 %v954_v48, %v953_v49  ;;  %v2538_v48 = vld [vmem:[#allocation14 + $0x2c] ss:$16 sps:$4 sm:$0xff] (!%p2115_p0)   ;;  %v2540_v49 = vld [vmem:[#allocation14 + $0x20] ss:$16 sps:$4 sm:$0xff] (!%p2115_p0)  }
 0x3d4   : > { %v956_v54 = vadd.f32 %v955_v51, %v951_v50  ;;  %v2541_v50 = vld [vmem:[#allocation14 + $0x28] ss:$16 sps:$4 sm:$0xff] (!%p2115_p0)   ;;  %v2542_v51 = vld [vmem:[#allocation14 + $0x44] ss:$16 sps:$4 sm:$0xff] (!%p2115_p0)  }
 0x3d5   : > { %v945_v55 = vpop.permute.xlu0 %944 }
 0x3d6   : > { %v957_v56 = vpack.c.bf16 %v956_v54, %v956_v54  ;;  %v947_v57 = vmul.f32 %v946_v52, %v945_v55  ;;  %v2544_v52 = vld [vmem:[#allocation14 + $0x4c] ss:$16 sps:$4 sm:$0xff] (!%p2115_p0)  }
 0x3d8   : > { %2275 = vmatpush3.bf16.xpose.msra.mxu1 %v957_v56  ;;  %v948_v59 = vadd.f32 %v947_v57, %v943_v58  ;;  %v2546_v57 = vld [vmem:[#allocation14 + $0x40] ss:$16 sps:$4 sm:$0xff] (!%p2115_p0)   ;;  %v2547_v58 = vld [vmem:[#allocation14 + $0x48] ss:$16 sps:$4 sm:$0xff] (!%p2115_p0)  }
 0x3d9   : > { %2280 = vmatprep.subr.bf16.mxu1 %v3010_v35 }
 0x3da   : > { %v949_v60 = vpack.c.bf16 %v948_v59, %v948_v59  ;;  %v2548_v59 = vld [vmem:[#allocation14 + $0x64] ss:$16 sps:$4 sm:$0xff] (!%p2115_p0)  }
 0x3df   : > { %2277 = vmatmul.mubr.bf16.vlgmr.msra.gmra.mrb[4].mxu1 %v949_v60  ;;  %v2550_v60 = vld [vmem:[#allocation14 + $0x6c] ss:$16 sps:$4 sm:$0xff] (!%p2115_p0)  }
 0x3e0   : > { %2282 = vmatprep.mubr.msk.bf16.mxu1 %vm3011_vm0, %v3010_v35  ;;  %2281 = vmatpush3.bf16.msra.mxu1 %v1020_v1  ;;  %v1176_v35 = vld [vmem:[%s567_s10] sm:$0xff] (!%p2115_p0) }
 0x3e1   : > { %1463 = vmatprep.subr.bf16.mxu1 (!%p2115_p0), %v2532_v44  ;;  %v2558_v1 = vld [vmem:[#allocation14 + $0x80] ss:$16 sps:$4 sm:$0xff] (!%p2115_p0)  }
 0x3e2   : > { %v2594_v44 = vld [vmem:[#allocation15 + $0x60] sm:$0xff] (!%p2115_p0)  }
 0x4b2   : > { %v992_v6 = vpop.f32.mrb[4].mxu1 }
 0x4b3   : > { %v1003_v7 = vsel %vm1002_vm2, -1e+30, %v992_v6  ;;  %v2278_v8 = vpop.f32.mrb[5].mxu1  ;;  %v2564_v6 = vld [vmem:[#allocation14 + $0xa0] ss:$16 sps:$4 sm:$0xff] (!%p2115_p0)  }
 0x4b4   : > { %v995_v9 = vpop.f32.mrb[6].mxu1  ;;  %v1005_v10 = vsel %vm1004_vm3, %v1003_v7, -inf  ;;  %v2566_v8 = vld [vmem:[#allocation14 + $0xc4] ss:$16 sps:$4 sm:$0xff] (!%p2115_p0)  }
 0x4b5   : > { %1006 = vmax.xlane.f32.xlu1 %v1005_v10  ;;  %v2279_v11 = vpop.f32.mrb[7].mxu1  ;;  %v2568_v9 = vld [vmem:[#allocation14 + $0xcc] ss:$16 sps:$4 sm:$0xff] (!%p2115_p0)   ;;  %v3013_v10 = vmov (!%p2115_p0), 0  }
 0x4b6   : > { %v2570_v11 = vld [vmem:[#allocation14 + $0xc0] ss:$16 sps:$4 sm:$0xff] (!%p2115_p0)  }
 0x542   : > { %v1007_v12 = vpop.xlane.xlu1 %1006 }
 0x543   : > { %v1008_v13 = vsub.f32 %v1003_v7, %v1007_v12  ;;  %v2565_v7 = vld [vmem:[#allocation14 + $0xa8] ss:$16 sps:$4 sm:$0xff] (!%p2115_p0)  }
 0x544   : > { %v2571_v12 = vld [vmem:[#allocation14 + $0xc8] ss:$16 sps:$4 sm:$0xff] (!%p2115_p0)  }
 0x545   : > { %v1009_v14 = vmul.f32 1.442695, %v1008_v13  ;;  %v2572_v13 = vld [vmem:[#allocation14 + $0xe4] ss:$16 sps:$4 sm:$0xff] (!%p2115_p0)  }
 0x547   : > { %2526 = vpow2.f32 %v1009_v14  ;;  %v2574_v14 = vld [vmem:[#allocation14 + $0xec] ss:$16 sps:$4 sm:$0xff] (!%p2115_p0)  }
 0x551   : > { %v2527_v15 = vpop.eup %2526 }
 0x552   : > { %v1011_v16 = vsel %vm1004_vm3, %v2527_v15, 0.0  ;;  %v1014_v17 = vpack.c.bf16 %v2527_v15, %v2527_v15  ;;  %v2576_v15 = vld [vmem:[#allocation14 + $0xe0] ss:$16 sps:$4 sm:$0xff] (!%p2115_p0)  }
 0x553   : > { %1012 = vadd.xlane.f32.xlu1 %v1011_v16  ;;  %v2577_v16 = vld [vmem:[#allocation14 + $0xe8] ss:$16 sps:$4 sm:$0xff] (!%p2115_p0)  }
 0x554   : > { %2283 = vmatmul.mubr.msk.bf16.vlgmr.msra.gmra.mrb[8].mxu1 %vm1004_vm3, %v1014_v17  ;;  %v2578_v17 = vld [vmem:[#allocation15 + $0x40] sm:$0xff] (!%p2115_p0)  }
 0x555   : > { %1464 = vmatpush1.bf16.msra.mxu1 (!%p2115_p0), %v2535_v46  ;;  %1495 = vmatprep.mubr.bf16.mxu1 (!%p2115_p0), %v3013_v10  ;;  %v2596_v46 = vld [vmem:[#allocation15 + $0x20] sm:$0xff] (!%p2115_p0)  }
 0x556   : > { %1465 = vmatprep.subr.bf16.mxu1 (!%p2115_p0), %v2538_v48  ;;  %v2598_v48 = vld [vmem:[#allocation15 + $0x68] sm:$0xff] (!%p2115_p0)  }
 0x559   : > { %1466 = vmatpush1.bf16.msra.mxu1 (!%p2115_p0), %v2541_v50  ;;  %v2600_v50 = vld [vmem:[#allocation15 + $0x28] sm:$0xff] (!%p2115_p0)  }
 0x55a   : > { %1467 = vmatprep.subr.bf16.mxu1 (!%p2115_p0), %v2544_v52  ;;  %v2602_v52 = vld [vmem:[#allocation15 + $0x70] sm:$0xff] (!%p2115_p0)  }
 0x55d   : > { %1468 = vmatpush1.bf16.msra.mxu1 (!%p2115_p0), %v2547_v58  ;;  %v2608_v58 = vld [vmem:[#allocation15 + $0x38] sm:$0xff] (!%p2115_p0)  }
 0x55e   : > { %1469 = vmatprep.subr.bf16.mxu1 (!%p2115_p0), %v2550_v60  ;;  %v1244_v60 = vsub.s32 (!%p2115_p0), 0, %v3563_v4 }
 0x561   : > { %1470 = vmatpush1.bf16.msra.mxu1 (!%p2115_p0), %v2553_v62  ;;  %v1240_v62 = vld [vmem:[%s3785_s14] sm:$0xf] (!%p2115_p0) }
 0x562   : > { %1471 = vmatprep.subr.bf16.mxu1 (!%p2115_p0), %v2556_v0  ;;  %v1256_v0 = vsub.s32 (!%p2115_p0), 3, %v3563_v4 }
 0x565   : > { %1472 = vmatpush1.bf16.msra.mxu1 (!%p2115_p0), %v2559_v2 }
 0x566   : > { %1473 = vmatprep.subr.bf16.mxu1 (!%p2115_p0), %v2562_v5  ;;  %v1257_v5 = vrot.slane (!%p2115_p0), %v1240_v62, %v1256_v0 }
 0x569   : > { %1474 = vmatpush1.bf16.msra.mxu1 (!%p2115_p0), %v2565_v7 }
 0x56a   : > { %1475 = vmatprep.subr.bf16.mxu1 (!%p2115_p0), %v2568_v9 }
 0x56d   : > { %1476 = vmatpush1.bf16.msra.mxu1 (!%p2115_p0), %v2571_v12 }
 0x56e   : > { %1477 = vmatprep.subr.bf16.mxu1 (!%p2115_p0), %v2574_v14 }
 0x571   : > { %1478 = vmatpush1.bf16.msra.mxu1 (!%p2115_p0), %v2577_v16 }
 0x572   : > { %2232 = vmatprep.subr.bf16.mxu1 (!%p2115_p0), %v2579_v18 }
 0x5e0   : > { %v1013_v26 = vpop.xlane.xlu1 %1012 }
 0x5e1   : > { %2528 = vrcp.f32 %v1013_v26 }
 0x5eb   : > { %v2529_v27 = vpop.eup %2528 }
 0x627   : > { %v1056_v28 = vpop.f32.mrb[8].mxu1 }
 0x628   : > { %v1063_v29 = vmul.f32 %v2529_v27, %v1056_v28  ;;  %v2284_v30 = vpop.f32.mrb[9].mxu1  ;;  %v2580_v28 = vld [vmem:[#allocation15] sm:$0xff] (!%p2115_p0)  }
 0x629   : > { %v1059_v31 = vpop.f32.mrb[10].mxu1 }
 0x62a   : > { %v1065_v32 = vpack.c.bf16 %v1063_v29, %v1063_v29  ;;  %v2285_v33 = vpop.f32.mrb[11].mxu1  ;;  %v2581_v29 = vld [vmem:[#allocation15 + $0x80] sm:$0xff] (!%p2115_p0)   ;;  %v2582_v31 = vld [vmem:[#allocation15 + $0x48] sm:$0xff] (!%p2115_p0)  }
 0x62b   : > { %v2584_v33 = vld [vmem:[#allocation15 + $0x8] sm:$0xff] (!%p2115_p0)  }
 0x62c   : > { %2303 = vmatmul.mubr.bf16.vlgmr.msra.gmra.mrb[4].mxu0 %v1065_v32  ;;  %v2583_v32 = vld [vmem:[#allocation15 + $0xc8] sm:$0xff] (!%p2115_p0)  }
 0x62d   : > { %1423 = vmatpush1.bf16.msra.mxu0 (!%p2115_p0), %v2534_v45  ;;  %1454 = vmatprep.mubr.bf16.mxu0 (!%p2115_p0), %v3013_v10  ;;  %v2595_v45 = vld [vmem:[#allocation15 + $0xe0] sm:$0xff] (!%p2115_p0)  }
 0x62e   : > { %1424 = vmatprep.subr.bf16.mxu0 (!%p2115_p0), %v2536_v47  ;;  %v2597_v47 = vld [vmem:[#allocation15 + $0xa0] sm:$0xff] (!%p2115_p0)  }
 0x631   : > { %1425 = vmatpush1.bf16.msra.mxu0 (!%p2115_p0), %v2540_v49  ;;  %v2599_v49 = vld [vmem:[#allocation15 + $0xe8] sm:$0xff] (!%p2115_p0)  }
 0x632   : > { %1426 = vmatprep.subr.bf16.mxu0 (!%p2115_p0), %v2542_v51  ;;  %v2601_v51 = vld [vmem:[#allocation15 + $0xa8] sm:$0xff] (!%p2115_p0)  }
 0x635   : > { %1427 = vmatpush1.bf16.msra.mxu0 (!%p2115_p0), %v2546_v57  ;;  %v2607_v57 = vld [vmem:[#allocation15 + $0xf8] sm:$0xff] (!%p2115_p0)  }
 0x636   : > { %1428 = vmatprep.subr.bf16.mxu0 (!%p2115_p0), %v2548_v59  ;;  %v2609_v59 = vld [vmem:[#allocation15 + $0xb8] sm:$0xff] (!%p2115_p0)  }
 0x639   : > { %1429 = vmatpush1.bf16.msra.mxu0 (!%p2115_p0), %v2552_v61  ;;  %v1252_v61 = vsub.s32 (!%p2115_p0), 2, %v3563_v4 }
 0x63a   : > { %1430 = vmatprep.subr.bf16.mxu0 (!%p2115_p0), %v2554_v63  ;;  %v1248_v63 = vsub.s32 (!%p2115_p0), 1, %v3563_v4 }
 0x63b   : > { %v1253_v2 = vrot.slane (!%p2115_p0), %v1240_v62, %v1252_v61 }
 0x63d   : > { %1431 = vmatpush1.bf16.msra.mxu0 (!%p2115_p0), %v2558_v1  ;;  %v1245_v1 = vrot.slane (!%p2115_p0), %v1240_v62, %v1244_v60 }
 0x63e   : > { %1432 = vmatprep.subr.bf16.mxu0 (!%p2115_p0), %v2560_v3  ;;  %v1249_v3 = vrot.slane (!%p2115_p0), %v1240_v62, %v1248_v63 }
 0x641   : > { %1433 = vmatpush1.bf16.msra.mxu0 (!%p2115_p0), %v2564_v6 }
 0x642   : > { %1434 = vmatprep.subr.bf16.mxu0 (!%p2115_p0), %v2566_v8 }
 0x645   : > { %1435 = vmatpush1.bf16.msra.mxu0 (!%p2115_p0), %v2570_v11 }
 0x646   : > { %1436 = vmatprep.subr.bf16.mxu0 (!%p2115_p0), %v2572_v13 }
 0x649   : > { %1437 = vmatpush1.bf16.msra.mxu0 (!%p2115_p0), %v2576_v15 }
 0x64a   : > { %2210 = vmatprep.subr.bf16.mxu0 (!%p2115_p0), %v2578_v17 }
 0x6fc   : > { %1175 = sbr.rel (%p2115_p0) target bundleno = 2575 (0xa0f), region = 120 }
 0x6ff   : > { %v1164_v36 = vpop.f32.mrb[4].mxu0 }
 0x700   : > { %v1170_v37 = vadd.f32 %v1164_v36, %v1064_v34  ;;  %v2304_v38 = vpop.f32.mrb[5].mxu0  ;;  %v2585_v34 = vld [vmem:[#allocation15 + $0x88] sm:$0xff] (!%p2115_p0)   ;;  %v2586_v36 = vld [vmem:[#allocation15 + $0x50] sm:$0xff] (!%p2115_p0)  }
 0x701   : > { %v1167_v39 = vpop.f32.mrb[6].mxu0  ;;  %v2588_v38 = vld [vmem:[#allocation15 + $0x10] sm:$0xff] (!%p2115_p0)  }
 0x702   : > { %1171 = vst [vmem:[#allocation3] sm:$0xff] %v1170_v37  ;;  %v2305_v40 = vpop.f32.mrb[7].mxu0  ;;  %v2587_v37 = vld [vmem:[#allocation15 + $0xd0] sm:$0xff] (!%p2115_p0)  }
 0x703   : > { %v2589_v39 = vld [vmem:[#allocation15 + $0x90] sm:$0xff]   ;;  %v2590_v40 = vld [vmem:[#allocation15 + $0x58] sm:$0xff]  }
 0x709   : > { %v1177_v41 = vld [vmem:[#allocation3] sm:$0xff] }
 0x70a   : > { %v3587_v42 = vadd.f32 %v1177_v41, %v1176_v35  ;;  %v2591_v35 = vld [vmem:[#allocation15 + $0xd8] sm:$0xff]  }
 0x70b   : > { %v2592_v41 = vld [vmem:[#allocation15 + $0x18] sm:$0xff]  }
 0x70c   : > { %1181 = vadd.xlane.f32.xlu0 %v3587_v42 }
 0x799   : > { %v1182_v53 = vpop.xlane.xlu0 %1181 }
 0x79a   : > { %v1184_v54 = vmul.f32 0.0078125, %v1182_v53  ;;  %v2603_v53 = vld [vmem:[#allocation15 + $0xf0] sm:$0xff]  }
 0x79c   : > { %v1185_v55 = vsub.f32 %v3587_v42, %v1184_v54  ;;  %v2604_v54 = vld [vmem:[#allocation15 + $0x30] sm:$0xff]  }
 0x79e   : > { %v1186_v56 = vmul.f32 %v1185_v55, %v1185_v55 }
 0x7a0   : > { %1187 = vadd.xlane.f32.xlu0 %v1186_v56  ;;  %v2606_v56 = vld [vmem:[#allocation15 + $0x78] sm:$0xff]  }
 0x82d   : > { %v1188_v19 = vpop.xlane.xlu0 %1187 }
 0x82e   : > { %v1189_v20 = vmul.f32 0.0078125, %v1188_v19 }
 0x830   : > { %v1190_v21 = vadd.f32 1e-05, %v1189_v20 }
 0x832   : > { %2610 = vrsqrt.f32 %v1190_v21 }
 0x83c   : > { %v2611_v22 = vpop.eup %2610 }
 0x83d   : > { %v1192_v24 = vmul.f32 %v2611_v22, %v1185_v55  ;;  %v2605_v55 = vld [vmem:[#allocation15 + $0xb0] sm:$0xff]  }
 0x83f   : > { %v1199_v26 = vmul.f32 %v2116_v23, %v1192_v24 }
 0x841   : > { %v1206_v27 = vadd.f32 %v2117_v25, %v1199_v26 }
 0x843   : > { %v1207_v30 = vpack.c.bf16 %v1206_v27, %v1206_v27 }
 0x845   : > { %1455 = vmatmul.mubr.bf16.vlgmr.msra.gmra.mrb[0].mxu0 %v1207_v30  ;;  %1496 = vmatmul.mubr.bf16.vlgmr.msra.gmra.mrb[0].mxu1 %v1207_v30 }
 0x846   : > { %2211 = vmatpush3.bf16.msra.mxu0 %v2580_v28  ;;  %2233 = vmatpush3.bf16.msra.mxu1 %v2581_v29 }
 0x847   : > { %2212 = vmatprep.subr.bf16.mxu0 %v2582_v31  ;;  %2234 = vmatprep.subr.bf16.mxu1 %v2583_v32 }
 0x84a   : > { %2213 = vmatpush3.bf16.msra.mxu0 %v2584_v33  ;;  %2235 = vmatpush3.bf16.msra.mxu1 %v2585_v34 }
 0x84b   : > { %2214 = vmatprep.subr.bf16.mxu0 %v2586_v36  ;;  %2236 = vmatprep.subr.bf16.mxu1 %v2587_v37 }
 0x84e   : > { %2215 = vmatpush3.bf16.msra.mxu0 %v2588_v38  ;;  %2237 = vmatpush3.bf16.msra.mxu1 %v2589_v39 }
 0x84f   : > { %2216 = vmatprep.subr.bf16.mxu0 %v2590_v40  ;;  %2238 = vmatprep.subr.bf16.mxu1 %v2591_v35 }
 0x852   : > { %2217 = vmatpush3.bf16.msra.mxu0 %v2592_v41  ;;  %2239 = vmatpush3.bf16.msra.mxu1 %v2593_v43 }
 0x853   : > { %2218 = vmatprep.subr.bf16.mxu0 %v2594_v44  ;;  %2240 = vmatprep.subr.bf16.mxu1 %v2595_v45  ;;  %v2150_v44 = vld [vmem:[%s3786_s24] ss:$0 sm:$0xff] }
 0x856   : > { %2219 = vmatpush3.bf16.msra.mxu0 %v2596_v46  ;;  %2241 = vmatpush3.bf16.msra.mxu1 %v2597_v47 }
 0x857   : > { %2220 = vmatprep.subr.bf16.mxu0 %v2598_v48  ;;  %2242 = vmatprep.subr.bf16.mxu1 %v2599_v49 }
 0x85a   : > { %2221 = vmatpush3.bf16.msra.mxu0 %v2600_v50  ;;  %2243 = vmatpush3.bf16.msra.mxu1 %v2601_v51 }
 0x85b   : > { %2222 = vmatprep.subr.bf16.mxu0 %v2602_v52  ;;  %2244 = vmatprep.subr.bf16.mxu1 %v2603_v53 }
 0x85e   : > { %2223 = vmatpush3.bf16.msra.mxu0 %v2604_v54  ;;  %2245 = vmatpush3.bf16.msra.mxu1 %v2605_v55 }
 0x85f   : > { %2224 = vmatprep.subr.bf16.mxu0 %v2606_v56  ;;  %2246 = vmatprep.subr.bf16.mxu1 %v2607_v57 }
 0x862   : > { %2225 = vmatpush3.bf16.msra.mxu0 %v2608_v58  ;;  %2247 = vmatpush3.bf16.msra.mxu1 %v2609_v59 }
 0x918   : > { %v1456_v6 = vpop.f32.mrb[0].mxu0  ;;  %v1497_v7 = vpop.f32.mrb[0].mxu1 }
 0x919   : > { %v1457_v8 = vadd.f32 %v1456_v6, %v1245_v1  ;;  %v1498_v9 = vadd.f32 %v1497_v7, %v1253_v2  ;;  %v1458_v10 = vpop.f32.mrb[1].mxu0  ;;  %v1499_v11 = vpop.f32.mrb[1].mxu1 }
 0x91a   : > { %v1459_v12 = vadd.f32 %v1458_v10, %v1249_v3  ;;  %v1500_v13 = vadd.f32 %v1499_v11, %v1257_v5  ;;  %v1460_v14 = vpop.f32.mrb[2].mxu0  ;;  %v1501_v15 = vpop.f32.mrb[2].mxu1 }
 0x91b   : > { %v1508_v16 = vmul.f32 0.70710677, %v1457_v8  ;;  %v1510_v17 = vmul.f32 0.70710677, %v1498_v9  ;;  %v1461_v4 = vpop.f32.mrb[3].mxu0  ;;  %v1502_v20 = vpop.f32.mrb[3].mxu1 }
 0x91c   : > { %v1509_v18 = vmul.f32 0.70710677, %v1459_v12  ;;  %v1511_v19 = vmul.f32 0.70710677, %v1500_v13  ;;  %v1504_v25 = vmul.f32 0.5, %v1457_v8  ;;  %v1506_v28 = vmul.f32 0.5, %v1498_v9 }
 0x91d   : > { %2612 = verf.f32 %v1508_v16  ;;  %v1505_v29 = vmul.f32 0.5, %v1459_v12  ;;  %v1507_v32 = vmul.f32 0.5, %v1500_v13 }
 0x91e   : > { %2614 = verf.f32 %v1510_v17 }
 0x91f   : > { %2616 = verf.f32 %v1509_v18 }
 0x920   : > { %2618 = verf.f32 %v1511_v19 }
 0x927   : > { %v2613_v21 = vpop.eup %2612 }
 0x928   : > { %v2615_v22 = vpop.eup %2614  ;;  %v1516_v23 = vadd.f32 1.0, %v2613_v21 }
 0x929   : > { %v2617_v24 = vpop.eup %2616  ;;  %v1518_v26 = vadd.f32 1.0, %v2615_v22 }
 0x92a   : > { %v2619_v27 = vpop.eup %2618  ;;  %v1517_v30 = vadd.f32 1.0, %v2617_v24  ;;  %v1520_v31 = vmul.f32 %v1516_v23, %v1504_v25 }
 0x92b   : > { %v1519_v33 = vadd.f32 1.0, %v2619_v27  ;;  %v1522_v34 = vmul.f32 %v1518_v26, %v1506_v28 }
 0x92c   : > { %v1521_v36 = vmul.f32 %v1517_v30, %v1505_v29  ;;  %v1524_v39 = vpack.c.bf16 %v1520_v31, %v1520_v31 }
 0x92d   : > { %v1523_v37 = vmul.f32 %v1519_v33, %v1507_v32  ;;  %v1526_v35 = vpack.c.bf16 %v1522_v34, %v1522_v34 }
 0x92e   : > { %v1525_v38 = vpack.c.bf16 %v1521_v36, %v1521_v36 }
 0x92f   : > { %v1527_v40 = vpack.c.bf16 %v1523_v37, %v1523_v37 }
 0x930   : > { %1823 = vmatprep.mubr.bf16.mxu0 %v1525_v38 }
 0x931   : > { %1863 = vmatprep.mubr.bf16.mxu1 %v1527_v40  ;;  %1824 = vmatmul.mubr.bf16.vlgmr.msra.gmra.mrb[4].mxu0 %v1524_v39 }
 0x932   : > { %1864 = vmatmul.mubr.bf16.vlgmr.msra.gmra.mrb[4].mxu1 %v1526_v35 }
 0xa04   : > { %v2226_v41 = vpop.f32.mrb[4].mxu0 }
 0xa05   : > { %v2248_v43 = vpop.f32.mrb[4].mxu1  ;;  %v2227_v45 = vpop.f32.mrb[5].mxu0 }
 0xa06   : > { %v2228_v46 = vadd.f32 %v2227_v45, %v2226_v41  ;;  %v2249_v47 = vpop.f32.mrb[5].mxu1  ;;  %v2229_v48 = vpop.f32.mrb[6].mxu0 }
 0xa07   : > { %v2250_v49 = vadd.f32 %v2249_v47, %v2248_v43  ;;  %v2251_v50 = vpop.f32.mrb[6].mxu1  ;;  %v2230_v51 = vpop.f32.mrb[7].mxu0 }
 0xa08   : > { %v1826_v52 = vadd.f32 %v2228_v46, %v2150_v44  ;;  %v2252_v53 = vpop.f32.mrb[7].mxu1 }
 0xa0a   : > { %v1866_v54 = vadd.f32 %v2250_v49, %v1826_v52 }
 0xa0c   : > { %v1871_v55 = vadd.f32 %v1866_v54, %v3587_v42 }
 0xa0e   : > { %1872 = vst [vmem:[%s661_s23] sm:$0xff] %v1871_v55 }
 0xa0f PF: > { %s3787_s19 = sld [smem:[#allocation28_spill]]  ;;  %s3788_s30 = sld [smem:[#allocation46_spill]] }
 0xa10   : > { %s1887_s10 = sshll.u32 %s661_s23, 4  ;;  %s1874_s17 = scalar_lea.sflag [#allocation6], %s565_s15  ;;  %s1888_s10 = int_to_ptr.vmem [resolvable:$true] %s1887_s10 }
 0xa11   : > { %s2850_s2 = scalar_lea.vmem %s1888_s10, 128  ;;  %p3789_p2 = scmp.ne.s32.totalorder %s3749_s1, 0 }
 0xa12   : > { %p2851_p12 = scmp.ne.s32.totalorder %s1888_s10, %s2850_s2  ;;  %s3014_s12 = smov [#allocation16]  }
 0xa13   : > { %s2854_s9 = sshll.u32 %s3014_s12, 4  ;;  %s2855_s9 = int_to_ptr.vmem [resolvable:$false] %s2854_s9 }
 0xa14   : > { %p2852_p4 = pnand %p2851_p12, %p3789_p2  ;;  %s2856_s21 = scalar_lea.vmem %s2855_s9, 256 }
 0xa15   : > { %s2184_s27 = sshll.u32 %s3787_s19, 7  ;;  %p2857_p1 = scmp.lt.s32.totalorder %s1888_s10, %s2855_s9 }
 0xa16   : > { %s3614_s7 = scalar_lea.hbm %s3788_s30, %s2184_s27  ;;  %p2853_p13 = pneg %p2852_p4 }
 0xa17   : > { %p2858_p3 = scmp.lt.s32.totalorder %s2856_s21, %s2850_s2 }
 0xa19   : > { %p2859_p5 = por %p2858_p3, %p2857_p1 }
 0xa1b   : > { %p2860_p10 = pnand %p2859_p5, %p2853_p13 }
 0xa1d   : > { %2863 = shalt.err (!%p2860_p10)
}
 0xa1e   : > { %s2864_s15 = scalar_lea.hbm %s3614_s7, 128  ;;  %s2868_s8 = scalar_lea.hbm %s3788_s30, 256 }
 0xa1f   : > { %p2865_p6 = scmp.ne.s32.totalorder %s3614_s7, %s2864_s15  ;;  %p2869_p7 = scmp.lt.u32.totalorder %s3614_s7, %s3788_s30 }
 0xa20   : > { %p2870_p8 = scmp.lt.u32.totalorder %s2868_s8, %s2864_s15  ;;  %p2872_p12 = scmp.lt.u32.totalorder %s2864_s15, %s3614_s7 }
 0xa21   : > { %p2866_p9 = pnand %p2865_p6, %p3789_p2 }
 0xa22   : > { %p2871_p0 = por %p2870_p8, %p2869_p7 }
 0xa23   : > { %p2867_p11 = pneg %p2866_p9 }
 0xa24   : > { %p2873_p4 = por %p2872_p12, %p2871_p0 }
 0xa26   : > { %p2874_p13 = pnand %p2873_p4, %p2867_p11 }
 0xa28   : > { %2877 = shalt.err (!%p2874_p13)
}
 0xa29   : > { %2335 = dma.vmem_to_hbm [thread:$0]  (%p3789_p2), %s1888_s10, 128, %s3614_s7, %s1874_s17  }
 0xa2a PF: > { %s3790_s0 = sld [smem:[#allocation25_spill]]  ;;  %s3791_s16 = sld [smem:[#allocation35_spill]] }
 0xa2b   : > { %p2378_p1 = scmp.ge.s32.totalorder %s2992_s28, 2 }
 0xa30   : > { %s1899_s24 = sand.u32 1, %s3790_s0   ;;  %p3792_p3 = scmp.ne.s32.totalorder %s3791_s16, 0 }
 0xa31   : > { %s1900_s19 = scalar_lea.sflag [#allocation6], %s1899_s24 }
 0xa32   : > { %p2364_p5 = pnand %p2378_p1, %p3792_p3 }
 0xa34   : > { %2947 = dma.done.wait (!%p2364_p5), %s1900_s19, 128  }
 0xa35   : > { %2949 = vsyncadd (!%p2364_p5), %s1900_s19, 4294967168  ;;  %s33_s28 = sadd.s32 1, %s2992_s28   ;;  %s3793_s18 = sld [smem:[#allocation24_spill]] }
 0xa36   : > { %p30_p10 = scmp.ge.s32.totalorder %s33_s28, 10   ;;  %s3794_s27 = sld [smem:[#allocation32_spill]] }
 0xa37   : > { %s3795_s1 = sld [smem:[#allocation26_spill]]  ;;  %s3796_s23 = sld [smem:[#allocation33_spill]] }
 0xa38   : > { %s3797_s25 = sld [smem:[#allocation29_spill]]  ;;  %s3798_s7 = sld [smem:[#allocation30_spill]] }
 0xa39   : > { %s3799_s10 = sld [smem:[#allocation31_spill]]  ;;  %s3800_s19 = smov %s2960_s20 }
 0xa3a   : > { %s3802_s21 = smov %s2968_s22  ;;  %s3804_s24 = smov %s2984_s26 }
 0xa3b   :  { %32 = sbr.rel (!%p30_p10) target bundleno = 23 (0x17), region = 175 }
 0xa3c   : > { %s3801_s20 = smov %s3794_s27 }
 0xa3d   : > { %s3803_s22 = smov %s3795_s1 }
 0xa3e   : > { %s3805_s26 = smov %s3798_s7 }
 0xa3f   : > { %s3806_s27 = smov %s3799_s10 }
 0xa42   :  { %1905 = vsyncpa [#allocation5], 1 }
 0xa43   :  { %1907 = vsyncpa [#allocation5 + $0x1], 1 }
 0xa44   :  { %1908 = vsyncpa [#allocation8], 1 }
 0xa45   :  { %1909 = vsyncpa [#allocation11], 1 }
 0xa46   :  { %1910 = vsyncpa [#allocation6], 1 }
 0xa47   :  { %1912 = vsyncpa [#allocation6 + $0x1], 1 }

</bundles_post_ra>
